<compile_context>
chip_gen: v6e
topology: v6e:2x2x1
jax: 0.10.0
libtpu: 0.0.40
codegen_flags: <defaults>
</compile_context>

<pallas_src>
import functools

import jax
import jax.numpy as jnp
import numpy as np
from jax.experimental import pallas as pl
from jax.experimental.pallas import tpu as pltpu


def _round_up(x, m):
    return (x + m - 1) // m * m


def _conv_block_kernel(x_ref, w_ref, mask_ref, b_ref, gred_ref, gbc_ref,
                       eg_ref, eb_ref, o_ref, *, hw, wp, m, gn_eps):
    # x_ref:    (1, S, Cin)   padded, spatially-flattened input (f32), S = (H+2)*(W+2)
    # w_ref:    (9, Cin, CT)  weight-standardized conv taps (bf16), tap t = dy*3 + dx
    # mask_ref: (1, M)        1.0 on valid output rows, 0.0 on "wrap" rows
    # b_ref:    (1, 1, CT)    conv bias
    # gred_ref: (1, CT, GP)   channel->group reduce matrix (includes 1/(H*W*cg))
    # gbc_ref:  (1, GP, CT)   group->channel broadcast matrix
    # eg_ref:   (1, 1, CT)    gamma * (scale + 1)
    # eb_ref:   (1, 1, CT)    beta * (scale + 1) + shift
    # o_ref:    (1, M, CT)
    ct = o_ref.shape[-1]
    del ct  # (shape only used implicitly via broadcasting)

    # --- 3x3 conv as 9 shifted (M, Cin) @ (Cin, CT) MXU matmuls, bf16 in / f32 acc ---
    y = None
    for t in range(9):
        dy, dx = t // 3, t % 3
        start = dy * wp + dx                                  # static offset
        xs = x_ref[0, start:start + m, :].astype(jnp.bfloat16)
        part = jnp.dot(xs, w_ref[t], preferred_element_type=jnp.float32)
        y = part if y is None else y + part                   # (M, CT) f32

    # --- GroupNorm: two-pass (centered) stats, spatial reduce on the MXU via mask row ---
    mask = mask_ref[...]                                      # (1, M) f32
    b = b_ref[0]                                              # (1, CT)
    red = gred_ref[0]                                         # (CT, GP)
    bc = gbc_ref[0]                                           # (GP, CT)

    sum_c = jnp.dot(mask, y, preferred_element_type=jnp.float32) + hw * b
    mean_c = jnp.dot(jnp.dot(sum_c, red, preferred_element_type=jnp.float32), bc,
                     preferred_element_type=jnp.float32)      # per-channel group mean

    y0 = y + (b - mean_c)                                     # centered (conv + bias)
    ssq_c = jnp.dot(mask, y0 * y0, preferred_element_type=jnp.float32)
    var_c = jnp.dot(jnp.dot(ssq_c, red, preferred_element_type=jnp.float32), bc,
                    preferred_element_type=jnp.float32)       # per-channel group variance

    a = jax.lax.rsqrt(var_c + gn_eps) * eg_ref[0]             # inv_std * gamma * (scale+1)
    z = y0 * a + eb_ref[0]                                    # full affine, one mul + one add
    o_ref[0] = (z * jax.nn.sigmoid(z)).astype(o_ref.dtype)    # SiLU


def conv_block_forward(x_nchw, params, scale_shift=None, groups=8):
    """Forward pass of conv_block. x_nchw: (N, Cin, H, W) float32. Returns NCHW."""
    N, Cin, H, W = x_nchw.shape
    w = params["w"]          # (Cout, Cin, 3, 3), OIHW like PyTorch
    b = params["b"]          # (Cout,)
    gamma = params["gamma"]  # (Cout,)
    beta = params["beta"]    # (Cout,)
    Cout = w.shape[0]
    assert Cout % groups == 0
    cg = Cout // groups

    Hp, Wp = H + 2, W + 2
    S = Hp * Wp
    M = (H - 1) * Wp + W          # rows of conv output we compute (includes wrap rows)
    HW = H * W

    # --- weight standardization (tiny parameter-side reduction; plain JAX glue) ---
    ws_eps = 1e-5 if x_nchw.dtype == jnp.float32 else 1e-4   # matches the PyTorch module
    w_mean = jnp.mean(w, axis=(1, 2, 3), keepdims=True)
    w_var = jnp.var(w, axis=(1, 2, 3), keepdims=True)        # unbiased=False
    w_norm = (w - w_mean) * jax.lax.rsqrt(w_var + ws_eps)

    # --- Cout padding / tiling (lane-dense output, VMEM-bounded blocks) ---
    Coutp = _round_up(Cout, 128)
    if Coutp > 128 and (Cout % 128 == 0) and (128 % cg == 0):
        CT = 128                   # whole groups fit in each Cout tile
    else:
        CT = Coutp                 # single tile covering all (padded) channels
    ntiles = Coutp // CT

    # tap-major conv weights: (9, Cin, Coutp), bf16 for the MXU
    w_taps = jnp.transpose(w_norm, (2, 3, 1, 0)).reshape(9, Cin, Cout)
    w_taps = jnp.pad(w_taps, ((0, 0), (0, 0), (0, Coutp - Cout))).astype(jnp.bfloat16)

    # padded NHWC input, spatially flattened (no im2col); kept f32 so the unaligned
    # per-tap slices stay on the plain f32 load path (cast to bf16 in-register).
    x_nhwc = jnp.transpose(x_nchw, (0, 2, 3, 1))
    xp = jnp.pad(x_nhwc, ((0, 0), (1, 1), (1, 1), (0, 0)))
    x_flat = xp.reshape(N, S, Cin).astype(jnp.float32)

    # valid-row mask: flat row r maps to (y, x) = (r // Wp, r % Wp); x >= W are wrap rows
    r_idx = np.arange(M)
    mask = jnp.asarray(((r_idx % Wp) < W).astype(np.float32)[None, :])     # (1, M)

    # skinny group reduce / broadcast matrices (per Cout tile, stacked on a leading axis)
    gpt = (CT // cg) if ntiles > 1 else groups
    GP = _round_up(max(gpt, 1), 128)
    red_np = np.zeros((ntiles, CT, GP), np.float32)
    bc_np = np.zeros((ntiles, GP, CT), np.float32)
    for j in range(ntiles):
        for cl in range(CT):
            c = j * CT + cl
            if c < Cout:
                g_local = (c // cg) - j * (CT // cg)
                red_np[j, cl, g_local] = 1.0 / float(HW * cg)
                bc_np[j, g_local, cl] = 1.0
    gred = jnp.asarray(red_np)
    gbc = jnp.asarray(bc_np)

    # folded per-channel affine: (z_norm * gamma + beta) * (scale+1) + shift
    #   = z_norm * [gamma*(scale+1)] + [beta*(scale+1) + shift]
    bias_p = jnp.pad(b, (0, Coutp - Cout)).reshape(1, 1, Coutp).astype(jnp.float32)
    gamma_p = jnp.pad(gamma, (0, Coutp - Cout)).astype(jnp.float32)
    beta_p = jnp.pad(beta, (0, Coutp - Cout)).astype(jnp.float32)
    if scale_shift is None:
        eff_gamma = gamma_p.reshape(1, 1, Coutp)
        eff_beta = beta_p.reshape(1, 1, Coutp)
        per_batch = False
    else:
        sc, sh = scale_shift                              # (N, Cout, 1, 1)
        sc = jnp.pad(sc.reshape(N, Cout), ((0, 0), (0, Coutp - Cout))).astype(jnp.float32)
        sh = jnp.pad(sh.reshape(N, Cout), ((0, 0), (0, Coutp - Cout))).astype(jnp.float32)
        eff_gamma = (gamma_p[None, :] * (sc + 1.0)).reshape(N, 1, Coutp)
        eff_beta = (beta_p[None, :] * (sc + 1.0) + sh).reshape(N, 1, Coutp)
        per_batch = True

    def aff_idx(n, j):
        return (n if per_batch else 0, 0, j)

    kernel = functools.partial(_conv_block_kernel, hw=HW, wp=Wp, m=M, gn_eps=1e-5)

    out_flat = pl.pallas_call(
        kernel,
        out_shape=jax.ShapeDtypeStruct((N, M, Coutp), x_nchw.dtype),
        grid_spec=pltpu.PrefetchScalarGridSpec(
            num_scalar_prefetch=0,
            grid=(N, ntiles),
            in_specs=[
                pl.BlockSpec((1, S, Cin), lambda n, j: (n, 0, 0)),    # padded flat input
                pl.BlockSpec((9, Cin, CT), lambda n, j: (0, 0, j)),   # bf16 conv taps
                pl.BlockSpec((1, M), lambda n, j: (0, 0)),            # valid-row mask
                pl.BlockSpec((1, 1, CT), lambda n, j: (0, 0, j)),     # conv bias
                pl.BlockSpec((1, CT, GP), lambda n, j: (j, 0, 0)),    # group reduce
                pl.BlockSpec((1, GP, CT), lambda n, j: (j, 0, 0)),    # group broadcast
                pl.BlockSpec((1, 1, CT), aff_idx),                    # gamma*(scale+1)
                pl.BlockSpec((1, 1, CT), aff_idx),                    # beta*(scale+1)+shift
            ],
            out_specs=pl.BlockSpec((1, M, CT), lambda n, j: (n, 0, j)),
        ),
        compiler_params=pltpu.CompilerParams(
            dimension_semantics=("parallel", "parallel"),
            vmem_limit_bytes=32 * 1024 * 1024),
    )(x_flat, w_taps, mask, bias_p, gred, gbc, eff_gamma, eff_beta)

    # crop wrap rows / padded channels and go back to NCHW (layout glue)
    pad_rows = H * Wp - M                       # == Wp - W == 2
    out = jnp.pad(out_flat, ((0, 0), (0, pad_rows), (0, 0)))
    out = out.reshape(N, H, Wp, Coutp)[:, :, :W, :Cout]
    return jnp.transpose(out, (0, 3, 1, 2))


def _reference(x, params, scale_shift, groups=8):
    """Pure-JAX reference mirroring the PyTorch module (for correctness check)."""
    w, b = params["w"], params["b"]
    gamma, beta = params["gamma"], params["beta"]
    ws_eps = 1e-5
    m = jnp.mean(w, axis=(1, 2, 3), keepdims=True)
    v = jnp.var(w, axis=(1, 2, 3), keepdims=True)
    wn = (w - m) * jax.lax.rsqrt(v + ws_eps)
    y = jax.lax.conv_general_dilated(
        x, wn, window_strides=(1, 1), padding=((1, 1), (1, 1)),
        dimension_numbers=("NCHW", "OIHW", "NCHW"))
    y = y + b[None, :, None, None]
    N, C, H, W = y.shape
    cg = C // groups
    yg = y.reshape(N, groups, cg, H, W)
    gm = jnp.mean(yg, axis=(2, 3, 4), keepdims=True)
    gv = jnp.var(yg, axis=(2, 3, 4), keepdims=True)
    yn = ((yg - gm) * jax.lax.rsqrt(gv + 1e-5)).reshape(N, C, H, W)
    yn = yn * gamma[None, :, None, None] + beta[None, :, None, None]
    if scale_shift is not None:
        s, sh = scale_shift
        yn = yn * (s + 1.0) + sh
    return yn * jax.nn.sigmoid(yn)


if __name__ == "__main__":
    key = jax.random.PRNGKey(0)
    k1, k2, k3, k4, k5, k6 = jax.random.split(key, 6)
    N, Cin, Cout, H, W, G = 2, 4, 32, 16, 16, 8

    x = jax.random.normal(k1, (N, Cin, H, W), jnp.float32)
    params = dict(
        w=0.3 * jax.random.normal(k2, (Cout, Cin, 3, 3), jnp.float32),
        b=0.1 * jax.random.normal(k3, (Cout,), jnp.float32),
        gamma=1.0 + 0.1 * jax.random.normal(k4, (Cout,), jnp.float32),
        beta=0.1 * jax.random.normal(k5, (Cout,), jnp.float32),
    )
    k6a, k6b = jax.random.split(k6)
    scale = 0.1 * jax.random.normal(k6a, (N, Cout, 1, 1), jnp.float32)
    shift = 0.1 * jax.random.normal(k6b, (N, Cout, 1, 1), jnp.float32)

    # with scale/shift
    out = conv_block_forward(x, params, scale_shift=(scale, shift), groups=G)
    out = jax.block_until_ready(out)
    ref = _reference(x, params, (scale, shift), groups=G)
    # bf16 MXU operands -> bf16-level tolerance
    np.testing.assert_allclose(np.asarray(out), np.asarray(ref), rtol=2e-2, atol=2e-2)

    # without scale/shift (exercises the no-extra-inputs path)
    out2 = conv_block_forward(x, params, scale_shift=None, groups=G)
    out2 = jax.block_until_ready(out2)
    ref2 = _reference(x, params, None, groups=G)
    np.testing.assert_allclose(np.asarray(out2), np.asarray(ref2), rtol=2e-2, atol=2e-2)

    print("KERNEL_OK")
</pallas_src>

<mosaic_0001>
module attributes {stable_mosaic.version = 11 : i64} {
  func.func @_conv_block_kernel(%arg0: i32, %arg1: i32, %arg2: memref<1x324x4xf32, #tpu.memory_space<vmem>>, %arg3: memref<9x4x128xbf16, #tpu.memory_space<vmem>>, %arg4: memref<1x286xf32, #tpu.memory_space<vmem>>, %arg5: memref<1x1x128xf32, #tpu.memory_space<vmem>>, %arg6: memref<1x128x128xf32, #tpu.memory_space<vmem>>, %arg7: memref<1x128x128xf32, #tpu.memory_space<vmem>>, %arg8: memref<1x1x128xf32, #tpu.memory_space<vmem>>, %arg9: memref<1x1x128xf32, #tpu.memory_space<vmem>>, %arg10: memref<1x286x128xf32, #tpu.memory_space<vmem>>) attributes {dimension_semantics = [#tpu.dimension_semantics<parallel>, #tpu.dimension_semantics<parallel>], iteration_bounds = array<i64: 2, 1>, scalar_prefetch = 0 : i64, scratch_operands = 0 : i64, tpu.core_type = #tpu.core_type<tc>, window_params = [{transform_indices = @transform_0, window_bounds = array<i64: 1, 324, 4>}, {transform_indices = @transform_1, window_bounds = array<i64: 9, 4, 128>}, {pipeline_mode = #tpu.pipeline_mode<synchronous>, transform_indices = @transform_2, window_bounds = array<i64: 1, 286>}, {transform_indices = @transform_3, window_bounds = array<i64: 1, 1, 128>}, {transform_indices = @transform_4, window_bounds = array<i64: 1, 128, 128>}, {transform_indices = @transform_5, window_bounds = array<i64: 1, 128, 128>}, {transform_indices = @transform_6, window_bounds = array<i64: 1, 1, 128>}, {transform_indices = @transform_7, window_bounds = array<i64: 1, 1, 128>}, {transform_indices = @transform_8, window_bounds = array<i64: 1, 286, 128>}]} {
    %c0 = arith.constant 0 : index
    %c0_0 = arith.constant 0 : index
    %c0_1 = arith.constant 0 : index
    %0 = vector.load %arg2[%c0, %c0_0, %c0_1] : memref<1x324x4xf32, #tpu.memory_space<vmem>>, vector<1x286x4xf32>
    %1 = vector.shape_cast %0 : vector<1x286x4xf32> to vector<286x4xf32>
    %2 = arith.truncf %1 : vector<286x4xf32> to vector<286x4xbf16>
    %c0_2 = arith.constant 0 : index
    %c0_3 = arith.constant 0 : index
    %c0_4 = arith.constant 0 : index
    %3 = vector.load %arg3[%c0_2, %c0_3, %c0_4] : memref<9x4x128xbf16, #tpu.memory_space<vmem>>, vector<1x4x128xbf16>
    %4 = vector.shape_cast %3 : vector<1x4x128xbf16> to vector<4x128xbf16>
    %cst = arith.constant dense<0.000000e+00> : vector<286x128xf32>
    %5 = tpu.matmul %2, %4, %cst {dimension_numbers = #tpu.dot_dimension_numbers<[1], [0], [0], [1], [0, 0, 1, 1], [], []>} : vector<286x4xbf16>, vector<4x128xbf16>, vector<286x128xf32> -> vector<286x128xf32>
    %c0_5 = arith.constant 0 : index
    %c1 = arith.constant 1 : index
    %c0_6 = arith.constant 0 : index
    %6 = vector.load %arg2[%c0_5, %c1, %c0_6] : memref<1x324x4xf32, #tpu.memory_space<vmem>>, vector<1x286x4xf32>
    %7 = vector.shape_cast %6 : vector<1x286x4xf32> to vector<286x4xf32>
    %8 = arith.truncf %7 : vector<286x4xf32> to vector<286x4xbf16>
    %c1_7 = arith.constant 1 : index
    %c0_8 = arith.constant 0 : index
    %c0_9 = arith.constant 0 : index
    %9 = vector.load %arg3[%c1_7, %c0_8, %c0_9] : memref<9x4x128xbf16, #tpu.memory_space<vmem>>, vector<1x4x128xbf16>
    %10 = vector.shape_cast %9 : vector<1x4x128xbf16> to vector<4x128xbf16>
    %cst_10 = arith.constant dense<0.000000e+00> : vector<286x128xf32>
    %11 = tpu.matmul %8, %10, %cst_10 {dimension_numbers = #tpu.dot_dimension_numbers<[1], [0], [0], [1], [0, 0, 1, 1], [], []>} : vector<286x4xbf16>, vector<4x128xbf16>, vector<286x128xf32> -> vector<286x128xf32>
    %12 = arith.addf %5, %11 : vector<286x128xf32>
    %c0_11 = arith.constant 0 : index
    %c2 = arith.constant 2 : index
    %c0_12 = arith.constant 0 : index
    %13 = vector.load %arg2[%c0_11, %c2, %c0_12] : memref<1x324x4xf32, #tpu.memory_space<vmem>>, vector<1x286x4xf32>
    %14 = vector.shape_cast %13 : vector<1x286x4xf32> to vector<286x4xf32>
    %15 = arith.truncf %14 : vector<286x4xf32> to vector<286x4xbf16>
    %c2_13 = arith.constant 2 : index
    %c0_14 = arith.constant 0 : index
    %c0_15 = arith.constant 0 : index
    %16 = vector.load %arg3[%c2_13, %c0_14, %c0_15] : memref<9x4x128xbf16, #tpu.memory_space<vmem>>, vector<1x4x128xbf16>
    %17 = vector.shape_cast %16 : vector<1x4x128xbf16> to vector<4x128xbf16>
    %cst_16 = arith.constant dense<0.000000e+00> : vector<286x128xf32>
    %18 = tpu.matmul %15, %17, %cst_16 {dimension_numbers = #tpu.dot_dimension_numbers<[1], [0], [0], [1], [0, 0, 1, 1], [], []>} : vector<286x4xbf16>, vector<4x128xbf16>, vector<286x128xf32> -> vector<286x128xf32>
    %19 = arith.addf %12, %18 : vector<286x128xf32>
    %c0_17 = arith.constant 0 : index
    %c18 = arith.constant 18 : index
    %c0_18 = arith.constant 0 : index
    %20 = vector.load %arg2[%c0_17, %c18, %c0_18] : memref<1x324x4xf32, #tpu.memory_space<vmem>>, vector<1x286x4xf32>
    %21 = vector.shape_cast %20 : vector<1x286x4xf32> to vector<286x4xf32>
    %22 = arith.truncf %21 : vector<286x4xf32> to vector<286x4xbf16>
    %c3 = arith.constant 3 : index
    %c0_19 = arith.constant 0 : index
    %c0_20 = arith.constant 0 : index
    %23 = vector.load %arg3[%c3, %c0_19, %c0_20] : memref<9x4x128xbf16, #tpu.memory_space<vmem>>, vector<1x4x128xbf16>
    %24 = vector.shape_cast %23 : vector<1x4x128xbf16> to vector<4x128xbf16>
    %cst_21 = arith.constant dense<0.000000e+00> : vector<286x128xf32>
    %25 = tpu.matmul %22, %24, %cst_21 {dimension_numbers = #tpu.dot_dimension_numbers<[1], [0], [0], [1], [0, 0, 1, 1], [], []>} : vector<286x4xbf16>, vector<4x128xbf16>, vector<286x128xf32> -> vector<286x128xf32>
    %26 = arith.addf %19, %25 : vector<286x128xf32>
    %c0_22 = arith.constant 0 : index
    %c19 = arith.constant 19 : index
    %c0_23 = arith.constant 0 : index
    %27 = vector.load %arg2[%c0_22, %c19, %c0_23] : memref<1x324x4xf32, #tpu.memory_space<vmem>>, vector<1x286x4xf32>
    %28 = vector.shape_cast %27 : vector<1x286x4xf32> to vector<286x4xf32>
    %29 = arith.truncf %28 : vector<286x4xf32> to vector<286x4xbf16>
    %c4 = arith.constant 4 : index
    %c0_24 = arith.constant 0 : index
    %c0_25 = arith.constant 0 : index
    %30 = vector.load %arg3[%c4, %c0_24, %c0_25] : memref<9x4x128xbf16, #tpu.memory_space<vmem>>, vector<1x4x128xbf16>
    %31 = vector.shape_cast %30 : vector<1x4x128xbf16> to vector<4x128xbf16>
    %cst_26 = arith.constant dense<0.000000e+00> : vector<286x128xf32>
    %32 = tpu.matmul %29, %31, %cst_26 {dimension_numbers = #tpu.dot_dimension_numbers<[1], [0], [0], [1], [0, 0, 1, 1], [], []>} : vector<286x4xbf16>, vector<4x128xbf16>, vector<286x128xf32> -> vector<286x128xf32>
    %33 = arith.addf %26, %32 : vector<286x128xf32>
    %c0_27 = arith.constant 0 : index
    %c20 = arith.constant 20 : index
    %c0_28 = arith.constant 0 : index
    %34 = vector.load %arg2[%c0_27, %c20, %c0_28] : memref<1x324x4xf32, #tpu.memory_space<vmem>>, vector<1x286x4xf32>
    %35 = vector.shape_cast %34 : vector<1x286x4xf32> to vector<286x4xf32>
    %36 = arith.truncf %35 : vector<286x4xf32> to vector<286x4xbf16>
    %c5 = arith.constant 5 : index
    %c0_29 = arith.constant 0 : index
    %c0_30 = arith.constant 0 : index
    %37 = vector.load %arg3[%c5, %c0_29, %c0_30] : memref<9x4x128xbf16, #tpu.memory_space<vmem>>, vector<1x4x128xbf16>
    %38 = vector.shape_cast %37 : vector<1x4x128xbf16> to vector<4x128xbf16>
    %cst_31 = arith.constant dense<0.000000e+00> : vector<286x128xf32>
    %39 = tpu.matmul %36, %38, %cst_31 {dimension_numbers = #tpu.dot_dimension_numbers<[1], [0], [0], [1], [0, 0, 1, 1], [], []>} : vector<286x4xbf16>, vector<4x128xbf16>, vector<286x128xf32> -> vector<286x128xf32>
    %40 = arith.addf %33, %39 : vector<286x128xf32>
    %c0_32 = arith.constant 0 : index
    %c36 = arith.constant 36 : index
    %c0_33 = arith.constant 0 : index
    %41 = vector.load %arg2[%c0_32, %c36, %c0_33] : memref<1x324x4xf32, #tpu.memory_space<vmem>>, vector<1x286x4xf32>
    %42 = vector.shape_cast %41 : vector<1x286x4xf32> to vector<286x4xf32>
    %43 = arith.truncf %42 : vector<286x4xf32> to vector<286x4xbf16>
    %c6 = arith.constant 6 : index
    %c0_34 = arith.constant 0 : index
    %c0_35 = arith.constant 0 : index
    %44 = vector.load %arg3[%c6, %c0_34, %c0_35] : memref<9x4x128xbf16, #tpu.memory_space<vmem>>, vector<1x4x128xbf16>
    %45 = vector.shape_cast %44 : vector<1x4x128xbf16> to vector<4x128xbf16>
    %cst_36 = arith.constant dense<0.000000e+00> : vector<286x128xf32>
    %46 = tpu.matmul %43, %45, %cst_36 {dimension_numbers = #tpu.dot_dimension_numbers<[1], [0], [0], [1], [0, 0, 1, 1], [], []>} : vector<286x4xbf16>, vector<4x128xbf16>, vector<286x128xf32> -> vector<286x128xf32>
    %47 = arith.addf %40, %46 : vector<286x128xf32>
    %c0_37 = arith.constant 0 : index
    %c37 = arith.constant 37 : index
    %c0_38 = arith.constant 0 : index
    %48 = vector.load %arg2[%c0_37, %c37, %c0_38] : memref<1x324x4xf32, #tpu.memory_space<vmem>>, vector<1x286x4xf32>
    %49 = vector.shape_cast %48 : vector<1x286x4xf32> to vector<286x4xf32>
    %50 = arith.truncf %49 : vector<286x4xf32> to vector<286x4xbf16>
    %c7 = arith.constant 7 : index
    %c0_39 = arith.constant 0 : index
    %c0_40 = arith.constant 0 : index
    %51 = vector.load %arg3[%c7, %c0_39, %c0_40] : memref<9x4x128xbf16, #tpu.memory_space<vmem>>, vector<1x4x128xbf16>
    %52 = vector.shape_cast %51 : vector<1x4x128xbf16> to vector<4x128xbf16>
    %cst_41 = arith.constant dense<0.000000e+00> : vector<286x128xf32>
    %53 = tpu.matmul %50, %52, %cst_41 {dimension_numbers = #tpu.dot_dimension_numbers<[1], [0], [0], [1], [0, 0, 1, 1], [], []>} : vector<286x4xbf16>, vector<4x128xbf16>, vector<286x128xf32> -> vector<286x128xf32>
    %54 = arith.addf %47, %53 : vector<286x128xf32>
    %c0_42 = arith.constant 0 : index
    %c38 = arith.constant 38 : index
    %c0_43 = arith.constant 0 : index
    %55 = vector.load %arg2[%c0_42, %c38, %c0_43] : memref<1x324x4xf32, #tpu.memory_space<vmem>>, vector<1x286x4xf32>
    %56 = vector.shape_cast %55 : vector<1x286x4xf32> to vector<286x4xf32>
    %57 = arith.truncf %56 : vector<286x4xf32> to vector<286x4xbf16>
    %c8 = arith.constant 8 : index
    %c0_44 = arith.constant 0 : index
    %c0_45 = arith.constant 0 : index
    %58 = vector.load %arg3[%c8, %c0_44, %c0_45] : memref<9x4x128xbf16, #tpu.memory_space<vmem>>, vector<1x4x128xbf16>
    %59 = vector.shape_cast %58 : vector<1x4x128xbf16> to vector<4x128xbf16>
    %cst_46 = arith.constant dense<0.000000e+00> : vector<286x128xf32>
    %60 = tpu.matmul %57, %59, %cst_46 {dimension_numbers = #tpu.dot_dimension_numbers<[1], [0], [0], [1], [0, 0, 1, 1], [], []>} : vector<286x4xbf16>, vector<4x128xbf16>, vector<286x128xf32> -> vector<286x128xf32>
    %61 = arith.addf %54, %60 : vector<286x128xf32>
    %c0_47 = arith.constant 0 : index
    %c0_48 = arith.constant 0 : index
    %62 = vector.load %arg4[%c0_47, %c0_48] : memref<1x286xf32, #tpu.memory_space<vmem>>, vector<1x286xf32>
    %c0_49 = arith.constant 0 : index
    %c0_50 = arith.constant 0 : index
    %c0_51 = arith.constant 0 : index
    %63 = vector.load %arg5[%c0_49, %c0_50, %c0_51] : memref<1x1x128xf32, #tpu.memory_space<vmem>>, vector<1x1x128xf32>
    %64 = vector.shape_cast %63 : vector<1x1x128xf32> to vector<1x128xf32>
    %c0_52 = arith.constant 0 : index
    %c0_53 = arith.constant 0 : index
    %c0_54 = arith.constant 0 : index
    %65 = vector.load %arg6[%c0_52, %c0_53, %c0_54] : memref<1x128x128xf32, #tpu.memory_space<vmem>>, vector<1x128x128xf32>
    %66 = vector.shape_cast %65 : vector<1x128x128xf32> to vector<128x128xf32>
    %c0_55 = arith.constant 0 : index
    %c0_56 = arith.constant 0 : index
    %c0_57 = arith.constant 0 : index
    %67 = vector.load %arg7[%c0_55, %c0_56, %c0_57] : memref<1x128x128xf32, #tpu.memory_space<vmem>>, vector<1x128x128xf32>
    %68 = vector.shape_cast %67 : vector<1x128x128xf32> to vector<128x128xf32>
    %cst_58 = arith.constant dense<0.000000e+00> : vector<1x128xf32>
    %69 = tpu.matmul %62, %61, %cst_58 {dimension_numbers = #tpu.dot_dimension_numbers<[1], [0], [0], [1], [0, 0, 1, 1], [], []>} : vector<1x286xf32>, vector<286x128xf32>, vector<1x128xf32> -> vector<1x128xf32>
    %cst_59 = arith.constant 2.560000e+02 : f32
    %70 = vector.broadcast %cst_59 : f32 to vector<1x128xf32>
    %71 = arith.mulf %70, %64 : vector<1x128xf32>
    %72 = arith.addf %69, %71 : vector<1x128xf32>
    %cst_60 = arith.constant dense<0.000000e+00> : vector<1x128xf32>
    %73 = tpu.matmul %72, %66, %cst_60 {dimension_numbers = #tpu.dot_dimension_numbers<[1], [0], [0], [1], [0, 0, 1, 1], [], []>} : vector<1x128xf32>, vector<128x128xf32>, vector<1x128xf32> -> vector<1x128xf32>
    %cst_61 = arith.constant dense<0.000000e+00> : vector<1x128xf32>
    %74 = tpu.matmul %73, %68, %cst_61 {dimension_numbers = #tpu.dot_dimension_numbers<[1], [0], [0], [1], [0, 0, 1, 1], [], []>} : vector<1x128xf32>, vector<128x128xf32>, vector<1x128xf32> -> vector<1x128xf32>
    %75 = arith.subf %64, %74 : vector<1x128xf32>
    %76 = vector.broadcast %75 : vector<1x128xf32> to vector<286x128xf32>
    %77 = arith.addf %61, %76 : vector<286x128xf32>
    %78 = arith.mulf %77, %77 : vector<286x128xf32>
    %cst_62 = arith.constant dense<0.000000e+00> : vector<1x128xf32>
    %79 = tpu.matmul %62, %78, %cst_62 {dimension_numbers = #tpu.dot_dimension_numbers<[1], [0], [0], [1], [0, 0, 1, 1], [], []>} : vector<1x286xf32>, vector<286x128xf32>, vector<1x128xf32> -> vector<1x128xf32>
    %cst_63 = arith.constant dense<0.000000e+00> : vector<1x128xf32>
    %80 = tpu.matmul %79, %66, %cst_63 {dimension_numbers = #tpu.dot_dimension_numbers<[1], [0], [0], [1], [0, 0, 1, 1], [], []>} : vector<1x128xf32>, vector<128x128xf32>, vector<1x128xf32> -> vector<1x128xf32>
    %cst_64 = arith.constant dense<0.000000e+00> : vector<1x128xf32>
    %81 = tpu.matmul %80, %68, %cst_64 {dimension_numbers = #tpu.dot_dimension_numbers<[1], [0], [0], [1], [0, 0, 1, 1], [], []>} : vector<1x128xf32>, vector<128x128xf32>, vector<1x128xf32> -> vector<1x128xf32>
    %cst_65 = arith.constant 9.99999974E-6 : f32
    %82 = vector.broadcast %cst_65 : f32 to vector<1x128xf32>
    %83 = arith.addf %81, %82 : vector<1x128xf32>
    %84 = math.rsqrt %83 : vector<1x128xf32>
    %c0_66 = arith.constant 0 : index
    %c0_67 = arith.constant 0 : index
    %c0_68 = arith.constant 0 : index
    %85 = vector.load %arg8[%c0_66, %c0_67, %c0_68] : memref<1x1x128xf32, #tpu.memory_space<vmem>>, vector<1x1x128xf32>
    %86 = vector.shape_cast %85 : vector<1x1x128xf32> to vector<1x128xf32>
    %87 = arith.mulf %84, %86 : vector<1x128xf32>
    %88 = vector.broadcast %87 : vector<1x128xf32> to vector<286x128xf32>
    %89 = arith.mulf %77, %88 : vector<286x128xf32>
    %c0_69 = arith.constant 0 : index
    %c0_70 = arith.constant 0 : index
    %c0_71 = arith.constant 0 : index
    %90 = vector.load %arg9[%c0_69, %c0_70, %c0_71] : memref<1x1x128xf32, #tpu.memory_space<vmem>>, vector<1x1x128xf32>
    %91 = vector.shape_cast %90 : vector<1x1x128xf32> to vector<1x128xf32>
    %92 = vector.broadcast %91 : vector<1x128xf32> to vector<286x128xf32>
    %93 = arith.addf %89, %92 : vector<286x128xf32>
    %94 = arith.negf %93 : vector<286x128xf32>
    %95 = math.exp %94 : vector<286x128xf32>
    %cst_72 = arith.constant 1.000000e+00 : f32
    %96 = vector.broadcast %cst_72 : f32 to vector<286x128xf32>
    %97 = arith.addf %96, %95 : vector<286x128xf32>
    %98 = arith.divf %96, %97 : vector<286x128xf32>
    %99 = arith.mulf %93, %98 : vector<286x128xf32>
    %c0_73 = arith.constant 0 : index
    %c0_74 = arith.constant 0 : index
    %c0_75 = arith.constant 0 : index
    %100 = vector.load %arg10[%c0_73, %c0_74, %c0_75] : memref<1x286x128xf32, #tpu.memory_space<vmem>>, vector<1x286x128xf32>
    %101 = vector.shape_cast %100 : vector<1x286x128xf32> to vector<286x128xf32>
    %102 = vector.shape_cast %99 : vector<286x128xf32> to vector<1x286x128xf32>
    tpu.vector_store %arg10[%c0_73, %c0_74, %c0_75], %102 {strides = array<i32>} : memref<1x286x128xf32, #tpu.memory_space<vmem>>, vector<1x286x128xf32>,
    return
  }
  func.func @transform_0(%arg0: i32, %arg1: i32) -> (i32, i32, i32) {
    %c0_i32 = arith.constant 0 : i32
    %c0_i32_0 = arith.constant 0 : i32
    %c0_i32_1 = arith.constant 0 : i32
    return %arg0, %c0_i32, %c0_i32_0 : i32, i32, i32
  }
  func.func @transform_1(%arg0: i32, %arg1: i32) -> (i32, i32, i32) {
    %c0_i32 = arith.constant 0 : i32
    %c0_i32_0 = arith.constant 0 : i32
    %c0_i32_1 = arith.constant 0 : i32
    return %c0_i32, %c0_i32_0, %arg1 : i32, i32, i32
  }
  func.func @transform_2(%arg0: i32, %arg1: i32) -> (i32, i32) {
    %c0_i32 = arith.constant 0 : i32
    %c0_i32_0 = arith.constant 0 : i32
    %c0_i32_1 = arith.constant 0 : i32
    return %c0_i32, %c0_i32_0 : i32, i32
  }
  func.func @transform_3(%arg0: i32, %arg1: i32) -> (i32, i32, i32) {
    %c0_i32 = arith.constant 0 : i32
    %c0_i32_0 = arith.constant 0 : i32
    %c0_i32_1 = arith.constant 0 : i32
    return %c0_i32, %c0_i32_0, %arg1 : i32, i32, i32
  }
  func.func @transform_4(%arg0: i32, %arg1: i32) -> (i32, i32, i32) {
    %c0_i32 = arith.constant 0 : i32
    %c0_i32_0 = arith.constant 0 : i32
    %c0_i32_1 = arith.constant 0 : i32
    return %arg1, %c0_i32, %c0_i32_0 : i32, i32, i32
  }
  func.func @transform_5(%arg0: i32, %arg1: i32) -> (i32, i32, i32) {
    %c0_i32 = arith.constant 0 : i32
    %c0_i32_0 = arith.constant 0 : i32
    %c0_i32_1 = arith.constant 0 : i32
    return %arg1, %c0_i32, %c0_i32_0 : i32, i32, i32
  }
  func.func @transform_6(%arg0: i32, %arg1: i32) -> (i32, i32, i32) {
    %c0_i32 = arith.constant 0 : i32
    %c0_i32_0 = arith.constant 0 : i32
    return %arg0, %c0_i32, %arg1 : i32, i32, i32
  }
  func.func @transform_7(%arg0: i32, %arg1: i32) -> (i32, i32, i32) {
    %c0_i32 = arith.constant 0 : i32
    %c0_i32_0 = arith.constant 0 : i32
    return %arg0, %c0_i32, %arg1 : i32, i32, i32
  }
  func.func @transform_8(%arg0: i32, %arg1: i32) -> (i32, i32, i32) {
    %c0_i32 = arith.constant 0 : i32
    %c0_i32_0 = arith.constant 0 : i32
    return %arg0, %c0_i32, %arg1 : i32, i32, i32
  }
}

</mosaic_0001>

<bundles_post_ra>
// kernel: tpu_custom_call.1
= control target key start
LH: loop header
LB: loop body
LE: loop exit
PB: predicated region body
PF: predicated region fallthrough
CT: control target
= control target key end

     0   :  { %s5844_s27 = smov 0   ;;  %s5846_s28 = smov 0   ;;  %s8012_s0 = inlined_call_operand.vmem [shape: f32[2,324,4], index: 0, kind: input, shape index: {}]   ;;  %s8013_s1 = inlined_call_operand.vmem [shape: bf16[9,4,128], index: 1, kind: input, shape index: {}]   ;;  %s8014_s2 = inlined_call_operand.vmem [shape: f32[1,286], index: 2, kind: input, shape index: {}]   ;;  %s8015_s3 = inlined_call_operand.vmem [shape: f32[1,1,128], index: 3, kind: input, shape index: {}]   ;;  %s8016_s4 = inlined_call_operand.vmem [shape: f32[1,128,128], index: 4, kind: input, shape index: {}]   ;;  %s8017_s5 = inlined_call_operand.vmem [shape: f32[1,128,128], index: 5, kind: input, shape index: {}]   ;;  %s8018_s6 = inlined_call_operand.vmem [shape: f32[2,1,128], index: 6, kind: input, shape index: {}]   ;;  %s8019_s7 = inlined_call_operand.vmem [shape: f32[2,1,128], index: 7, kind: input, shape index: {}]   ;;  %s8020_s8 = inlined_call_operand.vmem [shape: f32[2,286,128], index: 8, kind: output, shape index: {}]  }
   0x1   :  { %s5848_s29 = smov 0  }
   0x2 LB: > { %s30_s30 = sadd.s32 1, %s5791_s28  ;;  %p4551_p0 = scmp.ge.s32.totalorder %s5795_s29, 1  ;;  %s5795_s29 = sphi %s5848_s29, %s18_s29   ;;  %s5791_s28 = sphi %s5846_s28, %s8176_s28   ;;  %s5787_s27 = sphi %s5844_s27, %s8175_s27  }
   0x3   : > { %p32_p1 = scmp.ge.s32.totalorder %s30_s30, 2  ;;  %p339_p2 = scmp.lt.s32.totalorder %s5795_s29, 3 }
   0x5   : > { %s8178_s30 = smov (%p32_p1, %s30_s30), 0  ;;  %p340_p3 = pnand %p4551_p0, %p339_p2 }
   0x7   : > { %343 = sbr.rel (%p340_p3) target bundleno = 1926 (0x786), region = 52 }
   0xc   : > { %v4554_v0 = vld [vmem:[%s8013_s1 + $0x2] sm:$0x3]  ;;  %vm614_vm0 = vcmask 1041408   ;;  %v502_v1 = vld [vmem:[%s8013_s1] sm:$0x3]  ;;  %p405_p4 = scmp.lt.s32.totalorder %s5787_s27, 1 }
   0xd   : > { %5590 = vmatprep.subr.msk.bf16.mxu0 %vm614_vm0, %v4554_v0  ;;  %5591 = vmatprep.subr.msk.bf16.mxu1 %vm614_vm0, %v502_v1  ;;  %v616_v2 = vsel %vm614_vm0, %v4554_v0, 0  ;;  %v850_v3 = vsel %vm614_vm0, %v502_v1, 0  ;;  %v4591_v4 = vld [vmem:[%s8013_s1 + $0x4] sm:$0x3]  ;;  %v4610_v5 = vld [vmem:[%s8013_s1 + $0x6] sm:$0x3] }
   0xe   : > { %5087 = vmatpush3.bf16.msra.mxu0 %v616_v2  ;;  %5125 = vmatpush3.bf16.msra.mxu1 %v850_v3  ;;  %s8180_s27 = smov (!%p405_p4, %s5787_s27), 1  ;;  %vm559_vm1 = vcmask 31744   ;;  %v1140_v18 = vsel %vm614_vm0, %v4591_v4, 0  ;;  %v1466_v25 = vsel %vm614_vm0, %v4610_v5, 0  ;;  %v5908_v26 = vld [vmem:[%s8013_s1 + $0x8] sm:$0x3] }
   0xf   : > { %5592 = vmatprep.subr.msk.bf16.mxu0 %vm614_vm0, %v4591_v4  ;;  %5593 = vmatprep.subr.msk.bf16.mxu1 %vm614_vm0, %v4610_v5  ;;  %s5599_s17 = smul.u32 328, %s8180_s27  ;;  %vm5798_vm2 = vmmov 0   ;;  %vm3364_vm3 = vcmask 1045504   ;;  %vm3361_vm4 = vcmask 244736   ;;  %s432_s11 = scalar_lea.vmem %s8018_s6, %s8180_s27 }
  0x10   : > { %s438_s14 = scalar_lea.vmem %s8019_s7, %s8180_s27  ;;  %s5600_s15 = smul.u32 288, %s8180_s27 }
  0x11   : > { %s5886_s20 = scalar_lea.vmem %s8012_s0, %s5599_s17 }
  0x12   : > { %v503_v6 = vld [vmem:[%s5886_s20 + $0x1] sm:$0xff]  ;;  %v504_v7 = vld [vmem:[%s5886_s20 + $0x9] sm:$0xff]  ;;  %v505_v11 = vld [vmem:[%s5886_s20 + $0x11] sm:$0xff]  ;;  %s7914_s18 = scalar_lea.vmem %s8020_s8, %s5600_s15 }
  0x13   : > { %v448_v8 = vld [vmem:[%s5886_s20] sm:$0xff]  ;;  %v539_v9 = vpack.c.bf16 %v504_v7, %v503_v6  ;;  %v449_v10 = vld [vmem:[%s5886_s20 + $0x8] sm:$0xff]  ;;  %v450_v15 = vld [vmem:[%s5886_s20 + $0x10] sm:$0xff] }
  0x14   : > { %v506_v12 = vld [vmem:[%s5886_s20 + $0x19] sm:$0xff]  ;;  %v484_v13 = vpack.c.bf16 %v449_v10, %v448_v8  ;;  %v507_v17 = vld [vmem:[%s5886_s20 + $0x21] sm:$0xff]  ;;  %v508_v20 = vld [vmem:[%s5886_s20 + $0x29] sm:$0xff] }
  0x15   : > { %v540_v14 = vpack.c.bf16 %v506_v12, %v505_v11  ;;  %v451_v16 = vld [vmem:[%s5886_s20 + $0x18] sm:$0xff]  ;;  %5088 = vmatprep.mubr.msk.bf16.mxu0 %vm559_vm1, %v539_v9  ;;  %v452_v21 = vld [vmem:[%s5886_s20 + $0x20] sm:$0xff]  ;;  %v453_v22 = vld [vmem:[%s5886_s20 + $0x28] sm:$0xff]  ;;  %v541_v23 = vpack.c.bf16 %v508_v20, %v507_v17 }
  0x16   : > { %v485_v19 = vpack.c.bf16 %v451_v16, %v450_v15  ;;  %5126 = vmatprep.mubr.msk.bf16.mxu1 %vm559_vm1, %v484_v13  ;;  %v486_v24 = vpack.c.bf16 %v453_v22, %v452_v21  ;;  %v509_v27 = vld [vmem:[%s5886_s20 + $0x31] sm:$0xff]  ;;  %v510_v28 = vld [vmem:[%s5886_s20 + $0x39] sm:$0xff]  ;;  %v511_v31 = vld [vmem:[%s5886_s20 + $0x41] sm:$0xff] }
  0x17   : > { %5089 = vmatmul.mubr.msk.bf16.vlgmr.msra.gmra.mxu0 %vm559_vm1, %v540_v14  ;;  %v454_v29 = vld [vmem:[%s5886_s20 + $0x30] sm:$0xff]  ;;  %v455_v30 = vld [vmem:[%s5886_s20 + $0x38] sm:$0xff]  ;;  %v456_v33 = vld [vmem:[%s5886_s20 + $0x40] sm:$0xff]  ;;  %v542_v35 = vpack.c.bf16 %v510_v28, %v509_v27 }
  0x18   : > { %5127 = vmatmul.mubr.msk.bf16.vlgmr.msra.gmra.mxu1 %vm559_vm1, %v485_v19  ;;  %5163 = vmatpush3.bf16.msra.mxu0 %v1140_v18  ;;  %v512_v32 = vld [vmem:[%s5886_s20 + $0x49] sm:$0xff]  ;;  %v487_v36 = vpack.c.bf16 %v455_v30, %v454_v29  ;;  %v513_v39 = vld [vmem:[%s5886_s20 + $0x51] sm:$0xff]  ;;  %v514_v40 = vld [vmem:[%s5886_s20 + $0x59] sm:$0xff] }
  0x19   : > { %5092 = vmatprep.mubr.msk.bf16.mxu0 %vm559_vm1, %v541_v23  ;;  %5130 = vmatprep.mubr.msk.bf16.mxu1 %vm559_vm1, %v486_v24  ;;  %v457_v34 = vld [vmem:[%s5886_s20 + $0x48] sm:$0xff]  ;;  %v543_v37 = vpack.c.bf16 %v512_v32, %v511_v31  ;;  %v458_v41 = vld [vmem:[%s5886_s20 + $0x50] sm:$0xff]  ;;  %v459_v42 = vld [vmem:[%s5886_s20 + $0x58] sm:$0xff]  ;;  %v544_v47 = vpack.c.bf16 %v514_v40, %v513_v39 }
  0x1a   : > { %5201 = vmatpush3.bf16.msra.mxu1 %v1466_v25  ;;  %5594 = vmatprep.subr.msk.bf16.mxu0 %vm614_vm0, %v5908_v26  ;;  %v488_v38 = vpack.c.bf16 %v457_v34, %v456_v33  ;;  %v515_v43 = vld [vmem:[%s5886_s20 + $0x61] sm:$0xff]  ;;  %v516_v44 = vld [vmem:[%s5886_s20 + $0x69] sm:$0xff]  ;;  %v489_v48 = vpack.c.bf16 %v459_v42, %v458_v41  ;;  %v517_v51 = vld [vmem:[%s5886_s20 + $0x71] sm:$0xff] }
  0x1b   : > { %v460_v45 = vld [vmem:[%s5886_s20 + $0x60] sm:$0xff]  ;;  %v461_v46 = vld [vmem:[%s5886_s20 + $0x68] sm:$0xff]  ;;  %v545_v49 = vpack.c.bf16 %v516_v44, %v515_v43  ;;  %v462_v53 = vld [vmem:[%s5886_s20 + $0x70] sm:$0xff] }
  0x1c   : > { %v490_v50 = vpack.c.bf16 %v461_v46, %v460_v45  ;;  %v518_v52 = vld [vmem:[%s5886_s20 + $0x79] sm:$0xff]  ;;  %v519_v55 = vld [vmem:[%s5886_s20 + $0x81] sm:$0xff]  ;;  %v520_v56 = vld [vmem:[%s5886_s20 + $0x89] sm:$0xff] }
  0x1d   : > { %v463_v54 = vld [vmem:[%s5886_s20 + $0x78] sm:$0xff]  ;;  %v464_v57 = vld [vmem:[%s5886_s20 + $0x80] sm:$0xff]  ;;  %v465_v58 = vld [vmem:[%s5886_s20 + $0x88] sm:$0xff]  ;;  %v546_v59 = vpack.c.bf16 %v518_v52, %v517_v51  ;;  %v547_v61 = vpack.c.bf16 %v520_v56, %v519_v55 }
  0x1e   : > { %v491_v60 = vpack.c.bf16 %v463_v54, %v462_v53  ;;  %v492_v62 = vpack.c.bf16 %v465_v58, %v464_v57  ;;  %v521_v63 = vld [vmem:[%s5886_s20 + $0x91] sm:$0xff]  ;;  %v522_v0 = vld [vmem:[%s5886_s20 + $0x99] sm:$0xff]  ;;  %v523_v3 = vld [vmem:[%s5886_s20 + $0xa1] sm:$0xff] }
  0x1f   : > { %5093 = vmatmul.mubr.msk.bf16.gmra.mxu0 %vm559_vm1, %v542_v35  ;;  %v466_v1 = vld [vmem:[%s5886_s20 + $0x90] sm:$0xff]  ;;  %v467_v2 = vld [vmem:[%s5886_s20 + $0x98] sm:$0xff]  ;;  %v468_v5 = vld [vmem:[%s5886_s20 + $0xa0] sm:$0xff]  ;;  %v548_v7 = vpack.c.bf16 %v522_v0, %v521_v63 }
  0x20   : > { %5131 = vmatmul.mubr.msk.bf16.gmra.mxu1 %vm559_vm1, %v487_v36  ;;  %5096 = vmatprep.mubr.msk.bf16.mxu0 %vm559_vm1, %v543_v37  ;;  %v524_v4 = vld [vmem:[%s5886_s20 + $0xa9] sm:$0xff]  ;;  %v493_v8 = vpack.c.bf16 %v467_v2, %v466_v1  ;;  %v525_v11 = vld [vmem:[%s5886_s20 + $0xb1] sm:$0xff]  ;;  %v526_v12 = vld [vmem:[%s5886_s20 + $0xb9] sm:$0xff] }
  0x21   : > { %5134 = vmatprep.mubr.msk.bf16.mxu1 %vm559_vm1, %v488_v38  ;;  %v469_v6 = vld [vmem:[%s5886_s20 + $0xa8] sm:$0xff]  ;;  %v549_v9 = vpack.c.bf16 %v524_v4, %v523_v3  ;;  %v470_v13 = vld [vmem:[%s5886_s20 + $0xb0] sm:$0xff]  ;;  %v471_v15 = vld [vmem:[%s5886_s20 + $0xb8] sm:$0xff]  ;;  %v550_v20 = vpack.c.bf16 %v526_v12, %v525_v11  ;;  %v1792_v3 = vsel %vm614_vm0, %v5908_v26, 0 }
  0x22   : > { %v494_v10 = vpack.c.bf16 %v469_v6, %v468_v5  ;;  %v5968_v14 = vld [vmem:[%s8013_s1 + $0xa] sm:$0x3]  ;;  %v527_v16 = vld [vmem:[%s5886_s20 + $0xc1] sm:$0xff]  ;;  %v495_v21 = vpack.c.bf16 %v471_v15, %v470_v13  ;;  %v529_v24 = vld [vmem:[%s5886_s20 + $0xd1] sm:$0xff] }
  0x23   : > { %v528_v17 = vld [vmem:[%s5886_s20 + $0xc9] sm:$0xff]  ;;  %5595 = vmatprep.subr.msk.bf16.mxu1 %vm614_vm0, %v5968_v14  ;;  %v472_v18 = vld [vmem:[%s5886_s20 + $0xc0] sm:$0xff]  ;;  %v475_v28 = vld [vmem:[%s5886_s20 + $0xd8] sm:$0xff]  ;;  %v2118_v4 = vsel %vm614_vm0, %v5968_v14, 0 }
  0x24   : > { %v473_v19 = vld [vmem:[%s5886_s20 + $0xc8] sm:$0xff]  ;;  %v551_v22 = vpack.c.bf16 %v528_v17, %v527_v16  ;;  %v530_v25 = vld [vmem:[%s5886_s20 + $0xd9] sm:$0xff]  ;;  %v474_v27 = vld [vmem:[%s5886_s20 + $0xd0] sm:$0xff] }
  0x25   : > { %v496_v23 = vpack.c.bf16 %v473_v19, %v472_v18  ;;  %v531_v29 = vld [vmem:[%s5886_s20 + $0xe1] sm:$0xff]  ;;  %v532_v30 = vld [vmem:[%s5886_s20 + $0xe9] sm:$0xff]  ;;  %v552_v33 = vpack.c.bf16 %v530_v25, %v529_v24  ;;  %v497_v34 = vpack.c.bf16 %v475_v28, %v474_v27  ;;  %v533_v37 = vld [vmem:[%s5886_s20 + $0xf1] sm:$0xff] }
  0x26   : > { %v476_v31 = vld [vmem:[%s5886_s20 + $0xe0] sm:$0xff]  ;;  %v477_v32 = vld [vmem:[%s5886_s20 + $0xe8] sm:$0xff]  ;;  %v553_v35 = vpack.c.bf16 %v532_v30, %v531_v29  ;;  %v478_v39 = vld [vmem:[%s5886_s20 + $0xf0] sm:$0xff] }
  0x27   : > { %5097 = vmatmul.mubr.msk.bf16.gmra.mxu0 %vm559_vm1, %v544_v47  ;;  %v498_v36 = vpack.c.bf16 %v477_v32, %v476_v31  ;;  %v534_v38 = vld [vmem:[%s5886_s20 + $0xf9] sm:$0xff]  ;;  %v535_v41 = vld [vmem:[%s5886_s20 + $0x101] sm:$0xff]  ;;  %v536_v42 = vld [vmem:[%s5886_s20 + $0x109] sm:$0xff] }
  0x28   : > { %5135 = vmatmul.mubr.msk.bf16.gmra.mxu1 %vm559_vm1, %v489_v48  ;;  %5100 = vmatprep.mubr.msk.bf16.mxu0 %vm559_vm1, %v545_v49  ;;  %v479_v40 = vld [vmem:[%s5886_s20 + $0xf8] sm:$0xff]  ;;  %v480_v43 = vld [vmem:[%s5886_s20 + $0x100] sm:$0xff]  ;;  %v481_v44 = vld [vmem:[%s5886_s20 + $0x108] sm:$0xff]  ;;  %v554_v45 = vpack.c.bf16 %v534_v38, %v533_v37  ;;  %v555_v47 = vpack.c.bf16 %v536_v42, %v535_v41 }
  0x29   : > { %5138 = vmatprep.mubr.msk.bf16.mxu1 %vm559_vm1, %v490_v50  ;;  %v499_v46 = vpack.c.bf16 %v479_v40, %v478_v39  ;;  %v500_v48 = vpack.c.bf16 %v481_v44, %v480_v43  ;;  %v537_v49 = vld [vmem:[%s5886_s20 + $0x111] sm:$0xff]  ;;  %v538_v50 = vld [vmem:[%s5886_s20 + $0x119] sm:$0x3f]  ;;  %v1029_v53 = vld [vmem:[%s5886_s20 + $0x2] sm:$0xff] }
  0x2a   : > { %v482_v51 = vld [vmem:[%s5886_s20 + $0x110] sm:$0xff]  ;;  %v483_v52 = vld [vmem:[%s5886_s20 + $0x118] sm:$0x3f]  ;;  %v556_v57 = vpack.c.bf16 %v538_v50, %v537_v49  ;;  %v6030_v5 = vld [vmem:[%s8013_s1 + $0xc] sm:$0x3] }
  0x2b   : > { %v1030_v54 = vld [vmem:[%s5886_s20 + $0xa] sm:$0xff]  ;;  %v1031_v55 = vld [vmem:[%s5886_s20 + $0x12] sm:$0xff]  ;;  %v1032_v56 = vld [vmem:[%s5886_s20 + $0x1a] sm:$0xff]  ;;  %v501_v58 = vpack.c.bf16 %v483_v52, %v482_v51 }
  0x2c   : > { %v1035_v63 = vld [vmem:[%s5886_s20 + $0x32] sm:$0xff]  ;;  %v1036_v0 = vld [vmem:[%s5886_s20 + $0x3a] sm:$0xff]  ;;  %v1361_v26 = vld [vmem:[%s5886_s20 + $0x42] sm:$0xff] }
  0x2d   : > { %v1068_v2 = vpack.c.bf16 %v1036_v0, %v1035_v63  ;;  %v1362_v6 = vld [vmem:[%s5886_s20 + $0x4a] sm:$0xff]  ;;  %v1365_v11 = vld [vmem:[%s5886_s20 + $0x62] sm:$0xff]  ;;  %v1043_v13 = vld [vmem:[%s5886_s20 + $0x72] sm:$0xff] }
  0x2e   : > { %v1366_v12 = vld [vmem:[%s5886_s20 + $0x6a] sm:$0xff]  ;;  %v1044_v14 = vld [vmem:[%s5886_s20 + $0x7a] sm:$0xff]  ;;  %v1369_v18 = vld [vmem:[%s5886_s20 + $0x82] sm:$0xff] }
  0x2f   : > { %5101 = vmatmul.mubr.msk.bf16.gmra.mxu0 %vm559_vm1, %v546_v59  ;;  %v1065_v59 = vpack.c.bf16 %v1030_v54, %v1029_v53  ;;  %v1396_v15 = vpack.c.bf16 %v1366_v12, %v1365_v11  ;;  %v1072_v16 = vpack.c.bf16 %v1044_v14, %v1043_v13  ;;  %v6052_v17 = vld [vmem:[%s8013_s1 + $0xe] sm:$0x3]  ;;  %v1373_v24 = vld [vmem:[%s5886_s20 + $0xa2] sm:$0xff]  ;;  %v1051_v27 = vld [vmem:[%s5886_s20 + $0xb2] sm:$0xff] }
  0x30   : > { %5139 = vmatmul.mubr.msk.bf16.gmra.mxu1 %vm559_vm1, %v491_v60  ;;  %5104 = vmatprep.mubr.msk.bf16.mxu0 %vm559_vm1, %v547_v61  ;;  %v1066_v60 = vpack.c.bf16 %v1032_v56, %v1031_v55  ;;  %v1357_v61 = vld [vmem:[%s5886_s20 + $0x22] sm:$0xff]  ;;  %v1370_v19 = vld [vmem:[%s5886_s20 + $0x8a] sm:$0xff]  ;;  %v1052_v28 = vld [vmem:[%s5886_s20 + $0xba] sm:$0xff] }
  0x31   : > { %5142 = vmatprep.mubr.msk.bf16.mxu1 %vm559_vm1, %v492_v62  ;;  %v1358_v62 = vld [vmem:[%s5886_s20 + $0x2a] sm:$0xff]  ;;  %v1076_v30 = vpack.c.bf16 %v1052_v28, %v1051_v27  ;;  %v1377_v31 = vld [vmem:[%s5886_s20 + $0xc2] sm:$0xff]  ;;  %v1059_v39 = vld [vmem:[%s5886_s20 + $0xf2] sm:$0xff] }
  0x32   : > { %v1392_v1 = vpack.c.bf16 %v1358_v62, %v1357_v61  ;;  %v1374_v25 = vld [vmem:[%s5886_s20 + $0xaa] sm:$0xff]  ;;  %v1381_v37 = vld [vmem:[%s5886_s20 + $0xe2] sm:$0xff]  ;;  %v1060_v40 = vld [vmem:[%s5886_s20 + $0xfa] sm:$0xff] }
  0x33   : > { %v1400_v29 = vpack.c.bf16 %v1374_v25, %v1373_v24  ;;  %v1378_v32 = vld [vmem:[%s5886_s20 + $0xca] sm:$0xff]  ;;  %v1080_v42 = vpack.c.bf16 %v1060_v40, %v1059_v39  ;;  %v1385_v43 = vld [vmem:[%s5886_s20 + $0x102] sm:$0xff]  ;;  %v1064_v49 = vld [vmem:[%s5886_s20 + $0x11a] sm:$0x3f] }
  0x34   : > { %v1382_v38 = vld [vmem:[%s5886_s20 + $0xea] sm:$0xff]  ;;  %v1389_v50 = vld [vmem:[%s5886_s20 + $0x122] sm:$0xff]  ;;  %v1681_v52 = vld [vmem:[%s5886_s20 + $0x13] sm:$0xff] }
  0x35   : > { %v1404_v41 = vpack.c.bf16 %v1382_v38, %v1381_v37  ;;  %v1386_v44 = vld [vmem:[%s5886_s20 + $0x10a] sm:$0xff]  ;;  %v1682_v53 = vld [vmem:[%s5886_s20 + $0x1b] sm:$0xff]  ;;  %v1685_v0 = vld [vmem:[%s5886_s20 + $0x33] sm:$0xff] }
  0x36   : > { %v1390_v51 = vld [vmem:[%s5886_s20 + $0x12a] sm:$0x3f]  ;;  %v2007_v54 = vld [vmem:[%s5886_s20 + $0x14] sm:$0xff]  ;;  %v2008_v55 = vld [vmem:[%s5886_s20 + $0x1c] sm:$0xff] }
  0x37   : > { %5105 = vmatmul.mubr.msk.bf16.gmra.mxu0 %vm559_vm1, %v548_v7  ;;  %v1039_v7 = vld [vmem:[%s5886_s20 + $0x52] sm:$0xff]  ;;  %v2009_v62 = vld [vmem:[%s5886_s20 + $0x24] sm:$0xff]  ;;  %v1694_v28 = vld [vmem:[%s5886_s20 + $0x7b] sm:$0xff] }
  0x38   : > { %5143 = vmatmul.mubr.msk.bf16.gmra.mxu1 %vm559_vm1, %v493_v8  ;;  %5108 = vmatprep.mubr.msk.bf16.mxu0 %vm559_vm1, %v549_v9  ;;  %v1040_v8 = vld [vmem:[%s5886_s20 + $0x5a] sm:$0xff]  ;;  %v1394_v9 = vpack.c.bf16 %v1362_v6, %v1361_v26  ;;  %v1684_v61 = vld [vmem:[%s5886_s20 + $0x2b] sm:$0xff]  ;;  %v1687_v11 = vld [vmem:[%s5886_s20 + $0x43] sm:$0xff] }
  0x39   : > { %5146 = vmatprep.mubr.msk.bf16.mxu1 %vm559_vm1, %v494_v10  ;;  %v1070_v10 = vpack.c.bf16 %v1040_v8, %v1039_v7  ;;  %v2010_v63 = vld [vmem:[%s5886_s20 + $0x2c] sm:$0xff]  ;;  %v2444_v8 = vsel %vm614_vm0, %v6030_v5, 0  ;;  %v2013_v13 = vld [vmem:[%s5886_s20 + $0x44] sm:$0xff]  ;;  %v1698_v40 = vld [vmem:[%s5886_s20 + $0x9b] sm:$0xff] }
  0x3a   : > { %v6119_v26 = vpack.c.bf16 %v2010_v63, %v2009_v62  ;;  %v1688_v12 = vld [vmem:[%s5886_s20 + $0x4b] sm:$0xff]  ;;  %v1689_v14 = vld [vmem:[%s5886_s20 + $0x53] sm:$0xff] }
  0x3b   : > { %v2017_v24 = vld [vmem:[%s5886_s20 + $0x64] sm:$0xff]  ;;  %v2018_v25 = vld [vmem:[%s5886_s20 + $0x6c] sm:$0xff] }
  0x3c   : > { %v1693_v27 = vld [vmem:[%s5886_s20 + $0x73] sm:$0xff]  ;;  %v2021_v37 = vld [vmem:[%s5886_s20 + $0x84] sm:$0xff] }
  0x3d   : > { %v2022_v38 = vld [vmem:[%s5886_s20 + $0x8c] sm:$0xff] }
  0x3e   : > { %v1697_v39 = vld [vmem:[%s5886_s20 + $0x93] sm:$0xff] }
  0x3f   : > { %5109 = vmatmul.mubr.msk.bf16.gmra.mxu0 %vm559_vm1, %v550_v20  ;;  %v1047_v20 = vld [vmem:[%s5886_s20 + $0x92] sm:$0xff] }
  0x40   : > { %5147 = vmatmul.mubr.msk.bf16.gmra.mxu1 %vm559_vm1, %v495_v21  ;;  %5112 = vmatprep.mubr.msk.bf16.mxu0 %vm559_vm1, %v551_v22  ;;  %v1048_v21 = vld [vmem:[%s5886_s20 + $0x9a] sm:$0xff]  ;;  %v1398_v22 = vpack.c.bf16 %v1370_v19, %v1369_v18  ;;  %v1720_v18 = vpack.c.bf16 %v1688_v12, %v1687_v11  ;;  %v2030_v62 = vld [vmem:[%s5886_s20 + $0xcc] sm:$0xff]  ;;  %v2033_v12 = vld [vmem:[%s5886_s20 + $0xe4] sm:$0xff] }
  0x41   : > { %5150 = vmatprep.mubr.msk.bf16.mxu1 %vm559_vm1, %v496_v23  ;;  %v1074_v23 = vpack.c.bf16 %v1048_v21, %v1047_v20  ;;  %v1705_v63 = vld [vmem:[%s5886_s20 + $0xd3] sm:$0xff]  ;;  %v1708_v11 = vld [vmem:[%s5886_s20 + $0xeb] sm:$0xff] }
  0x47   : > { %5113 = vmatmul.mubr.msk.bf16.gmra.mxu0 %vm559_vm1, %v552_v33  ;;  %v1055_v33 = vld [vmem:[%s5886_s20 + $0xd2] sm:$0xff] }
  0x48   : > { %5151 = vmatmul.mubr.msk.bf16.gmra.mxu1 %vm559_vm1, %v497_v34  ;;  %5116 = vmatprep.mubr.msk.bf16.mxu0 %vm559_vm1, %v553_v35  ;;  %v1056_v34 = vld [vmem:[%s5886_s20 + $0xda] sm:$0xff]  ;;  %v1402_v35 = vpack.c.bf16 %v1378_v32, %v1377_v31  ;;  %v6166_v32 = vpack.c.bf16 %v2018_v25, %v2017_v24  ;;  %v1711_v25 = vld [vmem:[%s5886_s20 + $0x103] sm:$0xff] }
  0x49   : > { %5154 = vmatprep.mubr.msk.bf16.mxu1 %vm559_vm1, %v498_v36  ;;  %v1078_v36 = vpack.c.bf16 %v1056_v34, %v1055_v33  ;;  %v1723_v33 = vpack.c.bf16 %v1694_v28, %v1693_v27  ;;  %v1712_v27 = vld [vmem:[%s5886_s20 + $0x10b] sm:$0xff] }
  0x4a   : > { %v2037_v28 = vld [vmem:[%s5886_s20 + $0x104] sm:$0xff] }
  0x4f   : > { %5117 = vmatmul.mubr.msk.bf16.gmra.mxu0 %vm559_vm1, %v554_v45  ;;  %v1063_v45 = vld [vmem:[%s5886_s20 + $0x112] sm:$0xff] }
  0x50   : > { %5155 = vmatmul.mubr.msk.bf16.gmra.mxu1 %vm559_vm1, %v499_v46  ;;  %5120 = vmatprep.mubr.msk.bf16.mxu0 %vm559_vm1, %v555_v47  ;;  %v1388_v46 = vld [vmem:[%s5886_s20 + $0x11a] sm:$0xff]  ;;  %v1406_v47 = vpack.c.bf16 %v1386_v44, %v1385_v43  ;;  %v1082_v56 = vpack.c.bf16 %v1064_v49, %v1063_v45  ;;  %v6184_v44 = vpack.c.bf16 %v2022_v38, %v2021_v37  ;;  %v2025_v49 = vld [vmem:[%s5886_s20 + $0xa4] sm:$0xff] }
  0x51   : > { %5158 = vmatprep.mubr.msk.bf16.mxu1 %vm559_vm1, %v500_v48  ;;  %v1407_v48 = vpack.c.bf16 %v1388_v46, %v1063_v45  ;;  %v1725_v45 = vpack.c.bf16 %v1698_v40, %v1697_v39  ;;  %v2039_v37 = vld [vmem:[%s5886_s20 + $0x114] sm:$0xff]  ;;  %v2040_v38 = vld [vmem:[%s5886_s20 + $0x11c] sm:$0xff] }
  0x57   : > { %5121 = vmatmul.mubr.msk.bf16.gmra.mxu0 %vm559_vm1, %v556_v57  ;;  %v1408_v57 = vpack.c.bf16 %v1390_v51, %v1389_v50  ;;  %v2026_v50 = vld [vmem:[%s5886_s20 + $0xac] sm:$0xff] }
  0x58   : > { %5159 = vmatmul.mubr.msk.bf16.gmra.mxu1 %vm559_vm1, %v501_v58  ;;  %5164 = vmatprep.mubr.msk.bf16.mxu0 %vm559_vm1, %v1065_v59  ;;  %v1717_v58 = vpack.c.bf16 %v1682_v53, %v1681_v52  ;;  %v2043_v59 = vpack.c.bf16 %v2008_v55, %v2007_v54  ;;  %v1701_v51 = vld [vmem:[%s5886_s20 + $0xb3] sm:$0xff]  ;;  %v1702_v52 = vld [vmem:[%s5886_s20 + $0xbb] sm:$0xff] }
  0x59   : > { %5202 = vmatprep.mubr.msk.bf16.mxu1 %vm559_vm1, %v1066_v60  ;;  %v2027_v53 = vld [vmem:[%s5886_s20 + $0xb4] sm:$0xff]  ;;  %v2028_v54 = vld [vmem:[%s5886_s20 + $0xbc] sm:$0xff] }
  0x5f   : > { %5165 = vmatmul.mubr.msk.bf16.vlgmr.msra.gmra.mxu0 %vm559_vm1, %v1066_v60  ;;  %v1683_v60 = vld [vmem:[%s5886_s20 + $0x23] sm:$0xff] }
  0x60   : > { %5203 = vmatmul.mubr.msk.bf16.vlgmr.msra.gmra.mxu1 %vm559_vm1, %v1392_v1  ;;  %5168 = vmatprep.mubr.msk.bf16.mxu0 %vm559_vm1, %v1392_v1  ;;  %v1686_v1 = vld [vmem:[%s5886_s20 + $0x3b] sm:$0xff] }
  0x61   : > { %5206 = vmatprep.mubr.msk.bf16.mxu1 %vm559_vm1, %v1068_v2  ;;  %5239 = vmatpush3.bf16.msra.mxu0 %v1792_v3  ;;  %v2012_v3 = vld [vmem:[%s5886_s20 + $0x3c] sm:$0xff]  ;;  %v1719_v6 = vpack.c.bf16 %v1686_v1, %v1685_v0  ;;  %v2031_v1 = vld [vmem:[%s5886_s20 + $0xd4] sm:$0xff] }
  0x62   : > { %5277 = vmatpush3.bf16.msra.mxu1 %v2118_v4  ;;  %5596 = vmatprep.subr.msk.bf16.mxu0 %vm614_vm0, %v6030_v5  ;;  %v1718_v4 = vpack.c.bf16 %v1684_v61, %v1683_v60  ;;  %v2014_v5 = vld [vmem:[%s5886_s20 + $0x4c] sm:$0xff]  ;;  %v2029_v61 = vld [vmem:[%s5886_s20 + $0xc4] sm:$0xff]  ;;  %v1706_v0 = vld [vmem:[%s5886_s20 + $0xdb] sm:$0xff] }
  0x63   : > { %5597 = vmatprep.subr.msk.bf16.mxu1 %vm614_vm0, %v6052_v17  ;;  %v6148_v19 = vpack.c.bf16 %v2014_v5, %v2013_v13  ;;  %v1704_v60 = vld [vmem:[%s5886_s20 + $0xcb] sm:$0xff]  ;;  %v1709_v5 = vld [vmem:[%s5886_s20 + $0xf3] sm:$0xff] }
  0x64   : > { %v2034_v13 = vld [vmem:[%s5886_s20 + $0xec] sm:$0xff] }
  0x67   : > { %5169 = vmatmul.mubr.msk.bf16.gmra.mxu0 %vm559_vm1, %v1068_v2  ;;  %v2011_v2 = vld [vmem:[%s5886_s20 + $0x34] sm:$0xff] }
  0x68   : > { %5207 = vmatmul.mubr.msk.bf16.gmra.mxu1 %vm559_vm1, %v1394_v9  ;;  %5172 = vmatprep.mubr.msk.bf16.mxu0 %vm559_vm1, %v1394_v9  ;;  %v6121_v7 = vpack.c.bf16 %v2012_v3, %v2011_v2  ;;  %v2770_v9 = vsel %vm614_vm0, %v6052_v17, 0  ;;  %v2016_v17 = vld [vmem:[%s5886_s20 + $0x5c] sm:$0xff] }
  0x69   : > { %5210 = vmatprep.mubr.msk.bf16.mxu1 %vm559_vm1, %v1070_v10  ;;  %v2032_v2 = vld [vmem:[%s5886_s20 + $0xdc] sm:$0xff] }
  0x6f   : > { %5173 = vmatmul.mubr.msk.bf16.gmra.mxu0 %vm559_vm1, %v1070_v10  ;;  %v6131_v10 = vld [vmem:[%s8013_s1 + $0x10] sm:$0x3] }
  0x70   : > { %5211 = vmatmul.mubr.msk.bf16.gmra.mxu1 %vm559_vm1, %v1396_v15  ;;  %5176 = vmatprep.mubr.msk.bf16.mxu0 %vm559_vm1, %v1396_v15  ;;  %v1690_v15 = vld [vmem:[%s5886_s20 + $0x5b] sm:$0xff] }
  0x71   : > { %5214 = vmatprep.mubr.msk.bf16.mxu1 %vm559_vm1, %v1072_v16  ;;  %v1721_v20 = vpack.c.bf16 %v1690_v15, %v1689_v14  ;;  %v1710_v14 = vld [vmem:[%s5886_s20 + $0xfb] sm:$0xff] }
  0x72   : > { %v2035_v15 = vld [vmem:[%s5886_s20 + $0xf4] sm:$0xff] }
  0x77   : > { %5177 = vmatmul.mubr.msk.bf16.gmra.mxu0 %vm559_vm1, %v1072_v16  ;;  %v2015_v16 = vld [vmem:[%s5886_s20 + $0x54] sm:$0xff] }
  0x78   : > { %5215 = vmatmul.mubr.msk.bf16.gmra.mxu1 %vm559_vm1, %v1398_v22  ;;  %5180 = vmatprep.mubr.msk.bf16.mxu0 %vm559_vm1, %v1398_v22  ;;  %v6150_v21 = vpack.c.bf16 %v2016_v17, %v2015_v16  ;;  %v1691_v22 = vld [vmem:[%s5886_s20 + $0x63] sm:$0xff] }
  0x79   : > { %5218 = vmatprep.mubr.msk.bf16.mxu1 %vm559_vm1, %v1074_v23  ;;  %v2036_v16 = vld [vmem:[%s5886_s20 + $0xfc] sm:$0xff] }
  0x7f   : > { %5181 = vmatmul.mubr.msk.bf16.gmra.mxu0 %vm559_vm1, %v1074_v23  ;;  %v1692_v23 = vld [vmem:[%s5886_s20 + $0x6b] sm:$0xff] }
  0x80   : > { %5219 = vmatmul.mubr.msk.bf16.gmra.mxu1 %vm559_vm1, %v1400_v29  ;;  %5184 = vmatprep.mubr.msk.bf16.mxu0 %vm559_vm1, %v1400_v29  ;;  %v2019_v29 = vld [vmem:[%s5886_s20 + $0x74] sm:$0xff]  ;;  %v1722_v31 = vpack.c.bf16 %v1692_v23, %v1691_v22  ;;  %v6240_v22 = vpack.c.bf16 %v2036_v16, %v2035_v15 }
  0x81   : > { %5222 = vmatprep.mubr.msk.bf16.mxu1 %vm559_vm1, %v1076_v30 }
  0x87   : > { %5185 = vmatmul.mubr.msk.bf16.gmra.mxu0 %vm559_vm1, %v1076_v30  ;;  %v2020_v30 = vld [vmem:[%s5886_s20 + $0x7c] sm:$0xff] }
  0x88   : > { %5223 = vmatmul.mubr.msk.bf16.gmra.mxu1 %vm559_vm1, %v1402_v35  ;;  %5188 = vmatprep.mubr.msk.bf16.mxu0 %vm559_vm1, %v1402_v35  ;;  %v6168_v34 = vpack.c.bf16 %v2020_v30, %v2019_v29  ;;  %v1695_v35 = vld [vmem:[%s5886_s20 + $0x83] sm:$0xff] }
  0x89   : > { %5226 = vmatprep.mubr.msk.bf16.mxu1 %vm559_vm1, %v1078_v36 }
  0x8f   : > { %5189 = vmatmul.mubr.msk.bf16.gmra.mxu0 %vm559_vm1, %v1078_v36  ;;  %v1696_v36 = vld [vmem:[%s5886_s20 + $0x8b] sm:$0xff] }
  0x90   : > { %5227 = vmatmul.mubr.msk.bf16.gmra.mxu1 %vm559_vm1, %v1404_v41  ;;  %5192 = vmatprep.mubr.msk.bf16.mxu0 %vm559_vm1, %v1404_v41  ;;  %v2023_v41 = vld [vmem:[%s5886_s20 + $0x94] sm:$0xff]  ;;  %v1724_v43 = vpack.c.bf16 %v1696_v36, %v1695_v35 }
  0x91   : > { %5230 = vmatprep.mubr.msk.bf16.mxu1 %vm559_vm1, %v1080_v42  ;;  %v1714_v35 = vld [vmem:[%s5886_s20 + $0x11b] sm:$0xff] }
  0x97   : > { %5193 = vmatmul.mubr.msk.bf16.gmra.mxu0 %vm559_vm1, %v1080_v42  ;;  %v2024_v42 = vld [vmem:[%s5886_s20 + $0x9c] sm:$0xff] }
  0x98   : > { %5231 = vmatmul.mubr.msk.bf16.gmra.mxu1 %vm559_vm1, %v1406_v47  ;;  %5196 = vmatprep.mubr.msk.bf16.mxu0 %vm559_vm1, %v1406_v47  ;;  %v6186_v46 = vpack.c.bf16 %v2024_v42, %v2023_v41  ;;  %v1699_v47 = vld [vmem:[%s5886_s20 + $0xa3] sm:$0xff]  ;;  %v1732_v41 = vpack.c.bf16 %v1712_v27, %v1711_v25 }
  0x99   : > { %5234 = vmatprep.mubr.msk.bf16.mxu1 %vm559_vm1, %v1407_v48  ;;  %v1700_v48 = vld [vmem:[%s5886_s20 + $0xab] sm:$0xff] }
  0x9a   : > { %v1726_v55 = vpack.c.bf16 %v1700_v48, %v1699_v47  ;;  %v2663_v27 = vld [vmem:[%s5886_s20 + $0x45] sm:$0xff] }
  0x9f   : > { %5197 = vmatmul.mubr.msk.bf16.gmra.mxu0 %vm559_vm1, %v1082_v56  ;;  %v6202_v56 = vpack.c.bf16 %v2026_v50, %v2025_v49  ;;  %v6264_v49 = vpack.c.bf16 %v2040_v38, %v2039_v37 }
  0xa0   : > { %5235 = vmatmul.mubr.msk.bf16.gmra.mxu1 %vm559_vm1, %v1408_v57  ;;  %5240 = vmatprep.mubr.msk.bf16.mxu0 %vm559_vm1, %v1717_v58  ;;  %v1727_v57 = vpack.c.bf16 %v1702_v52, %v1701_v51  ;;  %v6204_v58 = vpack.c.bf16 %v2028_v54, %v2027_v53  ;;  %v1715_v54 = vld [vmem:[%s5886_s20 + $0x123] sm:$0xff] }
  0xa1   : > { %5278 = vmatprep.mubr.msk.bf16.mxu1 %vm559_vm1, %v2043_v59  ;;  %v1703_v59 = vld [vmem:[%s5886_s20 + $0xc3] sm:$0xff] }
  0xa2   : > { %v1728_v3 = vpack.c.bf16 %v1704_v60, %v1703_v59  ;;  %v6279_v60 = vld [vmem:[%s5886_s20 + $0x124] sm:$0xff] }
  0xa7   : > { %5241 = vmatmul.mubr.msk.bf16.vlgmr.msra.gmra.mxu0 %vm559_vm1, %v1718_v4  ;;  %v6220_v4 = vpack.c.bf16 %v2030_v62, %v2029_v61  ;;  %v2042_v61 = vld [vmem:[%s5886_s20 + $0x12c] sm:$0x3f] }
  0xa8   : > { %5279 = vmatmul.mubr.msk.bf16.vlgmr.msra.gmra.mxu1 %vm559_vm1, %v6119_v26  ;;  %5244 = vmatprep.mubr.msk.bf16.mxu0 %vm559_vm1, %v1719_v6  ;;  %v1729_v6 = vpack.c.bf16 %v1706_v0, %v1705_v63  ;;  %v2659_v63 = vld [vmem:[%s5886_s20 + $0x25] sm:$0xff]  ;;  %v2660_v0 = vld [vmem:[%s5886_s20 + $0x2d] sm:$0xff] }
  0xa9   : > { %5282 = vmatprep.mubr.msk.bf16.mxu1 %vm559_vm1, %v6121_v7  ;;  %5315 = vmatpush3.bf16.msra.mxu0 %v2444_v8  ;;  %v6222_v8 = vpack.c.bf16 %v2032_v2, %v2031_v1 }
  0xaa   : > { %5353 = vmatpush3.bf16.msra.mxu1 %v2770_v9  ;;  %5598 = vmatprep.subr.msk.bf16.mxu0 %vm614_vm0, %v6131_v10  ;;  %v1707_v9 = vld [vmem:[%s5886_s20 + $0xe3] sm:$0xff] }
  0xab   : > { %v1730_v17 = vpack.c.bf16 %v1708_v11, %v1707_v9  ;;  %v2060_v9 = vpack.c.bf16 %v2042_v61, %v6279_v60 }
  0xaf   : > { %5245 = vmatmul.mubr.msk.bf16.gmra.mxu0 %vm559_vm1, %v1720_v18  ;;  %v6238_v18 = vpack.c.bf16 %v2034_v13, %v2033_v12  ;;  %v2695_v13 = vpack.c.bf16 %v2660_v0, %v2659_v63 }
  0xb0   : > { %5283 = vmatmul.mubr.msk.bf16.gmra.mxu1 %vm559_vm1, %v6148_v19  ;;  %5248 = vmatprep.mubr.msk.bf16.mxu0 %vm559_vm1, %v1721_v20  ;;  %v1731_v20 = vpack.c.bf16 %v1710_v14, %v1709_v5 }
  0xb1   : > { %5286 = vmatprep.mubr.msk.bf16.mxu1 %vm559_vm1, %v6150_v21 }
  0xb7   : > { %5249 = vmatmul.mubr.msk.bf16.gmra.mxu0 %vm559_vm1, %v1722_v31  ;;  %v2038_v31 = vld [vmem:[%s5886_s20 + $0x10c] sm:$0xff] }
  0xb8   : > { %5287 = vmatmul.mubr.msk.bf16.gmra.mxu1 %vm559_vm1, %v6166_v32  ;;  %5252 = vmatprep.mubr.msk.bf16.mxu0 %vm559_vm1, %v1723_v33  ;;  %v1713_v33 = vld [vmem:[%s5886_s20 + $0x113] sm:$0xff] }
  0xb9   : > { %5290 = vmatprep.mubr.msk.bf16.mxu1 %vm559_vm1, %v6168_v34 }
  0xbf   : > { %5253 = vmatmul.mubr.msk.bf16.gmra.mxu0 %vm559_vm1, %v1724_v43  ;;  %v6260_v43 = vpack.c.bf16 %v2038_v31, %v2037_v28  ;;  %v2664_v28 = vld [vmem:[%s5886_s20 + $0x4d] sm:$0xff] }
  0xc0   : > { %5291 = vmatmul.mubr.msk.bf16.gmra.mxu1 %vm559_vm1, %v6184_v44  ;;  %5256 = vmatprep.mubr.msk.bf16.mxu0 %vm559_vm1, %v1725_v45  ;;  %v1733_v45 = vpack.c.bf16 %v1714_v35, %v1713_v33  ;;  %v2697_v37 = vpack.c.bf16 %v2664_v28, %v2663_v27 }
  0xc1   : > { %5294 = vmatprep.mubr.msk.bf16.mxu1 %vm559_vm1, %v6186_v46 }
  0xc7   : > { %5257 = vmatmul.mubr.msk.bf16.gmra.mxu0 %vm559_vm1, %v1726_v55  ;;  %v1716_v55 = vld [vmem:[%s5886_s20 + $0x12b] sm:$0x3f] }
  0xc8   : > { %5295 = vmatmul.mubr.msk.bf16.gmra.mxu1 %vm559_vm1, %v6202_v56  ;;  %5260 = vmatprep.mubr.msk.bf16.mxu0 %vm559_vm1, %v1727_v57 }
  0xc9   : > { %5298 = vmatprep.mubr.msk.bf16.mxu1 %vm559_vm1, %v6204_v58 }
  0xcf   : > { %5261 = vmatmul.mubr.msk.bf16.gmra.mxu0 %vm559_vm1, %v1728_v3  ;;  %v1734_v3 = vpack.c.bf16 %v1716_v55, %v1715_v54  ;;  %v2667_v54 = vld [vmem:[%s5886_s20 + $0x65] sm:$0xff]  ;;  %v2668_v55 = vld [vmem:[%s5886_s20 + $0x6d] sm:$0xff] }
  0xd0   : > { %5299 = vmatmul.mubr.msk.bf16.gmra.mxu1 %vm559_vm1, %v6220_v4  ;;  %5264 = vmatprep.mubr.msk.bf16.mxu0 %vm559_vm1, %v1729_v6  ;;  %v2699_v0 = vpack.c.bf16 %v2668_v55, %v2667_v54 }
  0xd1   : > { %5302 = vmatprep.mubr.msk.bf16.mxu1 %vm559_vm1, %v6222_v8 }
  0xd7   : > { %v5090_v23 = vpop.f32.mrf.mxu0  ;;  %5265 = vmatmul.mubr.msk.bf16.gmra.mxu0 %vm559_vm1, %v1730_v17 }
  0xd8   : > { %v5128_v24 = vpop.f32.mrf.mxu1  ;;  %5303 = vmatmul.mubr.msk.bf16.gmra.mxu1 %vm559_vm1, %v6238_v18  ;;  %5268 = vmatprep.mubr.msk.bf16.mxu0 %vm559_vm1, %v1731_v20 }
  0xd9   : > { %v6249_v29 = vadd.f32 %v5128_v24, %v5090_v23  ;;  %v652_v30 = vpop.f32.mrf.mxu0  ;;  %5306 = vmatprep.mubr.msk.bf16.mxu1 %vm559_vm1, %v6240_v22  ;;  %v2661_v23 = vld [vmem:[%s5886_s20 + $0x35] sm:$0xff]  ;;  %v2662_v24 = vld [vmem:[%s5886_s20 + $0x3d] sm:$0xff] }
  0xda   : > { %v886_v36 = vpop.f32.mrf.mxu1  ;;  %v2696_v35 = vpack.c.bf16 %v2662_v24, %v2661_v23  ;;  %v2672_v23 = vld [vmem:[%s5886_s20 + $0x8d] sm:$0xff] }
  0xdb   : > { %v6258_v39 = vadd.f32 %v886_v36, %v652_v30  ;;  %v5091_v40 = vpop.f32.mrf.mxu0 }
  0xdc   : > { %v5129_v42 = vpop.f32.mrf.mxu1 }
  0xdd   : > { %v6262_v47 = vadd.f32 %v5129_v42, %v5091_v40  ;;  %v655_v48 = vpop.f32.mrf.mxu0  ;;  %v3096_v40 = vsel %vm614_vm0, %v6131_v10, 0 }
  0xde   : > { %v889_v50 = vpop.f32.mrf.mxu1 }
  0xdf   : > { %v6266_v51 = vadd.f32 %v889_v50, %v655_v48  ;;  %v5094_v52 = vpop.f32.mrf.mxu0  ;;  %5269 = vmatmul.mubr.msk.bf16.gmra.mxu0 %vm559_vm1, %v1732_v41 }
  0xe0   : > { %v5132_v53 = vpop.f32.mrf.mxu1  ;;  %5307 = vmatmul.mubr.msk.bf16.gmra.mxu1 %vm559_vm1, %v6260_v43  ;;  %5272 = vmatprep.mubr.msk.bf16.mxu0 %vm559_vm1, %v1733_v45 }
  0xe1   : > { %v6274_v57 = vadd.f32 %v5132_v53, %v5094_v52  ;;  %v668_v59 = vpop.f32.mrf.mxu0  ;;  %5310 = vmatprep.mubr.msk.bf16.mxu1 %vm559_vm1, %v6264_v49  ;;  %v2665_v52 = vld [vmem:[%s5886_s20 + $0x55] sm:$0xff]  ;;  %v2666_v53 = vld [vmem:[%s5886_s20 + $0x5d] sm:$0xff] }
  0xe2   : > { %v902_v62 = vpop.f32.mrf.mxu1 }
  0xe3   : > { %v6284_v1 = vadd.f32 %v902_v62, %v668_v59  ;;  %v5095_v2 = vpop.f32.mrf.mxu0  ;;  %v2698_v62 = vpack.c.bf16 %v2666_v53, %v2665_v52  ;;  %v2675_v52 = vld [vmem:[%s5886_s20 + $0xa5] sm:$0xff]  ;;  %v2676_v53 = vld [vmem:[%s5886_s20 + $0xad] sm:$0xff] }
  0xe4   : > { %v5133_v6 = vpop.f32.mrf.mxu1 }
  0xe5   : > { %v6287_v11 = vadd.f32 %v5133_v6, %v5095_v2  ;;  %v671_v12 = vpop.f32.mrf.mxu0 }
  0xe6   : > { %v905_v5 = vpop.f32.mrf.mxu1 }
  0xe7   : > { %v6289_v14 = vadd.f32 %v905_v5, %v671_v12  ;;  %v5098_v15 = vpop.f32.mrf.mxu0  ;;  %5273 = vmatmul.mubr.msk.bf16.gmra.mxu0 %vm559_vm1, %v1734_v3  ;;  %v2669_v5 = vld [vmem:[%s5886_s20 + $0x75] sm:$0xff] }
  0xe8   : > { %v5136_v16 = vpop.f32.mrf.mxu1  ;;  %5311 = vmatmul.mubr.msk.bf16.gmra.mxu1 %vm559_vm1, %v2060_v9  ;;  %5316 = vmatprep.mubr.msk.bf16.mxu0 %vm559_vm1, %v6119_v26 }
  0xe9   : > { %v6295_v17 = vadd.f32 %v5136_v16, %v5098_v15  ;;  %v684_v20 = vpop.f32.mrf.mxu0  ;;  %5354 = vmatprep.mubr.msk.bf16.mxu1 %vm559_vm1, %v2695_v13  ;;  %v2670_v15 = vld [vmem:[%s5886_s20 + $0x7d] sm:$0xff] }
  0xea   : > { %v918_v25 = vpop.f32.mrf.mxu1  ;;  %v2700_v27 = vpack.c.bf16 %v2670_v15, %v2669_v5  ;;  %v2678_v5 = vld [vmem:[%s5886_s20 + $0xbd] sm:$0xff] }
  0xeb   : > { %v6302_v30 = vadd.f32 %v918_v25, %v684_v20  ;;  %v5099_v31 = vpop.f32.mrf.mxu0  ;;  %v2671_v20 = vld [vmem:[%s5886_s20 + $0x85] sm:$0xff] }
  0xec   : > { %v5137_v33 = vpop.f32.mrf.mxu1 }
  0xed   : > { %v6304_v36 = vadd.f32 %v5137_v33, %v5099_v31  ;;  %v687_v26 = vpop.f32.mrf.mxu0  ;;  %v2701_v31 = vpack.c.bf16 %v2672_v23, %v2671_v20  ;;  %v2680_v20 = vld [vmem:[%s5886_s20 + $0xcd] sm:$0xff] }
  0xee   : > { %v921_v38 = vpop.f32.mrf.mxu1 }
  0xef   : > { %v6308_v41 = vadd.f32 %v921_v38, %v687_v26  ;;  %v5102_v42 = vpop.f32.mrf.mxu0  ;;  %5317 = vmatmul.mubr.msk.bf16.vlgmr.msra.gmra.mxu0 %vm559_vm1, %v6121_v7 }
  0xf0   : > { %v5140_v45 = vpop.f32.mrf.mxu1  ;;  %5355 = vmatmul.mubr.msk.bf16.vlgmr.msra.gmra.mxu1 %vm559_vm1, %v2696_v35  ;;  %5320 = vmatprep.mubr.msk.bf16.mxu0 %vm559_vm1, %v6148_v19 }
  0xf1   : > { %v6315_v48 = vadd.f32 %v5140_v45, %v5102_v42  ;;  %v700_v50 = vpop.f32.mrf.mxu0  ;;  %5358 = vmatprep.mubr.msk.bf16.mxu1 %vm559_vm1, %v2697_v37  ;;  %5391 = vmatpush3.bf16.msra.mxu0 %v3096_v40  ;;  %v2673_v42 = vld [vmem:[%s5886_s20 + $0x95] sm:$0xff]  ;;  %v2674_v45 = vld [vmem:[%s5886_s20 + $0x9d] sm:$0xff] }
  0xf2   : > { %v934_v10 = vpop.f32.mrf.mxu1  ;;  %v2702_v55 = vpack.c.bf16 %v2674_v45, %v2673_v42  ;;  %v2681_v45 = vld [vmem:[%s5886_s20 + $0xd5] sm:$0xff] }
  0xf3   : > { %v6322_v59 = vadd.f32 %v934_v10, %v700_v50  ;;  %v5103_v7 = vpop.f32.mrf.mxu0 }
  0xf4   : > { %v5141_v61 = vpop.f32.mrf.mxu1 }
  0xf5   : > { %v6324_v63 = vadd.f32 %v5141_v61, %v5103_v7  ;;  %v703_v19 = vpop.f32.mrf.mxu0  ;;  %v2703_v61 = vpack.c.bf16 %v2676_v53, %v2675_v52  ;;  %v2683_v53 = vld [vmem:[%s5886_s20 + $0xe5] sm:$0xff] }
  0xf6   : > { %v937_v2 = vpop.f32.mrf.mxu1 }
  0xf7   : > { %v6326_v3 = vadd.f32 %v937_v2, %v703_v19  ;;  %v5106_v6 = vpop.f32.mrf.mxu0  ;;  %5321 = vmatmul.mubr.msk.bf16.gmra.mxu0 %vm559_vm1, %v6150_v21 }
  0xf8   : > { %v5144_v9 = vpop.f32.mrf.mxu1  ;;  %5359 = vmatmul.mubr.msk.bf16.gmra.mxu1 %vm559_vm1, %v2698_v62  ;;  %5324 = vmatprep.mubr.msk.bf16.mxu0 %vm559_vm1, %v6166_v32 }
  0xf9   : > { %v6333_v12 = vadd.f32 %v5144_v9, %v5106_v6  ;;  %v716_v13 = vpop.f32.mrf.mxu0  ;;  %5362 = vmatprep.mubr.msk.bf16.mxu1 %vm559_vm1, %v2699_v0 }
  0xfa   : > { %v950_v16 = vpop.f32.mrf.mxu1 }
  0xfb   : > { %v6340_v24 = vadd.f32 %v950_v16, %v716_v13  ;;  %v5107_v25 = vpop.f32.mrf.mxu0  ;;  %v2677_v13 = vld [vmem:[%s5886_s20 + $0xb5] sm:$0xff]  ;;  %v2679_v16 = vld [vmem:[%s5886_s20 + $0xc5] sm:$0xff] }
  0xfc   : > { %v5145_v21 = vpop.f32.mrf.mxu1 }
  0xfd   : > { %v6342_v28 = vadd.f32 %v5145_v21, %v5107_v25  ;;  %v719_v32 = vpop.f32.mrf.mxu0  ;;  %v2704_v21 = vpack.c.bf16 %v2678_v5, %v2677_v13 }
  0xfe   : > { %v953_v33 = vpop.f32.mrf.mxu1 }
  0xff   : > { %v6344_v35 = vadd.f32 %v953_v33, %v719_v32  ;;  %v5110_v26 = vpop.f32.mrf.mxu0  ;;  %5325 = vmatmul.mubr.msk.bf16.gmra.mxu0 %vm559_vm1, %v6168_v34  ;;  %v2705_v32 = vpack.c.bf16 %v2680_v20, %v2679_v16  ;;  %v2685_v16 = vld [vmem:[%s5886_s20 + $0xf5] sm:$0xff]  ;;  %v2686_v20 = vld [vmem:[%s5886_s20 + $0xfd] sm:$0xff] }
 0x100   : > { %v5148_v37 = vpop.f32.mrf.mxu1  ;;  %5363 = vmatmul.mubr.msk.bf16.gmra.mxu1 %vm559_vm1, %v2700_v27  ;;  %5328 = vmatprep.mubr.msk.bf16.mxu0 %vm559_vm1, %v6184_v44 }
 0x101   : > { %v6351_v38 = vadd.f32 %v5148_v37, %v5110_v26  ;;  %v732_v40 = vpop.f32.mrf.mxu0  ;;  %5366 = vmatprep.mubr.msk.bf16.mxu1 %vm559_vm1, %v2701_v31 }
 0x102   : > { %v966_v50 = vpop.f32.mrf.mxu1 }
 0x103   : > { %v6358_v10 = vadd.f32 %v966_v50, %v732_v40  ;;  %v5111_v54 = vpop.f32.mrf.mxu0  ;;  %v2682_v50 = vld [vmem:[%s5886_s20 + $0xdd] sm:$0xff] }
 0x104   : > { %v5149_v34 = vpop.f32.mrf.mxu1 }
 0x105   : > { %v6360_v7 = vadd.f32 %v5149_v34, %v5111_v54  ;;  %v735_v44 = vpop.f32.mrf.mxu0  ;;  %v2684_v54 = vld [vmem:[%s5886_s20 + $0xed] sm:$0xff] }
 0x106   : > { %v969_v62 = vpop.f32.mrf.mxu1 }
 0x107   : > { %v6362_v19 = vadd.f32 %v969_v62, %v735_v44  ;;  %v5114_v0 = vpop.f32.mrf.mxu0  ;;  %5329 = vmatmul.mubr.msk.bf16.gmra.mxu0 %vm559_vm1, %v6186_v46  ;;  %v2706_v44 = vpack.c.bf16 %v2682_v50, %v2681_v45  ;;  %v2707_v62 = vpack.c.bf16 %v2684_v54, %v2683_v53  ;;  %v2689_v53 = vld [vmem:[%s5886_s20 + $0x115] sm:$0xff]  ;;  %v2690_v54 = vld [vmem:[%s5886_s20 + $0x11d] sm:$0xff] }
 0x108   : > { %v5152_v2 = vpop.f32.mrf.mxu1  ;;  %5367 = vmatmul.mubr.msk.bf16.gmra.mxu1 %vm559_vm1, %v2702_v55  ;;  %5332 = vmatprep.mubr.msk.bf16.mxu0 %vm559_vm1, %v6202_v56 }
 0x109   : > { %v6369_v6 = vadd.f32 %v5152_v2, %v5114_v0  ;;  %v748_v9 = vpop.f32.mrf.mxu0  ;;  %5370 = vmatprep.mubr.msk.bf16.mxu1 %vm559_vm1, %v2703_v61 }
 0x10a   : > { %v982_v15 = vpop.f32.mrf.mxu1 }
 0x10b   : > { %v6376_v23 = vadd.f32 %v982_v15, %v748_v9  ;;  %v5115_v25 = vpop.f32.mrf.mxu0 }
 0x10c   : > { %v5153_v46 = vpop.f32.mrf.mxu1 }
 0x10d   : > { %v6378_v27 = vadd.f32 %v5153_v46, %v5115_v25  ;;  %v751_v56 = vpop.f32.mrf.mxu0  ;;  %v2687_v46 = vld [vmem:[%s5886_s20 + $0x105] sm:$0xff] }
 0x10e   : > { %v985_v31 = vpop.f32.mrf.mxu1 }
 0x10f   : > { %v6380_v33 = vadd.f32 %v985_v31, %v751_v56  ;;  %v5118_v26 = vpop.f32.mrf.mxu0  ;;  %5333 = vmatmul.mubr.msk.bf16.gmra.mxu0 %vm559_vm1, %v6204_v58 }
 0x110   : > { %v5156_v37 = vpop.f32.mrf.mxu1  ;;  %5371 = vmatmul.mubr.msk.bf16.gmra.mxu1 %vm559_vm1, %v2704_v21  ;;  %5336 = vmatprep.mubr.msk.bf16.mxu0 %vm559_vm1, %v6220_v4  ;;  %v2688_v21 = vld [vmem:[%s5886_s20 + $0x10d] sm:$0xff] }
 0x111   : > { %v6387_v40 = vadd.f32 %v5156_v37, %v5118_v26  ;;  %v764_v42 = vpop.f32.mrf.mxu0  ;;  %5374 = vmatprep.mubr.msk.bf16.mxu1 %vm559_vm1, %v2705_v32  ;;  %v2708_v32 = vpack.c.bf16 %v2686_v20, %v2685_v16  ;;  %v2709_v26 = vpack.c.bf16 %v2688_v21, %v2687_v46 }
 0x112   : > { %v998_v52 = vpop.f32.mrf.mxu1 }
 0x113   : > { %v6394_v34 = vadd.f32 %v998_v52, %v764_v42  ;;  %v5119_v55 = vpop.f32.mrf.mxu0 }
 0x114   : > { %v5157_v58 = vpop.f32.mrf.mxu1 }
 0x115   : > { %v6396_v61 = vadd.f32 %v5157_v58, %v5119_v55  ;;  %v767_v4 = vpop.f32.mrf.mxu0  ;;  %v2366_v55 = vld [vmem:[%s5886_s20 + $0x12c] sm:$0xff] }
 0x116   : > { %v1001_v0 = vpop.f32.mrf.mxu1 }
 0x117   : > { %v6398_v2 = vadd.f32 %v1001_v0, %v767_v4  ;;  %v5122_v9 = vpop.f32.mrf.mxu0  ;;  %5337 = vmatmul.mubr.msk.bf16.gmra.mxu0 %vm559_vm1, %v6222_v8  ;;  %v2692_v4 = vld [vmem:[%s5886_s20 + $0x12d] sm:$0xff] }
 0x118   : > { %v5160_v13 = vpop.f32.mrf.mxu1  ;;  %5375 = vmatmul.mubr.msk.bf16.gmra.mxu1 %vm559_vm1, %v2706_v44  ;;  %5340 = vmatprep.mubr.msk.bf16.mxu0 %vm559_vm1, %v6238_v18 }
 0x119   : > { %v6405_v5 = vadd.f32 %v5160_v13, %v5122_v9  ;;  %v6407_v15 = vpop.f32.mrf.mxu0  ;;  %5378 = vmatprep.mubr.msk.bf16.mxu1 %vm559_vm1, %v2707_v62  ;;  %v2710_v9 = vpack.c.bf16 %v2690_v54, %v2689_v53  ;;  %v2385_v13 = vpack.c.bf16 %v2366_v55, %v6279_v60  ;;  %v2367_v60 = vld [vmem:[%s5886_s20 + $0x134] sm:$0xff] }
 0x11a   : > { %v6412_v25 = vpop.f32.mrf.mxu1 }
 0x11b   : > { %v5123_v8 = vpop.f32.mrf.mxu0 }
 0x11c   : > { %v5161_v56 = vpop.f32.mrf.mxu1 }
 0x11d   : > { %v6416_v31 = vadd.f32 %v5161_v56, %v5123_v8  ;;  %v6418_v18 = vpop.f32.mrf.mxu0 }
 0x11e   : > { %v6420_v37 = vpop.f32.mrf.mxu1 }
 0x11f   : > { %v5166_v42 = vpop.f32.mrf.mxu0  ;;  %5341 = vmatmul.mubr.msk.bf16.gmra.mxu0 %vm559_vm1, %v6240_v22 }
 0x120   : > { %v1321_v45 = vadd.f32 %v5166_v42, %v6249_v29  ;;  %v5204_v50 = vpop.f32.mrf.mxu1  ;;  %5379 = vmatmul.mubr.msk.bf16.gmra.mxu1 %vm559_vm1, %v2708_v32  ;;  %5344 = vmatprep.mubr.msk.bf16.mxu0 %vm559_vm1, %v6260_v43  ;;  %v2691_v29 = vld [vmem:[%s5886_s20 + $0x125] sm:$0xff]  ;;  %v2368_v32 = vld [vmem:[%s5886_s20 + $0x13c] sm:$0x3f] }
 0x121   : > { %v1176_v52 = vpop.f32.mrf.mxu0  ;;  %5382 = vmatprep.mubr.msk.bf16.mxu1 %vm559_vm1, %v2709_v26  ;;  %v2694_v42 = vld [vmem:[%s5886_s20 + $0x13d] sm:$0x3f]  ;;  %v2386_v54 = vpack.c.bf16 %v2368_v32, %v2367_v60  ;;  %v2989_v60 = vld [vmem:[%s5886_s20 + $0x46] sm:$0xff] }
 0x122   : > { %v6433_v58 = vadd.f32 %v1176_v52, %v6258_v39  ;;  %v6435_v44 = vadd.f32 %v5204_v50, %v1321_v45  ;;  %v6437_v22 = vpop.f32.mrf.mxu1  ;;  %v2711_v39 = vpack.c.bf16 %v2692_v4, %v2691_v29  ;;  %v2985_v45 = vld [vmem:[%s5886_s20 + $0x26] sm:$0xff]  ;;  %v2986_v50 = vld [vmem:[%s5886_s20 + $0x2e] sm:$0xff] }
 0x123   : > { %v5167_v62 = vpop.f32.mrf.mxu0 }
 0x124   : > { %v1322_v0 = vadd.f32 %v5167_v62, %v6262_v47  ;;  %v5205_v43 = vpop.f32.mrf.mxu1  ;;  %v3021_v62 = vpack.c.bf16 %v2986_v50, %v2985_v45 }
 0x125   : > { %v1179_v16 = vpop.f32.mrf.mxu0 }
 0x126   : > { %v6444_v20 = vadd.f32 %v1179_v16, %v6266_v51  ;;  %v6446_v46 = vadd.f32 %v5205_v43, %v1322_v0  ;;  %v6448_v21 = vpop.f32.mrf.mxu1  ;;  %v2693_v51 = vld [vmem:[%s5886_s20 + $0x135] sm:$0xff] }
 0x127   : > { %v5170_v8 = vpop.f32.mrf.mxu0  ;;  %5345 = vmatmul.mubr.msk.bf16.gmra.mxu0 %vm559_vm1, %v6264_v49  ;;  %v2712_v4 = vpack.c.bf16 %v2694_v42, %v2693_v51 }
 0x128   : > { %v1325_v47 = vadd.f32 %v5170_v8, %v6274_v57  ;;  %v5208_v56 = vpop.f32.mrf.mxu1  ;;  %5383 = vmatmul.mubr.msk.bf16.gmra.mxu1 %vm559_vm1, %v2710_v9  ;;  %5348 = vmatprep.mubr.msk.bf16.mxu0 %vm559_vm1, %v2385_v13  ;;  %v2987_v8 = vld [vmem:[%s5886_s20 + $0x36] sm:$0xff] }
 0x129   : > { %v1192_v26 = vpop.f32.mrf.mxu0  ;;  %5386 = vmatprep.mubr.msk.bf16.mxu1 %vm559_vm1, %v2711_v39 }
 0x12a   : > { %v6463_v52 = vadd.f32 %v1192_v26, %v6284_v1  ;;  %v6465_v49 = vadd.f32 %v5208_v56, %v1325_v47  ;;  %v6467_v57 = vpop.f32.mrf.mxu1  ;;  %v2988_v47 = vld [vmem:[%s5886_s20 + $0x3e] sm:$0xff] }
 0x12b   : > { %v5171_v53 = vpop.f32.mrf.mxu0 }
 0x12c   : > { %v1326_v55 = vadd.f32 %v5171_v53, %v6287_v11  ;;  %v5209_v29 = vpop.f32.mrf.mxu1 }
 0x12d   : > { %v1195_v0 = vpop.f32.mrf.mxu0 }
 0x12e   : > { %v1324_v43 = vadd.f32 %v1195_v0, %v6289_v14  ;;  %v6471_v1 = vadd.f32 %v5209_v29, %v1326_v55  ;;  %v1521_v9 = vpop.f32.mrf.mxu1  ;;  %v2990_v14 = vld [vmem:[%s5886_s20 + $0x4e] sm:$0xff] }
 0x12f   : > { %v5174_v13 = vpop.f32.mrf.mxu0  ;;  %5349 = vmatmul.mubr.msk.bf16.gmra.mxu0 %vm559_vm1, %v2386_v54  ;;  %v3023_v54 = vpack.c.bf16 %v2990_v14, %v2989_v60 }
 0x130   : > { %v1329_v16 = vadd.f32 %v5174_v13, %v6295_v17  ;;  %v6475_v39 = vadd.f32 %v1521_v9, %v1324_v43  ;;  %v5212_v11 = vpop.f32.mrf.mxu1  ;;  %5387 = vmatmul.mubr.msk.bf16.gmra.mxu1 %vm559_vm1, %v2712_v4  ;;  %5392 = vmatprep.mubr.msk.bf16.mxu0 %vm559_vm1, %v3021_v62  ;;  %v3022_v17 = vpack.c.bf16 %v2988_v47, %v2987_v8  ;;  %v2991_v9 = vld [vmem:[%s5886_s20 + $0x56] sm:$0xff]  ;;  %v2992_v13 = vld [vmem:[%s5886_s20 + $0x5e] sm:$0xff]  ;;  %v2994_v8 = vld [vmem:[%s5886_s20 + $0x6e] sm:$0xff] }
 0x131   : > { %v1208_v56 = vpop.f32.mrf.mxu0  ;;  %v3024_v14 = vpack.c.bf16 %v2992_v13, %v2991_v9  ;;  %v2998_v9 = vld [vmem:[%s5886_s20 + $0x8e] sm:$0xff] }
 0x132   : > { %v1327_v32 = vadd.f32 %v1208_v56, %v6302_v30  ;;  %v6484_v51 = vadd.f32 %v5212_v11, %v1329_v16  ;;  %v1534_v26 = vpop.f32.mrf.mxu1  ;;  %v2993_v11 = vld [vmem:[%s5886_s20 + $0x66] sm:$0xff] }
 0x133   : > { %v5175_v42 = vpop.f32.mrf.mxu0 }
 0x134   : > { %v1330_v45 = vadd.f32 %v5175_v42, %v6304_v36  ;;  %v6487_v50 = vadd.f32 %v1534_v26, %v1327_v32  ;;  %v5213_v53 = vpop.f32.mrf.mxu1  ;;  %v3025_v42 = vpack.c.bf16 %v2994_v8, %v2993_v11 }
 0x135   : > { %v1211_v55 = vpop.f32.mrf.mxu0 }
 0x136   : > { %v1328_v29 = vadd.f32 %v1211_v55, %v6308_v41  ;;  %v6490_v4 = vadd.f32 %v5213_v53, %v1330_v45  ;;  %v1537_v30 = vpop.f32.mrf.mxu1 }
 0x137   : > { %v5178_v62 = vpop.f32.mrf.mxu0  ;;  %5393 = vmatmul.mubr.msk.bf16.vlgmr.msra.gmra.mxu0 %vm559_vm1, %v3022_v17 }
 0x138   : > { %v1333_v0 = vadd.f32 %v5178_v62, %v6315_v48  ;;  %v6494_v43 = vadd.f32 %v1537_v30, %v1328_v29  ;;  %v5216_v36 = vpop.f32.mrf.mxu1  ;;  %5396 = vmatprep.mubr.msk.bf16.mxu0 %vm559_vm1, %v3023_v54  ;;  %v2995_v30 = vld [vmem:[%s5886_s20 + $0x76] sm:$0xff]  ;;  %v2996_v62 = vld [vmem:[%s5886_s20 + $0x7e] sm:$0xff] }
 0x139   : > { %v1224_v16 = vpop.f32.mrf.mxu0  ;;  %v3026_v8 = vpack.c.bf16 %v2996_v62, %v2995_v30  ;;  %v3002_v30 = vld [vmem:[%s5886_s20 + $0xae] sm:$0xff] }
 0x13a   : > { %v1331_v41 = vadd.f32 %v1224_v16, %v6322_v59  ;;  %v6502_v47 = vadd.f32 %v5216_v36, %v1333_v0  ;;  %v1550_v56 = vpop.f32.mrf.mxu1  ;;  %v2997_v36 = vld [vmem:[%s5886_s20 + $0x86] sm:$0xff] }
 0x13b   : > { %v5179_v60 = vpop.f32.mrf.mxu0 }
 0x13c   : > { %v1334_v48 = vadd.f32 %v5179_v60, %v6324_v63  ;;  %v6505_v32 = vadd.f32 %v1550_v56, %v1331_v41  ;;  %v5217_v26 = vpop.f32.mrf.mxu1  ;;  %v3027_v60 = vpack.c.bf16 %v2998_v9, %v2997_v36 }
 0x13d   : > { %v1227_v17 = vpop.f32.mrf.mxu0 }
 0x13e   : > { %v1332_v45 = vadd.f32 %v1227_v17, %v6326_v3  ;;  %v6508_v53 = vadd.f32 %v5217_v26, %v1334_v48  ;;  %v1553_v59 = vpop.f32.mrf.mxu1 }
 0x13f   : > { %v5182_v54 = vpop.f32.mrf.mxu0  ;;  %5397 = vmatmul.mubr.msk.bf16.gmra.mxu0 %vm559_vm1, %v3024_v14 }
 0x140   : > { %v1337_v55 = vadd.f32 %v5182_v54, %v6333_v12  ;;  %v6512_v29 = vadd.f32 %v1553_v59, %v1332_v45  ;;  %v5220_v63 = vpop.f32.mrf.mxu1  ;;  %5400 = vmatprep.mubr.msk.bf16.mxu0 %vm559_vm1, %v3025_v42  ;;  %v2999_v59 = vld [vmem:[%s5886_s20 + $0x96] sm:$0xff]  ;;  %v3000_v54 = vld [vmem:[%s5886_s20 + $0x9e] sm:$0xff] }
 0x141   : > { %v1240_v0 = vpop.f32.mrf.mxu0  ;;  %v3028_v9 = vpack.c.bf16 %v3000_v54, %v2999_v59  ;;  %v3006_v59 = vld [vmem:[%s5886_s20 + $0xce] sm:$0xff] }
 0x142   : > { %v1335_v3 = vadd.f32 %v1240_v0, %v6340_v24  ;;  %v6520_v13 = vadd.f32 %v5220_v63, %v1337_v55  ;;  %v1566_v16 = vpop.f32.mrf.mxu1  ;;  %v3001_v63 = vld [vmem:[%s5886_s20 + $0xa6] sm:$0xff] }
 0x143   : > { %v5183_v11 = vpop.f32.mrf.mxu0 }
 0x144   : > { %v1338_v12 = vadd.f32 %v5183_v11, %v6342_v28  ;;  %v6523_v41 = vadd.f32 %v1566_v16, %v1335_v3  ;;  %v5221_v56 = vpop.f32.mrf.mxu1  ;;  %v3029_v11 = vpack.c.bf16 %v3002_v30, %v3001_v63 }
 0x145   : > { %v1243_v14 = vpop.f32.mrf.mxu0 }
 0x146   : > { %v1336_v48 = vadd.f32 %v1243_v14, %v6344_v35  ;;  %v6526_v26 = vadd.f32 %v5221_v56, %v1338_v12  ;;  %v1569_v24 = vpop.f32.mrf.mxu1 }
 0x147   : > { %v5186_v42 = vpop.f32.mrf.mxu0  ;;  %5401 = vmatmul.mubr.msk.bf16.gmra.mxu0 %vm559_vm1, %v3026_v8 }
 0x148   : > { %v1341_v17 = vadd.f32 %v5186_v42, %v6351_v38  ;;  %v6530_v45 = vadd.f32 %v1569_v24, %v1336_v48  ;;  %v5224_v28 = vpop.f32.mrf.mxu1  ;;  %5404 = vmatprep.mubr.msk.bf16.mxu0 %vm559_vm1, %v3027_v60  ;;  %v3003_v24 = vld [vmem:[%s5886_s20 + $0xb6] sm:$0xff]  ;;  %v3004_v42 = vld [vmem:[%s5886_s20 + $0xbe] sm:$0xff] }
 0x149   : > { %v1256_v55 = vpop.f32.mrf.mxu0  ;;  %v3030_v30 = vpack.c.bf16 %v3004_v42, %v3003_v24  ;;  %v3010_v24 = vld [vmem:[%s5886_s20 + $0xee] sm:$0xff] }
 0x14a   : > { %v1339_v35 = vadd.f32 %v1256_v55, %v6358_v10  ;;  %v6538_v62 = vadd.f32 %v5224_v28, %v1341_v17  ;;  %v1582_v0 = vpop.f32.mrf.mxu1  ;;  %v3005_v28 = vld [vmem:[%s5886_s20 + $0xc6] sm:$0xff] }
 0x14b   : > { %v5187_v36 = vpop.f32.mrf.mxu0 }
 0x14c   : > { %v1342_v38 = vadd.f32 %v5187_v36, %v6360_v7  ;;  %v6541_v3 = vadd.f32 %v1582_v0, %v1339_v35  ;;  %v5225_v16 = vpop.f32.mrf.mxu1  ;;  %v3031_v36 = vpack.c.bf16 %v3006_v59, %v3005_v28 }
 0x14d   : > { %v1259_v8 = vpop.f32.mrf.mxu0 }
 0x14e   : > { %v1340_v12 = vadd.f32 %v1259_v8, %v6362_v19  ;;  %v6544_v56 = vadd.f32 %v5225_v16, %v1342_v38  ;;  %v1585_v10 = vpop.f32.mrf.mxu1 }
 0x14f   : > { %v5190_v60 = vpop.f32.mrf.mxu0  ;;  %5405 = vmatmul.mubr.msk.bf16.gmra.mxu0 %vm559_vm1, %v3028_v9 }
 0x150   : > { %v1345_v14 = vadd.f32 %v5190_v60, %v6369_v6  ;;  %v6548_v48 = vadd.f32 %v1585_v10, %v1340_v12  ;;  %v5228_v7 = vpop.f32.mrf.mxu1  ;;  %5408 = vmatprep.mubr.msk.bf16.mxu0 %vm559_vm1, %v3029_v11  ;;  %v3007_v10 = vld [vmem:[%s5886_s20 + $0xd6] sm:$0xff]  ;;  %v3008_v60 = vld [vmem:[%s5886_s20 + $0xde] sm:$0xff] }
 0x151   : > { %v1272_v17 = vpop.f32.mrf.mxu0  ;;  %v3032_v59 = vpack.c.bf16 %v3008_v60, %v3007_v10  ;;  %v3014_v10 = vld [vmem:[%s5886_s20 + $0x10e] sm:$0xff] }
 0x152   : > { %v1343_v19 = vadd.f32 %v1272_v17, %v6376_v23  ;;  %v6556_v54 = vadd.f32 %v5228_v7, %v1345_v14  ;;  %v1598_v55 = vpop.f32.mrf.mxu1  ;;  %v3009_v7 = vld [vmem:[%s5886_s20 + $0xe6] sm:$0xff] }
 0x153   : > { %v5191_v63 = vpop.f32.mrf.mxu0 }
 0x154   : > { %v1346_v6 = vadd.f32 %v5191_v63, %v6378_v27  ;;  %v6559_v35 = vadd.f32 %v1598_v55, %v1343_v19  ;;  %v5229_v0 = vpop.f32.mrf.mxu1  ;;  %v3033_v63 = vpack.c.bf16 %v3010_v24, %v3009_v7 }
 0x155   : > { %v1275_v9 = vpop.f32.mrf.mxu0 }
 0x156   : > { %v1344_v38 = vadd.f32 %v1275_v9, %v6380_v33  ;;  %v6562_v16 = vadd.f32 %v5229_v0, %v1346_v6  ;;  %v1601_v23 = vpop.f32.mrf.mxu1  ;;  %v1015_v9 = vadd.f32 %v6412_v25, %v6407_v15  ;;  %v1018_v15 = vadd.f32 %v6420_v37, %v6418_v18 }
 0x157   : > { %v5194_v11 = vpop.f32.mrf.mxu0  ;;  %5409 = vmatmul.mubr.msk.bf16.gmra.mxu0 %vm559_vm1, %v3030_v30  ;;  %v1645_v18 = vadd.f32 %v6437_v22, %v6433_v58  ;;  %v1646_v58 = vadd.f32 %v6448_v21, %v6444_v20 }
 0x158   : > { %v1349_v8 = vadd.f32 %v5194_v11, %v6387_v40  ;;  %v6566_v12 = vadd.f32 %v1601_v23, %v1344_v38  ;;  %v5232_v27 = vpop.f32.mrf.mxu1  ;;  %5412 = vmatprep.mubr.msk.bf16.mxu0 %vm559_vm1, %v3031_v36  ;;  %v3011_v11 = vld [vmem:[%s5886_s20 + $0xf6] sm:$0xff] }
 0x159   : > { %v1288_v14 = vpop.f32.mrf.mxu0 }
 0x15a   : > { %v1347_v33 = vadd.f32 %v1288_v14, %v6394_v34  ;;  %v6574_v42 = vadd.f32 %v5232_v27, %v1349_v8  ;;  %v1614_v17 = vpop.f32.mrf.mxu1  ;;  %v3012_v8 = vld [vmem:[%s5886_s20 + $0xfe] sm:$0xff] }
 0x15b   : > { %v5195_v28 = vpop.f32.mrf.mxu0 }
 0x15c   : > { %v1350_v40 = vadd.f32 %v5195_v28, %v6396_v61  ;;  %v6577_v19 = vadd.f32 %v1614_v17, %v1347_v33  ;;  %v5233_v55 = vpop.f32.mrf.mxu1  ;;  %v3034_v33 = vpack.c.bf16 %v3012_v8, %v3011_v11 }
 0x15d   : > { %v1291_v30 = vpop.f32.mrf.mxu0 }
 0x15e   : > { %v1348_v6 = vadd.f32 %v1291_v30, %v6398_v2  ;;  %v6580_v0 = vadd.f32 %v5233_v55, %v1350_v40  ;;  %v1617_v34 = vpop.f32.mrf.mxu1  ;;  %v3013_v2 = vld [vmem:[%s5886_s20 + $0x106] sm:$0xff] }
 0x15f   : > { %v5198_v36 = vpop.f32.mrf.mxu0  ;;  %5413 = vmatmul.mubr.msk.bf16.gmra.mxu0 %vm559_vm1, %v3032_v59  ;;  %v3035_v28 = vpack.c.bf16 %v3014_v10, %v3013_v2 }
 0x160   : > { %v1353_v61 = vadd.f32 %v5198_v36, %v6405_v5  ;;  %v6586_v38 = vadd.f32 %v1617_v34, %v1348_v6  ;;  %v5236_v23 = vpop.f32.mrf.mxu1  ;;  %5416 = vmatprep.mubr.msk.bf16.mxu0 %vm559_vm1, %v3033_v63  ;;  %v3015_v34 = vld [vmem:[%s5886_s20 + $0x116] sm:$0xff]  ;;  %v3016_v36 = vld [vmem:[%s5886_s20 + $0x11e] sm:$0xff] }
 0x161   : > { %v1304_v27 = vpop.f32.mrf.mxu0  ;;  %v3036_v10 = vpack.c.bf16 %v3016_v36, %v3015_v34 }
 0x162   : > { %v1351_v60 = vadd.f32 %v1304_v27, %v1015_v9  ;;  %v6593_v14 = vadd.f32 %v5236_v23, %v1353_v61  ;;  %v1630_v7 = vpop.f32.mrf.mxu1  ;;  %v3017_v61 = vld [vmem:[%s5886_s20 + $0x126] sm:$0xff]  ;;  %v3018_v23 = vld [vmem:[%s5886_s20 + $0x12e] sm:$0xff] }
 0x163   : > { %v5199_v24 = vpop.f32.mrf.mxu0 }
 0x164   : > { %v1354_v5 = vadd.f32 %v5199_v24, %v6416_v31  ;;  %v6598_v25 = vadd.f32 %v1630_v7, %v1351_v60  ;;  %v5237_v17 = vpop.f32.mrf.mxu1  ;;  %v3037_v7 = vpack.c.bf16 %v3018_v23, %v3017_v61 }
 0x165   : > { %v1307_v59 = vpop.f32.mrf.mxu0 }
 0x166   : > { %v1352_v40 = vadd.f32 %v1307_v59, %v1018_v15  ;;  %v6600_v55 = vadd.f32 %v5237_v17, %v1354_v5  ;;  %v1633_v63 = vpop.f32.mrf.mxu1  ;;  %v3019_v59 = vld [vmem:[%s5886_s20 + $0x136] sm:$0xff] }
 0x167   : > { %v5242_v30 = vpop.f32.mrf.mxu0  ;;  %5417 = vmatmul.mubr.msk.bf16.gmra.mxu0 %vm559_vm1, %v3034_v33 }
 0x168   : > { %v6605_v37 = vadd.f32 %v1633_v63, %v1352_v40  ;;  %v1973_v31 = vadd.f32 %v5242_v30, %v6435_v44  ;;  %v5280_v6 = vpop.f32.mrf.mxu1  ;;  %5420 = vmatprep.mubr.msk.bf16.mxu0 %vm559_vm1, %v3035_v28  ;;  %v1649_v28 = vadd.f32 %v6467_v57, %v6463_v52  ;;  %v3020_v40 = vld [vmem:[%s5886_s20 + $0x13e] sm:$0x3f] }
 0x169   : > { %v1828_v9 = vpop.f32.mrf.mxu0  ;;  %v3038_v34 = vpack.c.bf16 %v3020_v40, %v3019_v59 }
 0x16a   : > { %v1971_v11 = vadd.f32 %v1828_v9, %v1645_v18  ;;  %v6613_v8 = vadd.f32 %v5280_v6, %v1973_v31  ;;  %v2154_v27 = vpop.f32.mrf.mxu1 }
 0x16b   : > { %v5243_v2 = vpop.f32.mrf.mxu0 }
 0x16c   : > { %v1974_v44 = vadd.f32 %v5243_v2, %v6446_v46  ;;  %v6618_v22 = vadd.f32 %v2154_v27, %v1971_v11  ;;  %v5281_v60 = vpop.f32.mrf.mxu1 }
 0x16d   : > { %v1831_v24 = vpop.f32.mrf.mxu0 }
 0x16e   : > { %v1972_v33 = vadd.f32 %v1831_v24, %v1646_v58  ;;  %v6620_v15 = vadd.f32 %v5281_v60, %v1974_v44  ;;  %v2157_v5 = vpop.f32.mrf.mxu1 }
 0x16f   : > { %v5246_v17 = vpop.f32.mrf.mxu0  ;;  %5421 = vmatmul.mubr.msk.bf16.gmra.mxu0 %vm559_vm1, %v3036_v10 }
 0x170   : > { %v1977_v20 = vadd.f32 %v5246_v17, %v6465_v49  ;;  %v6626_v21 = vadd.f32 %v2157_v5, %v1972_v33  ;;  %v5284_v46 = vpop.f32.mrf.mxu1  ;;  %5424 = vmatprep.mubr.msk.bf16.mxu0 %vm559_vm1, %v3037_v7 }
 0x171   : > { %v1844_v63 = vpop.f32.mrf.mxu0 }
 0x172   : > { %v1975_v30 = vadd.f32 %v1844_v63, %v1649_v28  ;;  %v6631_v18 = vadd.f32 %v5284_v46, %v1977_v20  ;;  %v2170_v31 = vpop.f32.mrf.mxu1 }
 0x173   : > { %v5247_v6 = vpop.f32.mrf.mxu0 }
 0x174   : > { %v1978_v36 = vadd.f32 %v5247_v6, %v6471_v1  ;;  %v6634_v9 = vadd.f32 %v2170_v31, %v1975_v30  ;;  %v5285_v52 = vpop.f32.mrf.mxu1 }
 0x175   : > { %v1847_v49 = vpop.f32.mrf.mxu0 }
 0x176   : > { %v1976_v57 = vadd.f32 %v1847_v49, %v6475_v39  ;;  %v6637_v61 = vadd.f32 %v5285_v52, %v1978_v36  ;;  %v2173_v23 = vpop.f32.mrf.mxu1 }
 0x177   : > { %v5250_v11 = vpop.f32.mrf.mxu0  ;;  %5425 = vmatmul.mubr.msk.bf16.gmra.mxu0 %vm559_vm1, %v3038_v34 }
 0x178   : > { %v1981_v27 = vadd.f32 %v5250_v11, %v6484_v51  ;;  %v6641_v2 = vadd.f32 %v2173_v23, %v1976_v57  ;;  %v5288_v10 = vpop.f32.mrf.mxu1 }
 0x179   : > { %v1860_v58 = vpop.f32.mrf.mxu0 }
 0x17a   : > { %v1979_v1 = vadd.f32 %v1860_v58, %v6487_v50  ;;  %v6644_v44 = vadd.f32 %v5288_v10, %v1981_v27  ;;  %v2186_v60 = vpop.f32.mrf.mxu1 }
 0x17b   : > { %v5251_v7 = vpop.f32.mrf.mxu0 }
 0x17c   : > { %v1982_v39 = vadd.f32 %v5251_v7, %v6490_v4  ;;  %v6647_v24 = vadd.f32 %v2186_v60, %v1979_v1  ;;  %v5289_v33 = vpop.f32.mrf.mxu1 }
 0x17d   : > { %v1863_v5 = vpop.f32.mrf.mxu0 }
 0x17e   : > { %v1980_v17 = vadd.f32 %v1863_v5, %v6494_v43  ;;  %v6650_v28 = vadd.f32 %v5289_v33, %v1982_v39  ;;  %v2189_v51 = vpop.f32.mrf.mxu1 }
 0x17f   : > { %v5254_v20 = vpop.f32.mrf.mxu0 }
 0x180   : > { %v1985_v46 = vadd.f32 %v5254_v20, %v6502_v47  ;;  %v6653_v59 = vadd.f32 %v2189_v51, %v1980_v17  ;;  %v5292_v50 = vpop.f32.mrf.mxu1 }
 0x181   : > { %v1876_v40 = vpop.f32.mrf.mxu0 }
 0x182   : > { %v1983_v63 = vadd.f32 %v1876_v40, %v6505_v32  ;;  %v6656_v30 = vadd.f32 %v5292_v50, %v1985_v46  ;;  %v2202_v4 = vpop.f32.mrf.mxu1 }
 0x183   : > { %v5255_v31 = vpop.f32.mrf.mxu0 }
 0x184   : > { %v1986_v6 = vadd.f32 %v5255_v31, %v6508_v53  ;;  %v6659_v34 = vadd.f32 %v2202_v4, %v1983_v63  ;;  %v5293_v43 = vpop.f32.mrf.mxu1 }
 0x185   : > { %v1879_v36 = vpop.f32.mrf.mxu0 }
 0x186   : > { %v1984_v52 = vadd.f32 %v1879_v36, %v6512_v29  ;;  %v6662_v49 = vadd.f32 %v5293_v43, %v1986_v6  ;;  %v2205_v47 = vpop.f32.mrf.mxu1 }
 0x187   : > { %v5258_v57 = vpop.f32.mrf.mxu0 }
 0x188   : > { %v1989_v23 = vadd.f32 %v5258_v57, %v6520_v13  ;;  %v6665_v11 = vadd.f32 %v2205_v47, %v1984_v52  ;;  %v5296_v32 = vpop.f32.mrf.mxu1 }
 0x189   : > { %v1892_v27 = vpop.f32.mrf.mxu0 }
 0x18a   : > { %v1987_v10 = vadd.f32 %v1892_v27, %v6523_v41  ;;  %v6668_v58 = vadd.f32 %v5296_v32, %v1989_v23  ;;  %v2218_v53 = vpop.f32.mrf.mxu1 }
 0x18b   : > { %v5259_v1 = vpop.f32.mrf.mxu0 }
 0x18c   : > { %v1990_v60 = vadd.f32 %v5259_v1, %v6526_v26  ;;  %v6671_v7 = vadd.f32 %v2218_v53, %v1987_v10  ;;  %v5297_v29 = vpop.f32.mrf.mxu1 }
 0x18d   : > { %v1895_v39 = vpop.f32.mrf.mxu0 }
 0x18e   : > { %v1988_v33 = vadd.f32 %v1895_v39, %v6530_v45  ;;  %v6674_v5 = vadd.f32 %v5297_v29, %v1990_v60  ;;  %v2221_v13 = vpop.f32.mrf.mxu1 }
 0x18f   : > { %v5262_v17 = vpop.f32.mrf.mxu0 }
 0x190   : > { %v1993_v51 = vadd.f32 %v5262_v17, %v6538_v62  ;;  %v6677_v20 = vadd.f32 %v2221_v13, %v1988_v33  ;;  %v5300_v41 = vpop.f32.mrf.mxu1 }
 0x191   : > { %v1908_v46 = vpop.f32.mrf.mxu0 }
 0x192   : > { %v1991_v50 = vadd.f32 %v1908_v46, %v6541_v3  ;;  %v6680_v40 = vadd.f32 %v5300_v41, %v1993_v51  ;;  %v2234_v26 = vpop.f32.mrf.mxu1 }
 0x193   : > { %v5263_v63 = vpop.f32.mrf.mxu0 }
 0x194   : > { %v1994_v4 = vadd.f32 %v5263_v63, %v6544_v56  ;;  %v6683_v31 = vadd.f32 %v2234_v26, %v1991_v50  ;;  %v5301_v45 = vpop.f32.mrf.mxu1 }
 0x195   : > { %v1911_v6 = vpop.f32.mrf.mxu0 }
 0x196   : > { %v1992_v43 = vadd.f32 %v1911_v6, %v6548_v48  ;;  %v6686_v36 = vadd.f32 %v5301_v45, %v1994_v4  ;;  %v2237_v62 = vpop.f32.mrf.mxu1 }
 0x197   : > { %v5266_v52 = vpop.f32.mrf.mxu0 }
 0x198   : > { %v1997_v47 = vadd.f32 %v5266_v52, %v6556_v54  ;;  %v6689_v57 = vadd.f32 %v2237_v62, %v1992_v43  ;;  %v5304_v3 = vpop.f32.mrf.mxu1 }
 0x199   : > { %v1924_v23 = vpop.f32.mrf.mxu0 }
 0x19a   : > { %v1995_v32 = vadd.f32 %v1924_v23, %v6559_v35  ;;  %v6692_v27 = vadd.f32 %v5304_v3, %v1997_v47  ;;  %v2250_v56 = vpop.f32.mrf.mxu1 }
 0x19b   : > { %v5267_v10 = vpop.f32.mrf.mxu0 }
 0x19c   : > { %v1998_v53 = vadd.f32 %v5267_v10, %v6562_v16  ;;  %v6695_v1 = vadd.f32 %v2250_v56, %v1995_v32  ;;  %v5305_v48 = vpop.f32.mrf.mxu1 }
 0x19d   : > { %v1927_v60 = vpop.f32.mrf.mxu0 }
 0x19e   : > { %v1996_v29 = vadd.f32 %v1927_v60, %v6566_v12  ;;  %v6698_v39 = vadd.f32 %v5305_v48, %v1998_v53  ;;  %v2253_v54 = vpop.f32.mrf.mxu1 }
 0x19f   : > { %v5270_v33 = vpop.f32.mrf.mxu0 }
 0x1a0   : > { %v2001_v13 = vadd.f32 %v5270_v33, %v6574_v42  ;;  %v6701_v17 = vadd.f32 %v2253_v54, %v1996_v29  ;;  %v5308_v35 = vpop.f32.mrf.mxu1 }
 0x1a1   : > { %v1940_v51 = vpop.f32.mrf.mxu0 }
 0x1a2   : > { %v1999_v41 = vadd.f32 %v1940_v51, %v6577_v19  ;;  %v6704_v46 = vadd.f32 %v5308_v35, %v2001_v13  ;;  %v2266_v16 = vpop.f32.mrf.mxu1 }
 0x1a3   : > { %v5271_v50 = vpop.f32.mrf.mxu0 }
 0x1a4   : > { %v2002_v26 = vadd.f32 %v5271_v50, %v6580_v0  ;;  %v6707_v63 = vadd.f32 %v2266_v16, %v1999_v41  ;;  %v5309_v12 = vpop.f32.mrf.mxu1 }
 0x1a5   : > { %v1943_v4 = vpop.f32.mrf.mxu0 }
 0x1a6   : > { %v2000_v45 = vadd.f32 %v1943_v4, %v6586_v38  ;;  %v6710_v6 = vadd.f32 %v5309_v12, %v2002_v26  ;;  %v2269_v42 = vpop.f32.mrf.mxu1 }
 0x1a7   : > { %v5274_v43 = vpop.f32.mrf.mxu0 }
 0x1a8   : > { %v2005_v62 = vadd.f32 %v5274_v43, %v6593_v14  ;;  %v6713_v52 = vadd.f32 %v2269_v42, %v2000_v45  ;;  %v5312_v19 = vpop.f32.mrf.mxu1 }
 0x1a9   : > { %v1956_v47 = vpop.f32.mrf.mxu0 }
 0x1aa   : > { %v2003_v3 = vadd.f32 %v1956_v47, %v6598_v25  ;;  %v6716_v23 = vadd.f32 %v5312_v19, %v2005_v62  ;;  %v2282_v0 = vpop.f32.mrf.mxu1 }
 0x1ab   : > { %v5275_v32 = vpop.f32.mrf.mxu0 }
 0x1ac   : > { %v2006_v56 = vadd.f32 %v5275_v32, %v6600_v55  ;;  %v6719_v10 = vadd.f32 %v2282_v0, %v2003_v3  ;;  %v5313_v38 = vpop.f32.mrf.mxu1 }
 0x1ad   : > { %v1959_v53 = vpop.f32.mrf.mxu0 }
 0x1ae   : > { %v2004_v48 = vadd.f32 %v1959_v53, %v6605_v37  ;;  %v6722_v60 = vadd.f32 %v5313_v38, %v2006_v56  ;;  %v2285_v14 = vpop.f32.mrf.mxu1 }
 0x1af   : > { %v5318_v29 = vpop.f32.mrf.mxu0 }
 0x1b0   : > { %v6724_v54 = vadd.f32 %v2285_v14, %v2004_v48  ;;  %v2625_v25 = vadd.f32 %v5318_v29, %v6613_v8  ;;  %v5356_v33 = vpop.f32.mrf.mxu1 }
 0x1b1   : > { %v2480_v13 = vpop.f32.mrf.mxu0 }
 0x1b2   : > { %v2623_v35 = vadd.f32 %v2480_v13, %v6618_v22  ;;  %v6728_v51 = vadd.f32 %v5356_v33, %v2625_v25  ;;  %v2806_v55 = vpop.f32.mrf.mxu1 }
 0x1b3   : > { %v5319_v41 = vpop.f32.mrf.mxu0 }
 0x1b4   : > { %v2626_v16 = vadd.f32 %v5319_v41, %v6620_v15  ;;  %v6731_v50 = vadd.f32 %v2806_v55, %v2623_v35  ;;  %v5357_v37 = vpop.f32.mrf.mxu1 }
 0x1b5   : > { %v2483_v26 = vpop.f32.mrf.mxu0 }
 0x1b6   : > { %v2624_v12 = vadd.f32 %v2483_v26, %v6626_v21  ;;  %v6734_v4 = vadd.f32 %v5357_v37, %v2626_v16  ;;  %v2809_v45 = vpop.f32.mrf.mxu1  ;;  %v3347_v26 = vlaneseq }
 0x1b7   : > { %v5322_v8 = vpop.f32.mrf.mxu0 }
 0x1b8   : > { %v2629_v42 = vadd.f32 %v5322_v8, %v6631_v18  ;;  %v6737_v43 = vadd.f32 %v2809_v45, %v2624_v12  ;;  %v5360_v22 = vpop.f32.mrf.mxu1  ;;  %v6777_v45 = vshrl.u32 %v3347_v26, 7 }
 0x1b9   : > { %v2496_v62 = vpop.f32.mrf.mxu0 }
 0x1ba   : > { %v2627_v19 = vadd.f32 %v2496_v62, %v6634_v9  ;;  %v6740_v47 = vadd.f32 %v5360_v22, %v2629_v42  ;;  %v2822_v15 = vpop.f32.mrf.mxu1  ;;  %8061 = vst [vmem:[#allocation3_spill] sm:$0xff] %v6777_v45  ;;  %v3357_v62 = vsub.s32 2, %v6777_v45 }
 0x1bb   : > { %v5323_v3 = vpop.f32.mrf.mxu0 }
 0x1bc   : > { %v2630_v0 = vadd.f32 %v5323_v3, %v6637_v61  ;;  %v6743_v32 = vadd.f32 %v2822_v15, %v2627_v19  ;;  %v5361_v21 = vpop.f32.mrf.mxu1  ;;  %v8021_v19 = vmov 0.0  }
 0x1bd   : > { %v2499_v56 = vpop.f32.mrf.mxu0  ;;  %5474 = vmatprep.subr.mxu0 %v8021_v19  ;;  %5506 = vmatprep.mubr.msk.f32.mxu0 %vm5798_vm2, %v8021_v19 }
 0x1be   : > { %v2628_v38 = vadd.f32 %v2499_v56, %v6641_v2  ;;  %v6746_v53 = vadd.f32 %v5361_v21, %v2630_v0  ;;  %v2825_v18 = vpop.f32.mrf.mxu1 }
 0x1bf   : > { %v5326_v48 = vpop.f32.mrf.mxu0 }
 0x1c0   : > { %v6749_v14 = vadd.f32 %v5326_v48, %v6644_v44  ;;  %v6751_v9 = vadd.f32 %v2825_v18, %v2628_v38  ;;  %v6800_v15 = vpop.f32.mrf.mxu1 }
 0x1c1   : > { %v2512_v29 = vpop.f32.mrf.mxu0 }
 0x1c2   : > { %v6754_v25 = vadd.f32 %v2512_v29, %v6647_v24 }
 0x1c3   : > { %v5327_v61 = vpop.f32.mrf.mxu0 }
 0x1c4   : > { %v6757_v33 = vadd.f32 %v5327_v61, %v6650_v28 }
 0x1c5   : > { %v2515_v13 = vpop.f32.mrf.mxu0 }
 0x1c6   : > { %v6760_v2 = vadd.f32 %v2515_v13, %v6653_v59 }
 0x1c7   : > { %v5330_v35 = vpop.f32.mrf.mxu0 }
 0x1c8   : > { %v6763_v55 = vadd.f32 %v5330_v35, %v6656_v30 }
 0x1c9   : > { %v2528_v44 = vpop.f32.mrf.mxu0 }
 0x1ca   : > { %v6766_v41 = vadd.f32 %v2528_v44, %v6659_v34  ;;  %v3353_v34 = vsub.s32 1, %v6777_v45 }
 0x1cb   : > { %v5331_v16 = vpop.f32.mrf.mxu0 }
 0x1cc   : > { %v6769_v24 = vadd.f32 %v5331_v16, %v6662_v49  ;;  %v6786_v49 = vld [vmem:[%s8014_s2] sm:$0x7] }
 0x1cd   : > { %v2531_v37 = vpop.f32.mrf.mxu0  ;;  %8063 = vst [vmem:[#allocation5_spill] sm:$0xff] %v6786_v49 }
 0x1ce   : > { %v6772_v28 = vadd.f32 %v2531_v37, %v6665_v11 }
 0x1cf   : > { %v5334_v12 = vpop.f32.mrf.mxu0 }
 0x1d0   : > { %v6775_v59 = vadd.f32 %v5334_v12, %v6668_v58  ;;  %v6792_v58 = vrot.slane %v6786_v49, %v3353_v34 }
 0x1d1   : > { %v2544_v30 = vpop.f32.mrf.mxu0 }
 0x1d2   : > { %8060 = vst [vmem:[#allocation2_spill] sm:$0xff] %v6775_v59  ;;  %v6780_v8 = vadd.f32 %v2544_v30, %v6671_v7  ;;  %8065 = vst [vmem:[#allocation7_spill] sm:$0xff] %v6792_v58  ;;  %3432 = vmatprep.mubr.f32.mxu1 %v6792_v58 }
 0x1d3   : > { %v5335_v42 = vpop.f32.mrf.mxu0 }
 0x1d4   : > { %8062 = vst [vmem:[#allocation4_spill] sm:$0xff] %v6780_v8  ;;  %v6789_v11 = vadd.f32 %v5335_v42, %v6674_v5  ;;  %v6803_v5 = vrot.slane %v6786_v49, %v3357_v62 }
 0x1d5   : > { %v2547_v22 = vpop.f32.mrf.mxu0 }
 0x1d6   : > { %8064 = vst [vmem:[#allocation6_spill] sm:$0xff] %v6789_v11  ;;  %v6796_v7 = vadd.f32 %v2547_v22, %v6677_v20  ;;  %8067 = vst [vmem:[#allocation9_spill] sm:$0xff] %v6803_v5  ;;  %v6811_v20 = vpop.f32.mrf.mxu1 }
 0x1d7   : > { %v5338_v3 = vpop.f32.mrf.mxu0 }
 0x1d8   : > { %8066 = vst [vmem:[#allocation8_spill] sm:$0xff] %v6796_v7  ;;  %v6806_v0 = vadd.f32 %v5338_v3, %v6680_v40  ;;  %v6821_v40 = vpop.f32.mrf.mxu1 }
 0x1d9   : > { %v2560_v21 = vpop.f32.mrf.mxu0 }
 0x1da   : > { %v6809_v56 = vadd.f32 %v2560_v21, %v6683_v31 }
 0x1db   : > { %v5339_v38 = vpop.f32.mrf.mxu0 }
 0x1dc   : > { %8068 = vst [vmem:[#allocation10_spill] sm:$0xff] %v6809_v56  ;;  %v6814_v18 = vadd.f32 %v5339_v38, %v6686_v36  ;;  %v6829_v36 = vpop.f32.mrf.mxu1 }
 0x1dd   : > { %v2563_v48 = vpop.f32.mrf.mxu0 }
 0x1de   : > { %v6817_v29 = vadd.f32 %v2563_v48, %v6689_v57  ;;  %v6837_v26 = vpop.f32.mrf.mxu1 }
 0x1df   : > { %v5342_v61 = vpop.f32.mrf.mxu0 }
 0x1e0   : > { %v6824_v31 = vadd.f32 %v5342_v61, %v6692_v27  ;;  %v6845_v34 = vpop.f32.mrf.mxu1 }
 0x1e1   : > { %v2576_v13 = vpop.f32.mrf.mxu0 }
 0x1e2   : > { %v6827_v35 = vadd.f32 %v2576_v13, %v6695_v1  ;;  %v6853_v62 = vpop.f32.mrf.mxu1 }
 0x1e3   : > { %v5343_v44 = vpop.f32.mrf.mxu0  ;;  %v2964_v59 = vadd.f32 %v6853_v62, %v6769_v24 }
 0x1e4   : > { %v6832_v57 = vadd.f32 %v5343_v44, %v6698_v39  ;;  %v6861_v38 = vpop.f32.mrf.mxu1 }
 0x1e5   : > { %v2579_v16 = vpop.f32.mrf.mxu0  ;;  %v2962_v24 = vadd.f32 %v6861_v38, %v6772_v28 }
 0x1e6   : > { %v6835_v37 = vadd.f32 %v2579_v16, %v6701_v17  ;;  %v6869_v13 = vpop.f32.mrf.mxu1 }
 0x1e7   : > { %v5346_v12 = vpop.f32.mrf.mxu0  ;;  %8073 = vst [vmem:[#allocation15_spill] sm:$0xff] %v6869_v13 }
 0x1e8   : > { %v6840_v27 = vadd.f32 %v5346_v12, %v6704_v46  ;;  %v6877_v12 = vpop.f32.mrf.mxu1 }
 0x1e9   : > { %v2592_v30 = vpop.f32.mrf.mxu0  ;;  %8076 = vst [vmem:[#allocation18_spill] sm:$0xff] %v6877_v12 }
 0x1ea   : > { %v6843_v1 = vadd.f32 %v2592_v30, %v6707_v63 }
 0x1eb   : > { %v5347_v42 = vpop.f32.mrf.mxu0 }
 0x1ec   : > { %v6848_v39 = vadd.f32 %v5347_v42, %v6710_v6 }
 0x1ed   : > { %v2595_v22 = vpop.f32.mrf.mxu0 }
 0x1ee   : > { %v6851_v17 = vadd.f32 %v2595_v22, %v6713_v52  ;;  %v6885_v22 = vpop.f32.mrf.mxu1 }
 0x1ef   : > { %v5350_v3 = vpop.f32.mrf.mxu0  ;;  %8079 = vst [vmem:[#allocation21_spill] sm:$0xff] %v6885_v22 }
 0x1f0   : > { %v6856_v46 = vadd.f32 %v5350_v3, %v6716_v23 }
 0x1f1   : > { %v2608_v21 = vpop.f32.mrf.mxu0 }
 0x1f2   : > { %8069 = vst [vmem:[#allocation11_spill] sm:$0xff] %v6856_v46  ;;  %v6859_v63 = vadd.f32 %v2608_v21, %v6719_v10 }
 0x1f3   : > { %v5351_v48 = vpop.f32.mrf.mxu0 }
 0x1f4   : > { %8070 = vst [vmem:[#allocation12_spill] sm:$0xff] %v6859_v63  ;;  %v6864_v6 = vadd.f32 %v5351_v48, %v6722_v60  ;;  %v6893_v48 = vpop.f32.mrf.mxu1 }
 0x1f5   : > { %v2611_v61 = vpop.f32.mrf.mxu0  ;;  %8082 = vst [vmem:[#allocation24_spill] sm:$0xff] %v6893_v48 }
 0x1f6   : > { %8071 = vst [vmem:[#allocation13_spill] sm:$0xff] %v6864_v6  ;;  %v6867_v52 = vadd.f32 %v2611_v61, %v6724_v54 }
 0x1f7   : > { %v5394_v44 = vpop.f32.mrf.mxu0 }
 0x1f8   : > { %8072 = vst [vmem:[#allocation14_spill] sm:$0xff] %v6867_v52  ;;  %v6872_v23 = vadd.f32 %v5394_v44, %v6728_v51 }
 0x1f9   : > { %v3132_v16 = vpop.f32.mrf.mxu0 }
 0x1fa   : > { %8074 = vst [vmem:[#allocation16_spill] sm:$0xff] %v6872_v23  ;;  %v6875_v10 = vadd.f32 %v3132_v16, %v6731_v50  ;;  %v6901_v16 = vpop.f32.mrf.mxu1 }
 0x1fb   : > { %v5395_v30 = vpop.f32.mrf.mxu0 }
 0x1fc   : > { %8075 = vst [vmem:[#allocation17_spill] sm:$0xff] %v6875_v10  ;;  %v6880_v60 = vadd.f32 %v5395_v30, %v6734_v4 }
 0x1fd   : > { %v3135_v42 = vpop.f32.mrf.mxu0 }
 0x1fe   : > { %8077 = vst [vmem:[#allocation19_spill] sm:$0xff] %v6880_v60  ;;  %v6883_v54 = vadd.f32 %v3135_v42, %v6737_v43  ;;  %v6907_v42 = vpop.f32.mrf.mxu1 }
 0x1ff   : > { %v5398_v3 = vpop.f32.mrf.mxu0  ;;  %8085 = vst [vmem:[#allocation27_spill] sm:$0xff] %v6907_v42 }
 0x200   : > { %8078 = vst [vmem:[#allocation20_spill] sm:$0xff] %v6883_v54  ;;  %v6888_v51 = vadd.f32 %v5398_v3, %v6740_v47 }
 0x201   : > { %v3148_v21 = vpop.f32.mrf.mxu0 }
 0x202   : > { %8080 = vst [vmem:[#allocation22_spill] sm:$0xff] %v6888_v51  ;;  %v6891_v50 = vadd.f32 %v3148_v21, %v6743_v32  ;;  %v6911_v21 = vpop.f32.mrf.mxu1  ;;  %v2963_v51 = vadd.f32 %v6837_v26, %v6763_v55  ;;  %v2961_v55 = vadd.f32 %v6845_v34, %v6766_v41 }
 0x203   : > { %v5399_v61 = vpop.f32.mrf.mxu0 }
 0x204   : > { %8081 = vst [vmem:[#allocation23_spill] sm:$0xff] %v6891_v50  ;;  %v6896_v4 = vadd.f32 %v5399_v61, %v6746_v53  ;;  %v6913_v61 = vpop.f32.mrf.mxu1 }
 0x205   : > { %v3151_v44 = vpop.f32.mrf.mxu0 }
 0x206   : > { %8083 = vst [vmem:[#allocation25_spill] sm:$0xff] %v6896_v4  ;;  %v6899_v43 = vadd.f32 %v3151_v44, %v6751_v9  ;;  %v5380_v44 = vpop.f32.mrf.mxu1  ;;  %v8094_v62 = vld [vmem:[#allocation27_spill] sm:$0xff] }
 0x207   : > { %v6903_v30 = vpop.f32.mrf.mxu0 }
 0x208   : > { %8084 = vst [vmem:[#allocation26_spill] sm:$0xff] %v6899_v43  ;;  %v2902_v52 = vpop.f32.mrf.mxu1 }
 0x209   : > { %v6905_v47 = vpop.f32.mrf.mxu0 }
 0x20a   : > { %v5381_v54 = vpop.f32.mrf.mxu1 }
 0x20b   : > { %v5403_v32 = vpop.f32.mrf.mxu0 }
 0x20c   : > { %v2905_v23 = vpop.f32.mrf.mxu1 }
 0x20d   : > { %v6909_v3 = vpop.f32.mrf.mxu0  ;;  %v8092_v34 = vld [vmem:[#allocation25_spill] sm:$0xff] }
 0x20e   : > { %v5384_v60 = vpop.f32.mrf.mxu1 }
 0x20f   : > { %v5406_v19 = vpop.f32.mrf.mxu0  ;;  %v2979_v22 = vadd.f32 %v5384_v60, %v6840_v27  ;;  %v8100_v60 = vld [vmem:[#allocation26_spill] sm:$0xff] }
 0x211   : > { %v3180_v53 = vpop.f32.mrf.mxu0 }
 0x213   : > { %v5407_v58 = vpop.f32.mrf.mxu0 }
 0x215   : > { %v3183_v9 = vpop.f32.mrf.mxu0 }
 0x217   : > { %v6915_v5 = vpop.f32.mrf.mxu0 }
 0x218   : > { %8086 = vst [vmem:[#allocation28_spill] sm:$0xff] %v6915_v5  ;;  %v2918_v5 = vpop.f32.mrf.mxu1 }
 0x219   : > { %v6917_v63 = vpop.f32.mrf.mxu0 }
 0x21a   : > { %8087 = vst [vmem:[#allocation29_spill] sm:$0xff] %v6917_v63  ;;  %v5385_v50 = vpop.f32.mrf.mxu1 }
 0x21b   : > { %v6919_v10 = vpop.f32.mrf.mxu0 }
 0x21c   : > { %8088 = vst [vmem:[#allocation30_spill] sm:$0xff] %v6919_v10  ;;  %v2921_v43 = vpop.f32.mrf.mxu1 }
 0x21d   : > { %v6921_v46 = vpop.f32.mrf.mxu0  ;;  %v2978_v56 = vadd.f32 %v2921_v43, %v6851_v17  ;;  %v8093_v17 = vld [vmem:[#allocation10_spill] sm:$0xff] }
 0x21e   : > { %8089 = vst [vmem:[#allocation31_spill] sm:$0xff] %v6921_v46  ;;  %v2980_v46 = vadd.f32 %v5385_v50, %v6848_v39  ;;  %v6945_v39 = vadd.f32 %v5406_v19, %v2963_v51  ;;  %v2960_v19 = vadd.f32 %v6821_v40, %v6757_v33  ;;  %v2958_v40 = vadd.f32 %v6829_v36, %v6760_v2 }
 0x21f   : > { %v6923_v6 = vpop.f32.mrf.mxu0  ;;  %v2972_v2 = vadd.f32 %v6911_v21, %v6814_v18  ;;  %v2970_v18 = vadd.f32 %v6913_v61, %v6817_v29  ;;  %v8098_v29 = vld [vmem:[#allocation21_spill] sm:$0xff] }
 0x220   : > { %v6972_v26 = vadd.f32 %v5403_v32, %v2960_v19  ;;  %v8107_v32 = vld [vmem:[#allocation28_spill] sm:$0xff] }
 0x221   : > { %v6925_v49 = vpop.f32.mrf.mxu0 }
 0x222   : > { %8090 = vst [vmem:[#allocation32_spill] sm:$0xff] %v6925_v49 }
 0x223   : > { %v5415_v12 = vpop.f32.mrf.mxu0 }
 0x225   : > { %v6927_v8 = vpop.f32.mrf.mxu0 }
 0x226   : > { %8091 = vst [vmem:[#allocation33_spill] sm:$0xff] %v6927_v8  ;;  %v6937_v8 = vadd.f32 %v5407_v58, %v2964_v59  ;;  %v6954_v59 = vadd.f32 %v3183_v9, %v2962_v24  ;;  %v2976_v58 = vadd.f32 %v5381_v54, %v6832_v57  ;;  %v2959_v57 = vadd.f32 %v6800_v15, %v6749_v14  ;;  %v8101_v54 = vld [vmem:[#allocation2_spill] sm:$0xff]  ;;  %v8109_v9 = vld [vmem:[#allocation19_spill] sm:$0xff] }
 0x227   : > { %v5418_v45 = vpop.f32.mrf.mxu0  ;;  %v2973_v14 = vadd.f32 %v2902_v52, %v6827_v35  ;;  %v8096_v52 = vld [vmem:[#allocation22_spill] sm:$0xff] }
 0x228   : > { %v8111_v24 = vld [vmem:[#allocation18_spill] sm:$0xff] }
 0x229   : > { %v3228_v48 = vpop.f32.mrf.mxu0 }
 0x22a   : > { %v6997_v36 = vadd.f32 %v3228_v48, %v2973_v14  ;;  %v8103_v48 = vld [vmem:[#allocation30_spill] sm:$0xff]  ;;  %v8115_v14 = vld [vmem:[#allocation5_spill] sm:$0xff] }
 0x22b   : > { %v5419_v7 = vpop.f32.mrf.mxu0 }
 0x22c   : > { %v6967_v41 = vadd.f32 %v5419_v7, %v2976_v58  ;;  %v6982_v7 = vadd.f32 %v6903_v30, %v2959_v57  ;;  %v8105_v30 = vld [vmem:[#allocation8_spill] sm:$0xff]  ;;  %v8112_v58 = vld [vmem:[#allocation31_spill] sm:$0xff]  ;;  %v8114_v57 = vld [vmem:[#allocation29_spill] sm:$0xff] }
 0x22d   : > { %v3231_v63 = vpop.f32.mrf.mxu0 }
 0x22f   : > { %v5422_v13 = vpop.f32.mrf.mxu0 }
 0x230   : > { %v6940_v4 = vadd.f32 %v5422_v13, %v2979_v22  ;;  %v8097_v13 = vld [vmem:[#allocation6_spill] sm:$0xff]  ;;  %v8102_v22 = vld [vmem:[#allocation15_spill] sm:$0xff] }
 0x231   : > { %v3244_v10 = vpop.f32.mrf.mxu0  ;;  %v2967_v51 = vadd.f32 %v8102_v22, %v8101_v54 }
 0x233   : > { %v5423_v49 = vpop.f32.mrf.mxu0 }
 0x234   : > { %v6933_v11 = vadd.f32 %v5423_v49, %v2980_v46  ;;  %v2977_v49 = vadd.f32 %v2918_v5, %v6843_v1  ;;  %v6963_v5 = vadd.f32 %v3180_v53, %v2961_v55  ;;  %v2974_v1 = vadd.f32 %v2905_v23, %v6835_v37  ;;  %v8108_v53 = vld [vmem:[#allocation3_spill] sm:$0xff] }
 0x235   : > { %v3247_v42 = vpop.f32.mrf.mxu0  ;;  %v2969_v46 = vadd.f32 %v8094_v62, %v8093_v17  ;;  %v2968_v23 = vadd.f32 %v8098_v29, %v8097_v13  ;;  %v7045_v61 = vsub.s32 0, %v8108_v53  ;;  %v8118_v62 = vld [vmem:[#allocation11_spill] sm:$0xff]  ;;  %v8119_v13 = vld [vmem:[#allocation17_spill] sm:$0xff]  ;;  %v7131_v53 = vld [vmem:[%s8016_s4 + $0x50] sm:$0xff] }
 0x236   : > { %4938 = vmatprep.subr.mxu1 %v6933_v11  ;;  %v6949_v27 = vadd.f32 %v3247_v42, %v2978_v56  ;;  %v6958_v28 = vadd.f32 %v3244_v10, %v2977_v49  ;;  %v2975_v56 = vadd.f32 %v5380_v44, %v6824_v31  ;;  %v6986_v15 = vadd.f32 %v3231_v63, %v2974_v1  ;;  %v8095_v63 = vld [vmem:[#allocation33_spill] sm:$0xff]  ;;  %v8110_v44 = vld [vmem:[#allocation4_spill] sm:$0xff] }
 0x237   : > { %4939 = vmatpush3.msra.mxu1 %v6937_v8  ;;  %v6992_v31 = vadd.f32 %v6909_v3, %v2958_v40  ;;  %v7020_v38 = vadd.f32 %v8095_v63, %v2970_v18  ;;  %v7034_v43 = vadd.f32 %v8103_v48, %v2968_v23  ;;  %v7041_v3 = vadd.f32 %v8107_v32, %v2967_v51  ;;  %v8117_v18 = vld [vmem:[#allocation20_spill] sm:$0xff]  ;;  %v7117_v32 = vld [vmem:[%s8016_s4 + $0x60] sm:$0xff] }
 0x238   : > { %4940 = vmatprep.subr.mxu1 %v6940_v4  ;;  %v6976_v33 = vadd.f32 %v5418_v45, %v2975_v56  ;;  %v2957_v45 = vadd.f32 %v6811_v20, %v6754_v25  ;;  %v2971_v25 = vadd.f32 %v6901_v16, %v6806_v0  ;;  %v7006_v20 = vadd.f32 %v5415_v12, %v2972_v2  ;;  %v5388_v0 = vpop.f32.mrf.mxu1  ;;  %v5426_v12 = vpop.f32.mrf.mxu0  ;;  %v8104_v16 = vld [vmem:[#allocation23_spill] sm:$0xff]  ;;  %v8113_v56 = vld [vmem:[#allocation16_spill] sm:$0xff]  ;;  %v8116_v2 = vld [vmem:[#allocation13_spill] sm:$0xff] }
 0x239   : > { %4941 = vmatpush3.msra.mxu1 %v6945_v39  ;;  %v2965_v49 = vadd.f32 %v8111_v24, %v8110_v44  ;;  %v8120_v23 = vmov 0.0   ;;  %8127 = vst [vmem:[#allocation33_spill] sm:$0xff] %v7117_v32  ;;  %8129 = vst [vmem:[#allocation6_spill] sm:$0xff] %v7131_v53  ;;  %v7138_v44 = vld [vmem:[%s8016_s4 + $0x48] sm:$0xff]  ;;  %v7145_v24 = vld [vmem:[%s8016_s4 + $0x40] sm:$0xff] }
 0x23a   : > { %4942 = vmatprep.subr.mxu1 %v6949_v27  ;;  %v7001_v35 = vadd.f32 %v6905_v47, %v2957_v45  ;;  %v7013_v37 = vadd.f32 %v6923_v6, %v2971_v25  ;;  %v8099_v6 = vld [vmem:[#allocation32_spill] sm:$0xff]  ;;  %v2934_v50 = vpop.f32.mrf.mxu1  ;;  %v3260_v21 = vpop.f32.mrf.mxu0  ;;  %v7061_v45 = vrot.slane %v8115_v14, %v7045_v61  ;;  %8130 = vst [vmem:[#allocation21_spill] sm:$0xff] %v7138_v44 }
 0x23b   : > { %4943 = vmatpush3.msra.mxu1 %v6954_v59  ;;  %v7027_v10 = vadd.f32 %v8099_v6, %v2969_v46  ;;  %v8106_v47 = vld [vmem:[#allocation24_spill] sm:$0xff]  ;;  %v7056_v1 = vadd.f32 %v8114_v57, %v2965_v49  ;;  %v2983_v46 = vadd.f32 %v5388_v0, %v8118_v62  ;;  %v8121_v6 = vld [vmem:[#allocation14_spill] sm:$0xff]  ;;  %8131 = vst [vmem:[#allocation32_spill] sm:$0xff] %v7145_v24  ;;  %v7152_v49 = vld [vmem:[%s8016_s4 + $0x38] sm:$0xff] }
 0x23c   : > { %4944 = vmatprep.subr.mxu1 %v6958_v28  ;;  %v2966_v42 = vadd.f32 %v8106_v47, %v8105_v30  ;;  %v5389_v55 = vpop.f32.mrf.mxu1  ;;  %v5427_v40 = vpop.f32.mrf.mxu0  ;;  %v8122_v0 = vld [vmem:[#allocation12_spill] sm:$0xff]  ;;  %8132 = vst [vmem:[#allocation26_spill] sm:$0xff] %v7152_v49  ;;  %v7175_v57 = vld [vmem:[%s8016_s4 + $0x20] sm:$0xff] }
 0x23d   : > { %4945 = vmatpush3.msra.mxu1 %v6963_v5  ;;  %v2984_v25 = vadd.f32 %v5389_v55, %v8116_v2  ;;  %v7073_v22 = vadd.f32 %v5426_v12, %v2983_v46  ;;  %v2981_v51 = vadd.f32 %v2934_v50, %v8122_v0  ;;  %v7092_v12 = vld [vmem:[%s8016_s4 + $0x78] sm:$0xff]  ;;  %v7101_v47 = vld [vmem:[%s8016_s4 + $0x70] sm:$0xff]  ;;  %8135 = vst [vmem:[#allocation30_spill] sm:$0xff] %v7175_v57  ;;  %v7196_v2 = vld [vmem:[%s8016_s4 + $0x8] sm:$0xff] }
 0x23e   : > { %4946 = vmatprep.subr.mxu1 %v6967_v41  ;;  %v7051_v19 = vadd.f32 %v8112_v58, %v2966_v42  ;;  %v2937_v17 = vpop.f32.mrf.mxu1  ;;  %v3263_v29 = vpop.f32.mrf.mxu0  ;;  %8123 = vst [vmem:[#allocation25_spill] sm:$0xff] %v7092_v12  ;;  %v8124_v50 = vld [vmem:[#allocation9_spill] sm:$0xff]  ;;  %8125 = vst [vmem:[#allocation10_spill] sm:$0xff] %v7101_v47  ;;  %v7110_v42 = vld [vmem:[%s8016_s4 + $0x68] sm:$0xff] }
 0x23f   : > { %4947 = vmatpush3.msra.mxu1 %v6972_v26  ;;  %v7067_v63 = vadd.f32 %v5427_v40, %v2984_v25  ;;  %v2982_v54 = vadd.f32 %v2937_v17, %v8121_v6  ;;  %v7085_v30 = vadd.f32 %v3260_v21, %v2981_v51  ;;  %8126 = vst [vmem:[#allocation27_spill] sm:$0xff] %v7110_v42  ;;  %v7124_v21 = vld [vmem:[%s8016_s4 + $0x58] sm:$0xff]  ;;  %v7159_v55 = vld [vmem:[%s8016_s4 + $0x30] sm:$0xff]  ;;  %v7166_v58 = vld [vmem:[%s8016_s4 + $0x28] sm:$0xff] }
 0x240   : > { %4948 = vmatprep.subr.mxu1 %v6976_v33  ;;  %8128 = vst [vmem:[#allocation22_spill] sm:$0xff] %v7124_v21  ;;  %8133 = vst [vmem:[#allocation2_spill] sm:$0xff] %v7159_v55  ;;  %v7182_v40 = vld [vmem:[%s8016_s4 + $0x18] sm:$0xff]  ;;  %v7187_v14 = vld [vmem:[%s8016_s4 + $0x10] sm:$0xff] }
 0x241   : > { %4949 = vmatpush3.msra.mxu1 %v6982_v7  ;;  %v7081_v48 = vadd.f32 %v3263_v29, %v2982_v54  ;;  %8134 = vst [vmem:[#allocation15_spill] sm:$0xff] %v7166_v58  ;;  %8136 = vst [vmem:[#allocation23_spill] sm:$0xff] %v7182_v40  ;;  %v7202_v25 = vld [vmem:[%s8016_s4] sm:$0xff]  ;;  %v7209_v17 = vld [vmem:[%s8017_s5 + $0x78] sm:$0xff] }
 0x242   : > { %4950 = vmatprep.subr.mxu1 %v6986_v15  ;;  %8137 = vst [vmem:[#allocation8_spill] sm:$0xff] %v7187_v14  ;;  %8138 = vst [vmem:[#allocation24_spill] sm:$0xff] %v7196_v2  ;;  %v7214_v62 = vld [vmem:[%s8017_s5 + $0x70] sm:$0xff]  ;;  %5475 = vmatpush3.msra.mxu0 %v7209_v17  ;;  %v7221_v46 = vld [vmem:[%s8017_s5 + $0x68] sm:$0xff] }
 0x243   : > { %4951 = vmatpush3.msra.mxu1 %v6992_v31  ;;  %8139 = vst [vmem:[#allocation28_spill] sm:$0xff] %v7202_v25  ;;  %5476 = vmatprep.subr.mxu0 %v8120_v23  ;;  %v7228_v29 = vld [vmem:[%s8017_s5 + $0x60] sm:$0xff]  ;;  %v7235_v6 = vld [vmem:[%s8017_s5 + $0x58] sm:$0xff]  ;;  %v7242_v54 = vld [vmem:[%s8017_s5 + $0x50] sm:$0xff] }
 0x244   : > { %4952 = vmatprep.subr.mxu1 %v6997_v36  ;;  %5477 = vmatpush3.msra.mxu0 %v7214_v62  ;;  %v7249_v0 = vld [vmem:[%s8017_s5 + $0x48] sm:$0xff]  ;;  %v7256_v51 = vld [vmem:[%s8017_s5 + $0x40] sm:$0xff] }
 0x245   : > { %4953 = vmatpush3.msra.mxu1 %v7001_v35  ;;  %5478 = vmatprep.subr.mxu0 %v8120_v23 }
 0x246   : > { %4954 = vmatprep.subr.mxu1 %v7006_v20  ;;  %5479 = vmatpush3.msra.mxu0 %v7221_v46 }
 0x247   : > { %4955 = vmatpush3.msra.mxu1 %v8092_v34  ;;  %5480 = vmatprep.subr.mxu0 %v8120_v23 }
 0x248   : > { %4956 = vmatprep.subr.mxu1 %v7013_v37  ;;  %5481 = vmatpush3.msra.mxu0 %v7228_v29 }
 0x249   : > { %4957 = vmatpush3.msra.mxu1 %v8096_v52  ;;  %5482 = vmatprep.subr.mxu0 %v8120_v23 }
 0x24a   : > { %4958 = vmatprep.subr.mxu1 %v7020_v38  ;;  %5483 = vmatpush3.msra.mxu0 %v7235_v6 }
 0x24b   : > { %4959 = vmatpush3.msra.mxu1 %v8100_v60  ;;  %5484 = vmatprep.subr.mxu0 %v8120_v23 }
 0x24c   : > { %4960 = vmatprep.subr.mxu1 %v7027_v10  ;;  %5485 = vmatpush3.msra.mxu0 %v7242_v54 }
 0x24d   : > { %4961 = vmatpush3.msra.mxu1 %v8104_v16  ;;  %5486 = vmatprep.subr.mxu0 %v8120_v23 }
 0x24e   : > { %4962 = vmatprep.subr.mxu1 %v7034_v43  ;;  %5487 = vmatpush3.msra.mxu0 %v7249_v0 }
 0x24f   : > { %4963 = vmatpush3.msra.mxu1 %v8109_v9  ;;  %5488 = vmatprep.subr.mxu0 %v8120_v23 }
 0x250   : > { %4964 = vmatprep.subr.mxu1 %v7041_v3  ;;  %5489 = vmatpush3.msra.mxu0 %v7256_v51 }
 0x251   : > { %4965 = vmatpush3.msra.mxu1 %v8113_v56  ;;  %5490 = vmatprep.subr.mxu0 %v8120_v23 }
 0x252   : > { %4966 = vmatprep.subr.mxu1 %v7051_v19 }
 0x253   : > { %4967 = vmatpush3.msra.mxu1 %v8117_v18 }
 0x254   : > { %4968 = vmatprep.subr.mxu1 %v7056_v1 }
 0x255   : > { %4969 = vmatpush3.msra.mxu1 %v8119_v13 }
 0x256   : > { %5428 = vmatprep.subr.mxu1 %v8120_v23  ;;  %3433 = vmatmul.mubr.f32.vlgmr.msra.gmra.mxu1 %v7061_v45 }
 0x257   : > { %5429 = vmatpush3.msk.msra.mxu1 %vm3364_vm3, %v7067_v63  ;;  %5436 = vmatprep.mubr.msk.f32.mxu1 %vm5798_vm2, %v8120_v23 }
 0x258   : > { %5430 = vmatprep.subr.mxu1 %v8120_v23 }
 0x259   : > { %5431 = vmatpush3.msra.mxu1 %v7073_v22 }
 0x25a   : > { %5432 = vmatprep.subr.mxu1 %v8120_v23 }
 0x25b   : > { %5433 = vmatpush3.msra.mxu1 %v7081_v48 }
 0x25c   : > { %5434 = vmatprep.subr.mxu1 %v8120_v23 }
 0x25d   : > { %5435 = vmatpush3.msra.mxu1 %v7085_v30 }
 0x25e   : > { %5437 = vmatmul.mubr.msk.f32.vlgmr.msra.gmra.mxu1 %vm3361_vm4, %v8124_v50  ;;  %5439 = vmatprep.subr.mxu1 %v8120_v23 }
 0x25f   : > { %5440 = vmatpush3.msra.mxu1 %v7092_v12  ;;  %5471 = vmatprep.mubr.msk.f32.mxu1 %vm5798_vm2, %v8120_v23 }
 0x260   : > { %5441 = vmatprep.subr.mxu1 %v8120_v23 }
 0x261   : > { %5442 = vmatpush3.msra.mxu1 %v7101_v47 }
 0x262   : > { %5443 = vmatprep.subr.mxu1 %v8120_v23 }
 0x263   : > { %5444 = vmatpush3.msra.mxu1 %v7110_v42 }
 0x264   : > { %5445 = vmatprep.subr.mxu1 %v8120_v23 }
 0x265   : > { %5446 = vmatpush3.msra.mxu1 %v7117_v32 }
 0x266   : > { %5447 = vmatprep.subr.mxu1 %v8120_v23 }
 0x267   : > { %5448 = vmatpush3.msra.mxu1 %v7124_v21 }
 0x268   : > { %5449 = vmatprep.subr.mxu1 %v8120_v23 }
 0x269   : > { %5450 = vmatpush3.msra.mxu1 %v7131_v53 }
 0x26a   : > { %5451 = vmatprep.subr.mxu1 %v8120_v23 }
 0x26b   : > { %5452 = vmatpush3.msra.mxu1 %v7138_v44 }
 0x26c   : > { %5453 = vmatprep.subr.mxu1 %v8120_v23 }
 0x26d   : > { %5454 = vmatpush3.msra.mxu1 %v7145_v24  ;;  %v3312_v24 = vld [vmem:[%s8015_s3] sm:$0x1] }
 0x26e   : > { %5455 = vmatprep.subr.mxu1 %v8120_v23  ;;  %v3345_v21 = vmul.f32 256.0, %v3312_v24 }
 0x26f   : > { %5456 = vmatpush3.msra.mxu1 %v7152_v49 }
 0x270   : > { %5457 = vmatprep.subr.mxu1 %v8120_v23 }
 0x271   : > { %5458 = vmatpush3.msra.mxu1 %v7159_v55  ;;  %v7305_v55 = vld [vmem:[%s8017_s5 + $0x8] sm:$0xff] }
 0x272   : > { %5459 = vmatprep.subr.mxu1 %v8120_v23  ;;  %8142 = vst [vmem:[#allocation4_spill] sm:$0xff] %v7305_v55 }
 0x273   : > { %5460 = vmatpush3.msra.mxu1 %v7166_v58  ;;  %v7298_v58 = vld [vmem:[%s8017_s5 + $0x10] sm:$0xff] }
 0x274   : > { %5461 = vmatprep.subr.mxu1 %v8120_v23  ;;  %8141 = vst [vmem:[#allocation19_spill] sm:$0xff] %v7298_v58 }
 0x275   : > { %5462 = vmatpush3.msra.mxu1 %v7175_v57  ;;  %v7291_v57 = vld [vmem:[%s8017_s5 + $0x18] sm:$0xff] }
 0x276   : > { %5463 = vmatprep.subr.mxu1 %v8120_v23  ;;  %8140 = vst [vmem:[#allocation3_spill] sm:$0xff] %v7291_v57 }
 0x277   : > { %5464 = vmatpush3.msra.mxu1 %v7182_v40  ;;  %v7284_v40 = vld [vmem:[%s8017_s5 + $0x20] sm:$0xff] }
 0x278   : > { %5465 = vmatprep.subr.mxu1 %v8120_v23 }
 0x279   : > { %5466 = vmatpush3.msra.mxu1 %v7187_v14  ;;  %v7277_v14 = vld [vmem:[%s8017_s5 + $0x28] sm:$0xff] }
 0x27a   : > { %5467 = vmatprep.subr.mxu1 %v8120_v23 }
 0x27b   : > { %5468 = vmatpush3.msra.mxu1 %v7196_v2  ;;  %v7270_v2 = vld [vmem:[%s8017_s5 + $0x30] sm:$0xff] }
 0x27c   : > { %5469 = vmatprep.subr.mxu1 %v8120_v23 }
 0x27d   : > { %5470 = vmatpush3.msra.mxu1 %v7202_v25  ;;  %v7263_v25 = vld [vmem:[%s8017_s5 + $0x38] sm:$0xff] }
 0x27e   : > { %5491 = vmatpush3.msra.mxu0 %v7263_v25 }
 0x27f   : > { %5492 = vmatprep.subr.mxu0 %v8120_v23 }
 0x280   : > { %5493 = vmatpush3.msra.mxu0 %v7270_v2 }
 0x281   : > { %5494 = vmatprep.subr.mxu0 %v8120_v23 }
 0x282   : > { %5495 = vmatpush3.msra.mxu0 %v7277_v14 }
 0x283   : > { %5496 = vmatprep.subr.mxu0 %v8120_v23 }
 0x284   : > { %5497 = vmatpush3.msra.mxu0 %v7284_v40 }
 0x285   : > { %5498 = vmatprep.subr.mxu0 %v8120_v23 }
 0x286   : > { %5499 = vmatpush3.msra.mxu0 %v7291_v57 }
 0x287   : > { %5500 = vmatprep.subr.mxu0 %v8120_v23 }
 0x288   : > { %5501 = vmatpush3.msra.mxu0 %v7298_v58  ;;  %v8143_v58 = vld [vmem:[#allocation7_spill] sm:$0xff] }
 0x289   : > { %5502 = vmatprep.subr.mxu0 %v8120_v23 }
 0x28a   : > { %5503 = vmatpush3.msra.mxu0 %v7305_v55  ;;  %v7318_v55 = vld [vmem:[%s8017_s5] sm:$0xff] }
 0x28b   : > { %5504 = vmatprep.subr.mxu0 %v8120_v23 }
 0x28c   : > { %5505 = vmatpush3.msra.mxu0 %v7318_v55 }
 0x28d   : > { %5509 = vmatprep.subr.mxu0 %v8120_v23 }
 0x316   : > { %v4970_v49 = vpop.f32.mrf.mxu1 }
 0x318   : > { %v4971_v44 = vpop.f32.mrf.mxu1 }
 0x319   : > { %v4972_v53 = vadd.f32 %v4971_v44, %v4970_v49 }
 0x31b   : > { %v3435_v32 = vadd.f32 %v4972_v53, %v3345_v21 }
 0x31e   : > { %v3504_v42 = vpop.f32.mrf.mxu1 }
 0x31f   : > { %v3505_v47 = vadd.f32 %v3504_v42, %v3435_v32 }
 0x320   : > { %v5438_v57 = vpop.f32.mrf.mxu1 }
 0x321   : > { %5472 = vmatmul.mubr.f32.vlgmr.msra.gmra.mxu1 %v3505_v47 }
 0x322   : > { %3794 = vmatprep.mubr.f32.mxu1 %v8143_v58 }
 0x3e1   : > { %v3574_v12 = vpop.f32.mrf.mxu1 }
 0x3e2   : > { %5507 = vmatmul.mubr.f32.vlgmr.msra.gmra.mxu0 %v3574_v12 }
 0x3e3   : > { %v5473_v44 = vpop.f32.mrf.mxu1  ;;  %5517 = vmatprep.mubr.msk.f32.mxu0 %vm5798_vm2, %v8120_v23 }
 0x4a2   : > { %v3644_v42 = vpop.f32.mrf.mxu0 }
 0x4a3   : > { %v3648_v47 = vsub.f32 %v3312_v24, %v3644_v42 }
 0x4a4   : > { %v5508_v32 = vpop.f32.mrf.mxu0 }
 0x4a5   : > { %v7325_v21 = vrot.slane %v3648_v47, %v7045_v61 }
 0x4a7   : > { %v7329_v53 = vadd.f32 %v7325_v21, %v6937_v8  ;;  %v7333_v49 = vadd.f32 %v7325_v21, %v7067_v63  ;;  %v7337_v12 = vadd.f32 %v7325_v21, %v6933_v11  ;;  %v7341_v58 = vadd.f32 %v7325_v21, %v7073_v22 }
 0x4a8   : > { %v7345_v24 = vadd.f32 %v7325_v21, %v6940_v4  ;;  %v7349_v8 = vadd.f32 %v7325_v21, %v6945_v39  ;;  %v7353_v63 = vadd.f32 %v7325_v21, %v7081_v48  ;;  %v7361_v22 = vadd.f32 %v7325_v21, %v6949_v27 }
 0x4a9   : > { %v3706_v11 = vmul.f32 %v7329_v53, %v7329_v53  ;;  %v3726_v57 = vmul.f32 %v7333_v49, %v7333_v49  ;;  %v3722_v4 = vmul.f32 %v7337_v12, %v7337_v12  ;;  %v7367_v39 = vadd.f32 %v7325_v21, %v6954_v59 }
 0x4aa   : > { %v7371_v48 = vadd.f32 %v7325_v21, %v7085_v30  ;;  %v3725_v44 = vmul.f32 %v7341_v58, %v7341_v58  ;;  %v7378_v27 = vadd.f32 %v7325_v21, %v6958_v28  ;;  %v3721_v59 = vmul.f32 %v7345_v24, %v7345_v24 }
 0x4ab   : > { %5510 = vmatpush3.msk.msra.mxu0 %vm3364_vm3, %v3726_v57  ;;  %5012 = vmatprep.subr.mxu1 %v3722_v4  ;;  %v7385_v42 = vadd.f32 %v7325_v21, %v6963_v5  ;;  %v3705_v30 = vmul.f32 %v7349_v8, %v7349_v8  ;;  %v3724_v32 = vmul.f32 %v7353_v63, %v7353_v63 }
 0x4ac   : > { %5511 = vmatprep.subr.mxu0 %v8120_v23  ;;  %5013 = vmatpush3.msra.mxu1 %v3706_v11  ;;  %v7393_v28 = vadd.f32 %v7325_v21, %v6967_v41  ;;  %v3720_v47 = vmul.f32 %v7361_v22, %v7361_v22  ;;  %v7400_v5 = vadd.f32 %v7325_v21, %v6972_v26 }
 0x4ad   : > { %5512 = vmatpush3.msra.mxu0 %v3725_v44  ;;  %5014 = vmatprep.subr.mxu1 %v3721_v59  ;;  %v3704_v57 = vmul.f32 %v7367_v39, %v7367_v39  ;;  %v3723_v11 = vmul.f32 %v7371_v48, %v7371_v48  ;;  %v7408_v41 = vadd.f32 %v7325_v21, %v6976_v33 }
 0x4ae   : > { %5513 = vmatprep.subr.mxu0 %v8120_v23  ;;  %5015 = vmatpush3.msra.mxu1 %v3705_v30  ;;  %v3719_v4 = vmul.f32 %v7378_v27, %v7378_v27  ;;  %v7415_v26 = vadd.f32 %v7325_v21, %v6982_v7  ;;  %v3703_v44 = vmul.f32 %v7385_v42, %v7385_v42 }
 0x4af   : > { %5514 = vmatpush3.msra.mxu0 %v3724_v32  ;;  %5016 = vmatprep.subr.mxu1 %v3720_v47  ;;  %v7421_v59 = vadd.f32 %v7325_v21, %v6986_v15  ;;  %v3718_v33 = vmul.f32 %v7393_v28, %v7393_v28  ;;  %v7429_v7 = vadd.f32 %v7325_v21, %v6992_v31 }
 0x4b0   : > { %5515 = vmatprep.subr.mxu0 %v8120_v23  ;;  %5017 = vmatpush3.msra.mxu1 %v3704_v57  ;;  %v3702_v30 = vmul.f32 %v7400_v5, %v7400_v5  ;;  %v7436_v15 = vadd.f32 %v7325_v21, %v6997_v36  ;;  %v3717_v32 = vmul.f32 %v7408_v41, %v7408_v41 }
 0x4b1   : > { %5516 = vmatpush3.msra.mxu0 %v3723_v11  ;;  %5018 = vmatprep.subr.mxu1 %v3719_v4  ;;  %v7443_v31 = vadd.f32 %v7325_v21, %v7001_v35  ;;  %v7450_v36 = vadd.f32 %v7325_v21, %v7006_v20  ;;  %v3716_v47 = vmul.f32 %v7421_v59, %v7421_v59 }
 0x4b2   : > { %5518 = vmatmul.mubr.msk.f32.vlgmr.msra.gmra.mxu0 %vm3361_vm4, %v8124_v50  ;;  %5019 = vmatpush3.msra.mxu1 %v3703_v44  ;;  %v3701_v50 = vmul.f32 %v7415_v26, %v7415_v26  ;;  %v7457_v35 = vadd.f32 %v7325_v21, %v8092_v34  ;;  %v7464_v20 = vadd.f32 %v7325_v21, %v7013_v37 }
 0x4b3   : > { %5555 = vmatprep.subr.mxu0 %v8120_v23  ;;  %5020 = vmatprep.subr.mxu1 %v3718_v33  ;;  %v3715_v57 = vmul.f32 %v7436_v15, %v7436_v15  ;;  %v7471_v34 = vadd.f32 %v7325_v21, %v8096_v52  ;;  %v7478_v37 = vadd.f32 %v7325_v21, %v7020_v38 }
 0x4b4   : > { %5556 = vmatpush3.msra.mxu0 %v7209_v17  ;;  %5021 = vmatpush3.msra.mxu1 %v3702_v30  ;;  %v3700_v17 = vmul.f32 %v7429_v7, %v7429_v7  ;;  %v3714_v11 = vmul.f32 %v7450_v36, %v7450_v36  ;;  %v7485_v52 = vadd.f32 %v7325_v21, %v8100_v60 }
 0x4b5   : > { %5557 = vmatprep.subr.mxu0 %v8120_v23  ;;  %5022 = vmatprep.subr.mxu1 %v3717_v32  ;;  %v7492_v38 = vadd.f32 %v7325_v21, %v7027_v10  ;;  %v3713_v4 = vmul.f32 %v7464_v20, %v7464_v20  ;;  %v7499_v60 = vadd.f32 %v7325_v21, %v8104_v16 }
 0x4b6   : > { %5558 = vmatpush3.msra.mxu0 %v7214_v62  ;;  %5023 = vmatpush3.msra.mxu1 %v3701_v50  ;;  %v3699_v62 = vmul.f32 %v7443_v31, %v7443_v31  ;;  %v7506_v10 = vadd.f32 %v7325_v21, %v7034_v43  ;;  %v3712_v44 = vmul.f32 %v7478_v37, %v7478_v37 }
 0x4b7   : > { %5559 = vmatprep.subr.mxu0 %v8120_v23  ;;  %5024 = vmatprep.subr.mxu1 %v3716_v47  ;;  %v7513_v16 = vadd.f32 %v7325_v21, %v8109_v9  ;;  %v7520_v43 = vadd.f32 %v7325_v21, %v7041_v3  ;;  %v3711_v33 = vmul.f32 %v7492_v38, %v7492_v38  ;;  %v8149_v47 = vld [vmem:[#allocation4_spill] sm:$0xff] }
 0x4b8   : > { %5560 = vmatpush3.msra.mxu0 %v7221_v46  ;;  %5025 = vmatpush3.msra.mxu1 %v3700_v17  ;;  %v3698_v46 = vmul.f32 %v7457_v35, %v7457_v35  ;;  %v7527_v9 = vadd.f32 %v7325_v21, %v8113_v56  ;;  %v7534_v3 = vadd.f32 %v7325_v21, %v7051_v19  ;;  %v8150_v17 = vld [vmem:[#allocation33_spill] sm:$0xff] }
 0x4b9   : > { %5561 = vmatprep.subr.mxu0 %v8120_v23  ;;  %5026 = vmatprep.subr.mxu1 %v3715_v57  ;;  %v3710_v30 = vmul.f32 %v7506_v10, %v7506_v10  ;;  %v7541_v56 = vadd.f32 %v7325_v21, %v8117_v18  ;;  %v7548_v19 = vadd.f32 %v7325_v21, %v7056_v1  ;;  %v8151_v57 = vld [vmem:[#allocation22_spill] sm:$0xff] }
 0x4ba   : > { %5562 = vmatpush3.msra.mxu0 %v7228_v29  ;;  %5027 = vmatpush3.msra.mxu1 %v3699_v62  ;;  %v3697_v29 = vmul.f32 %v7471_v34, %v7471_v34  ;;  %v3709_v32 = vmul.f32 %v7520_v43, %v7520_v43  ;;  %v7555_v18 = vadd.f32 %v7325_v21, %v8119_v13  ;;  %v8146_v21 = vld [vmem:[#allocation10_spill] sm:$0xff] }
 0x4bb   : > { %5563 = vmatprep.subr.mxu0 %v8120_v23  ;;  %5028 = vmatprep.subr.mxu1 %v3714_v11  ;;  %v3708_v1 = vmul.f32 %v7534_v3, %v7534_v3  ;;  %v3692_v50 = vmul.f32 %v7541_v56, %v7541_v56  ;;  %v3707_v13 = vmul.f32 %v7548_v19, %v7548_v19  ;;  %v8152_v62 = vld [vmem:[#allocation6_spill] sm:$0xff]  ;;  %v8153_v11 = vld [vmem:[#allocation21_spill] sm:$0xff] }
 0x4bc   : > { %5564 = vmatpush3.msra.mxu0 %v7235_v6  ;;  %5029 = vmatpush3.msra.mxu1 %v3698_v46  ;;  %v3696_v6 = vmul.f32 %v7485_v52, %v7485_v52  ;;  %v8154_v46 = vld [vmem:[#allocation32_spill] sm:$0xff] }
 0x4bd   : > { %5565 = vmatprep.subr.mxu0 %v8120_v23  ;;  %5030 = vmatprep.subr.mxu1 %v3713_v4  ;;  %v8156_v4 = vld [vmem:[#allocation2_spill] sm:$0xff] }
 0x4be   : > { %5566 = vmatpush3.msra.mxu0 %v7242_v54  ;;  %5031 = vmatpush3.msra.mxu1 %v3697_v29  ;;  %v3695_v54 = vmul.f32 %v7499_v60, %v7499_v60  ;;  %v8157_v29 = vld [vmem:[#allocation15_spill] sm:$0xff] }
 0x4bf   : > { %5567 = vmatprep.subr.mxu0 %v8120_v23  ;;  %5032 = vmatprep.subr.mxu1 %v3712_v44  ;;  %v8158_v44 = vld [vmem:[#allocation30_spill] sm:$0xff] }
 0x4c0   : > { %5568 = vmatpush3.msra.mxu0 %v7249_v0  ;;  %5033 = vmatpush3.msra.mxu1 %v3696_v6  ;;  %v3694_v0 = vmul.f32 %v7513_v16, %v7513_v16  ;;  %v8159_v6 = vld [vmem:[#allocation23_spill] sm:$0xff] }
 0x4c1   : > { %5569 = vmatprep.subr.mxu0 %v8120_v23  ;;  %5034 = vmatprep.subr.mxu1 %v3711_v33  ;;  %v8160_v33 = vld [vmem:[#allocation8_spill] sm:$0xff] }
 0x4c2   : > { %5570 = vmatpush3.msra.mxu0 %v7256_v51  ;;  %5035 = vmatpush3.msra.mxu1 %v3695_v54  ;;  %v3693_v51 = vmul.f32 %v7527_v9, %v7527_v9  ;;  %v8161_v54 = vld [vmem:[#allocation24_spill] sm:$0xff] }
 0x4c3   : > { %5571 = vmatprep.subr.mxu0 %v8120_v23  ;;  %5036 = vmatprep.subr.mxu1 %v3710_v30  ;;  %v8162_v30 = vld [vmem:[#allocation28_spill] sm:$0xff] }
 0x4c4   : > { %5572 = vmatpush3.msra.mxu0 %v7263_v25  ;;  %5037 = vmatpush3.msra.mxu1 %v3694_v0  ;;  %v3691_v25 = vmul.f32 %v7555_v18, %v7555_v18 }
 0x4c5   : > { %5573 = vmatprep.subr.mxu0 %v8120_v23  ;;  %5038 = vmatprep.subr.mxu1 %v3709_v32 }
 0x4c6   : > { %5574 = vmatpush3.msra.mxu0 %v7270_v2  ;;  %5039 = vmatpush3.msra.mxu1 %v3693_v51  ;;  %v8144_v2 = vld [vmem:[#allocation25_spill] sm:$0xff] }
 0x4c7   : > { %5575 = vmatprep.subr.mxu0 %v8120_v23  ;;  %5040 = vmatprep.subr.mxu1 %v3708_v1 }
 0x4c8   : > { %5576 = vmatpush3.msra.mxu0 %v7277_v14  ;;  %5041 = vmatpush3.msra.mxu1 %v3692_v50  ;;  %v8145_v14 = vld [vmem:[#allocation3_spill] sm:$0xff] }
 0x4c9   : > { %5577 = vmatprep.subr.mxu0 %v8120_v23  ;;  %5042 = vmatprep.subr.mxu1 %v3707_v13 }
 0x4ca   : > { %5578 = vmatpush3.msra.mxu0 %v7284_v40  ;;  %5043 = vmatpush3.msra.mxu1 %v3691_v25  ;;  %v8147_v40 = vld [vmem:[#allocation19_spill] sm:$0xff] }
 0x4cb   : > { %5579 = vmatprep.subr.mxu0 %v8120_v23  ;;  %3795 = vmatmul.mubr.f32.vlgmr.msra.gmra.mxu1 %v7061_v45  ;;  %v8148_v45 = vld [vmem:[#allocation27_spill] sm:$0xff] }
 0x4cc   : > { %5520 = vmatprep.subr.mxu1 %v8120_v23  ;;  %5552 = vmatprep.mubr.msk.f32.mxu1 %vm5798_vm2, %v8120_v23 }
 0x4cd   : > { %5521 = vmatpush3.msra.mxu1 %v8144_v2  ;;  %5580 = vmatpush3.msra.mxu0 %v8145_v14 }
 0x4ce   : > { %5522 = vmatprep.subr.mxu1 %v8120_v23  ;;  %5581 = vmatprep.subr.mxu0 %v8120_v23 }
 0x4cf   : > { %5523 = vmatpush3.msra.mxu1 %v8146_v21  ;;  %5582 = vmatpush3.msra.mxu0 %v8147_v40 }
 0x4d0   : > { %5524 = vmatprep.subr.mxu1 %v8120_v23  ;;  %5583 = vmatprep.subr.mxu0 %v8120_v23 }
 0x4d1   : > { %5525 = vmatpush3.msra.mxu1 %v8148_v45  ;;  %5584 = vmatpush3.msra.mxu0 %v8149_v47  ;;  %v4011_v45 = vld [vmem:[%s432_s11] sm:$0x1] }
 0x4d2   : > { %5526 = vmatprep.subr.mxu1 %v8120_v23  ;;  %5585 = vmatprep.subr.mxu0 %v8120_v23 }
 0x4d3   : > { %5527 = vmatpush3.msra.mxu1 %v8150_v17  ;;  %5586 = vmatpush3.msra.mxu0 %v7318_v55  ;;  %v8155_v55 = vld [vmem:[#allocation26_spill] sm:$0xff] }
 0x4d4   : > { %5528 = vmatprep.subr.mxu1 %v8120_v23  ;;  %5587 = vmatprep.mubr.msk.f32.mxu0 %vm5798_vm2, %v8120_v23 }
 0x4d5   : > { %5529 = vmatpush3.msra.mxu1 %v8151_v57 }
 0x4d6   : > { %5530 = vmatprep.subr.mxu1 %v8120_v23 }
 0x4d7   : > { %5531 = vmatpush3.msra.mxu1 %v8152_v62 }
 0x4d8   : > { %5532 = vmatprep.subr.mxu1 %v8120_v23 }
 0x4d9   : > { %5533 = vmatpush3.msra.mxu1 %v8153_v11 }
 0x4da   : > { %5534 = vmatprep.subr.mxu1 %v8120_v23 }
 0x4db   : > { %5535 = vmatpush3.msra.mxu1 %v8154_v46 }
 0x4dc   : > { %5536 = vmatprep.subr.mxu1 %v8120_v23 }
 0x4dd   : > { %5537 = vmatpush3.msra.mxu1 %v8155_v55  ;;  %v7637_v55 = vld [vmem:[%s438_s14] ss:$0 sm:$0xff] }
 0x4de   : > { %5538 = vmatprep.subr.mxu1 %v8120_v23 }
 0x4df   : > { %5539 = vmatpush3.msra.mxu1 %v8156_v4 }
 0x4e0   : > { %5540 = vmatprep.subr.mxu1 %v8120_v23 }
 0x4e1   : > { %5541 = vmatpush3.msra.mxu1 %v8157_v29 }
 0x4e2   : > { %5542 = vmatprep.subr.mxu1 %v8120_v23 }
 0x4e3   : > { %5543 = vmatpush3.msra.mxu1 %v8158_v44 }
 0x4e4   : > { %5544 = vmatprep.subr.mxu1 %v8120_v23 }
 0x4e5   : > { %5545 = vmatpush3.msra.mxu1 %v8159_v6 }
 0x4e6   : > { %5546 = vmatprep.subr.mxu1 %v8120_v23 }
 0x4e7   : > { %5547 = vmatpush3.msra.mxu1 %v8160_v33 }
 0x4e8   : > { %5548 = vmatprep.subr.mxu1 %v8120_v23 }
 0x4e9   : > { %5549 = vmatpush3.msra.mxu1 %v8161_v54 }
 0x4ea   : > { %5550 = vmatprep.subr.mxu1 %v8120_v23 }
 0x4eb   : > { %5551 = vmatpush3.msra.mxu1 %v8162_v30 }
 0x572   : > { %v3866_v0 = vpop.f32.mrf.mxu0 }
 0x574   : > { %v5519_v32 = vpop.f32.mrf.mxu0 }
 0x58b   : > { %v5044_v51 = vpop.f32.mrf.mxu1 }
 0x58d   : > { %v5045_v1 = vpop.f32.mrf.mxu1 }
 0x58e   : > { %v5046_v50 = vadd.f32 %v5045_v1, %v5044_v51 }
 0x590   : > { %v3867_v13 = vadd.f32 %v5046_v50, %v3866_v0 }
 0x592   : > { %5553 = vmatmul.mubr.f32.vlgmr.msra.gmra.mxu1 %v3867_v13 }
 0x652   : > { %v3936_v25 = vpop.f32.mrf.mxu1 }
 0x653   : > { %5588 = vmatmul.mubr.f32.vlgmr.msra.gmra.mxu0 %v3936_v25 }
 0x654   : > { %v5554_v2 = vpop.f32.mrf.mxu1 }
 0x713   : > { %v4006_v14 = vpop.f32.mrf.mxu0 }
 0x714   : > { %v4007_v40 = vadd.f32 1e-05, %v4006_v14 }
 0x715   : > { %v5589_v21 = vpop.f32.mrf.mxu0 }
 0x716   : > { %5627 = vrsqrt.f32 %v4007_v40 }
 0x723   : > { %v5628_v23 = vpop.eup %5627 }
 0x724   : > { %v4012_v47 = vmul.f32 %v5628_v23, %v4011_v45 }
 0x726   : > { %v7623_v17 = vrot.slane %v4012_v47, %v7045_v61 }
 0x728   : > { %v4017_v57 = vmul.f32 %v7623_v17, %v7555_v18  ;;  %v4018_v62 = vmul.f32 %v7623_v17, %v7541_v56  ;;  %v4019_v11 = vmul.f32 %v7623_v17, %v7527_v9  ;;  %v4020_v46 = vmul.f32 %v7623_v17, %v7513_v16 }
 0x729   : > { %v4021_v61 = vmul.f32 %v7623_v17, %v7499_v60  ;;  %v4022_v4 = vmul.f32 %v7623_v17, %v7485_v52  ;;  %v4023_v18 = vmul.f32 %v7623_v17, %v7471_v34  ;;  %v4024_v16 = vmul.f32 %v7623_v17, %v7457_v35 }
 0x72a   : > { %v7646_v29 = vadd.f32 %v7637_v55, %v4017_v57  ;;  %v7649_v56 = vadd.f32 %v7637_v55, %v4018_v62  ;;  %v7652_v9 = vadd.f32 %v7637_v55, %v4019_v11  ;;  %v7657_v60 = vadd.f32 %v7637_v55, %v4020_v46 }
 0x72b   : > { %v4025_v52 = vmul.f32 %v7623_v17, %v7443_v31  ;;  %v7662_v34 = vadd.f32 %v7637_v55, %v4021_v61  ;;  %v4026_v44 = vmul.f32 %v7623_v17, %v7429_v7  ;;  %v4027_v6 = vmul.f32 %v7623_v17, %v7415_v26 }
 0x72c   : > { %v7669_v33 = vadd.f32 %v7637_v55, %v4022_v4  ;;  %v7672_v35 = vadd.f32 %v7637_v55, %v4023_v18  ;;  %v4729_v54 = vmul.f32 -1.442695, %v7646_v29  ;;  %v4730_v30 = vmul.f32 -1.442695, %v7649_v56 }
 0x72d   : > { %v4731_v31 = vmul.f32 -1.442695, %v7652_v9  ;;  %v4028_v0 = vmul.f32 %v7623_v17, %v7400_v5  ;;  %v7680_v7 = vadd.f32 %v7637_v55, %v4024_v16  ;;  %v4732_v26 = vmul.f32 -1.442695, %v7657_v60 }
 0x72e   : > { %v4029_v32 = vmul.f32 %v7623_v17, %v7385_v42  ;;  %v7686_v51 = vadd.f32 %v7637_v55, %v4025_v52  ;;  %5629 = vpow2.f32 %v4729_v54  ;;  %v4733_v1 = vmul.f32 -1.442695, %v7662_v34 }
 0x72f   : > { %v4030_v50 = vmul.f32 %v7623_v17, %v7367_v39  ;;  %v7692_v13 = vadd.f32 %v7637_v55, %v4026_v44  ;;  %5631 = vpow2.f32 %v4730_v30  ;;  %v4734_v5 = vmul.f32 -1.442695, %v7669_v33 }
 0x730   : > { %v4031_v25 = vmul.f32 %v7623_v17, %v7349_v8  ;;  %v7698_v42 = vadd.f32 %v7637_v55, %v4027_v6  ;;  %5633 = vpow2.f32 %v4731_v31  ;;  %v4735_v2 = vmul.f32 -1.442695, %v7672_v35 }
 0x731   : > { %v4032_v14 = vmul.f32 %v7623_v17, %v7329_v53  ;;  %v7704_v39 = vadd.f32 %v7637_v55, %v4028_v0  ;;  %5635 = vpow2.f32 %v4732_v26  ;;  %v4736_v21 = vmul.f32 -1.442695, %v7680_v7 }
 0x732   : > { %v4033_v40 = vmul.f32 %v7623_v17, %v7548_v19  ;;  %v7710_v8 = vadd.f32 %v7637_v55, %v4029_v32  ;;  %5637 = vpow2.f32 %v4733_v1  ;;  %v4737_v23 = vmul.f32 -1.442695, %v7686_v51 }
 0x733   : > { %v4034_v45 = vmul.f32 %v7623_v17, %v7534_v3  ;;  %v7716_v53 = vadd.f32 %v7637_v55, %v4030_v50  ;;  %5639 = vpow2.f32 %v4734_v5  ;;  %v4738_v47 = vmul.f32 -1.442695, %v7692_v13 }
 0x734   : > { %v4035_v57 = vmul.f32 %v7623_v17, %v7520_v43  ;;  %v7722_v19 = vadd.f32 %v7637_v55, %v4031_v25  ;;  %5641 = vpow2.f32 %v4735_v2  ;;  %v4739_v62 = vmul.f32 -1.442695, %v7698_v42 }
 0x735   : > { %v4036_v11 = vmul.f32 %v7623_v17, %v7506_v10  ;;  %v7728_v3 = vadd.f32 %v7637_v55, %v4032_v14  ;;  %5643 = vpow2.f32 %v4736_v21  ;;  %v4740_v46 = vmul.f32 -1.442695, %v7704_v39 }
 0x736   : > { %v4037_v61 = vmul.f32 %v7623_v17, %v7492_v38  ;;  %v7734_v43 = vadd.f32 %v7637_v55, %v4033_v40  ;;  %5645 = vpow2.f32 %v4737_v23  ;;  %v4741_v4 = vmul.f32 -1.442695, %v7710_v8 }
 0x737   : > { %v4038_v18 = vmul.f32 %v7623_v17, %v7478_v37  ;;  %v7740_v10 = vadd.f32 %v7637_v55, %v4034_v45  ;;  %5647 = vpow2.f32 %v4738_v47  ;;  %v4742_v16 = vmul.f32 -1.442695, %v7716_v53 }
 0x738   : > { %v4039_v52 = vmul.f32 %v7623_v17, %v7464_v20  ;;  %v7746_v38 = vadd.f32 %v7637_v55, %v4035_v57  ;;  %5649 = vpow2.f32 %v4739_v62  ;;  %v4743_v44 = vmul.f32 -1.442695, %v7722_v19 }
 0x739   : > { %v4040_v6 = vmul.f32 %v7623_v17, %v7450_v36  ;;  %v7752_v37 = vadd.f32 %v7637_v55, %v4036_v11  ;;  %5651 = vpow2.f32 %v4740_v46  ;;  %v4744_v54 = vmul.f32 -1.442695, %v7728_v3 }
 0x73a   : > { %v4041_v30 = vmul.f32 %v7623_v17, %v7436_v15  ;;  %v7758_v20 = vadd.f32 %v7637_v55, %v4037_v61  ;;  %5653 = vpow2.f32 %v4741_v4  ;;  %v4745_v31 = vmul.f32 -1.442695, %v7734_v43 }
 0x73b   : > { %v7761_v0 = vpop.eup %5629  ;;  %v4042_v36 = vmul.f32 %v7623_v17, %v7421_v59  ;;  %v7766_v26 = vadd.f32 %v7637_v55, %v4038_v18  ;;  %5655 = vpow2.f32 %v4742_v16  ;;  %v4746_v32 = vmul.f32 -1.442695, %v7740_v10 }
 0x73c   : > { %v7769_v1 = vpop.eup %5631  ;;  %v4043_v15 = vmul.f32 %v7623_v17, %v7408_v41  ;;  %v7774_v50 = vadd.f32 %v7637_v55, %v4039_v52  ;;  %5657 = vpow2.f32 %v4743_v44  ;;  %v4747_v5 = vmul.f32 -1.442695, %v7746_v38 }
 0x73d   : > { %v7777_v25 = vpop.eup %5633  ;;  %v4044_v59 = vmul.f32 %v7623_v17, %v7393_v28  ;;  %v7782_v2 = vadd.f32 %v7637_v55, %v4040_v6  ;;  %5659 = vpow2.f32 %v4744_v54  ;;  %v4748_v14 = vmul.f32 -1.442695, %v7752_v37 }
 0x73e   : > { %v7785_v21 = vpop.eup %5635  ;;  %v4045_v41 = vmul.f32 %v7623_v17, %v7378_v27  ;;  %v7790_v40 = vadd.f32 %v7637_v55, %v4041_v30  ;;  %5661 = vpow2.f32 %v4745_v31  ;;  %v4749_v23 = vmul.f32 -1.442695, %v7758_v20 }
 0x73f   : > { %v7793_v45 = vpop.eup %5637  ;;  %v4046_v28 = vmul.f32 %v7623_v17, %v7361_v22  ;;  %v7798_v47 = vadd.f32 %v7637_v55, %v4042_v36  ;;  %5663 = vpow2.f32 %v4746_v32  ;;  %v4750_v57 = vmul.f32 -1.442695, %v7766_v26 }
 0x740   : > { %v7801_v62 = vpop.eup %5639  ;;  %v4047_v27 = vmul.f32 %v7623_v17, %v7345_v24  ;;  %v7806_v11 = vadd.f32 %v7637_v55, %v4043_v15  ;;  %5665 = vpow2.f32 %v4747_v5  ;;  %v4751_v46 = vmul.f32 -1.442695, %v7774_v50 }
 0x741   : > { %v7809_v61 = vpop.eup %5641  ;;  %v4048_v22 = vmul.f32 %v7623_v17, %v7337_v12  ;;  %v7814_v4 = vadd.f32 %v7637_v55, %v4044_v59  ;;  %5667 = vpow2.f32 %v4748_v14  ;;  %v4752_v18 = vmul.f32 -1.442695, %v7782_v2 }
 0x742   : > { %v7817_v16 = vpop.eup %5643  ;;  %v4049_v24 = vmul.f32 %v7623_v17, %v7371_v48  ;;  %v7822_v52 = vadd.f32 %v7637_v55, %v4045_v41  ;;  %5669 = vpow2.f32 %v4749_v23  ;;  %v4753_v44 = vmul.f32 -1.442695, %v7790_v40 }
 0x743   : > { %v7825_v6 = vpop.eup %5645  ;;  %v4050_v12 = vmul.f32 %v7623_v17, %v7353_v63  ;;  %v7830_v54 = vadd.f32 %v7637_v55, %v4046_v28  ;;  %5671 = vpow2.f32 %v4750_v57  ;;  %v4754_v30 = vmul.f32 -1.442695, %v7798_v47 }
 0x744   : > { %v7833_v31 = vpop.eup %5647  ;;  %v4051_v48 = vmul.f32 %v7623_v17, %v7341_v58  ;;  %v7838_v36 = vadd.f32 %v7637_v55, %v4047_v27  ;;  %5673 = vpow2.f32 %v4751_v46  ;;  %v4755_v32 = vmul.f32 -1.442695, %v7806_v11 }
 0x745   : > { %v7841_v15 = vpop.eup %5649  ;;  %v4052_v63 = vmul.f32 %v7623_v17, %v7333_v49  ;;  %v7846_v5 = vadd.f32 %v7637_v55, %v4048_v22  ;;  %5675 = vpow2.f32 %v4752_v18  ;;  %v4756_v59 = vmul.f32 -1.442695, %v7814_v4 }
 0x746   : > { %8163 = vst [vmem:[#allocation18_spill] sm:$0xff] %v7838_v36  ;;  %v5652_v14 = vpop.eup %5651  ;;  %v7850_v58 = vadd.f32 %v7637_v55, %v4049_v24  ;;  %5677 = vpow2.f32 %v4753_v44  ;;  %v4757_v41 = vmul.f32 -1.442695, %v7822_v52  ;;  %v7854_v28 = vadd.f32 %v7637_v55, %v4050_v12 }
 0x747   : > { %8164 = vst [vmem:[#allocation31_spill] sm:$0xff] %v7846_v5  ;;  %v5654_v23 = vpop.eup %5653  ;;  %5679 = vpow2.f32 %v4754_v30  ;;  %v4758_v49 = vmul.f32 -1.442695, %v7830_v54  ;;  %v7858_v57 = vadd.f32 %v7637_v55, %v4051_v48  ;;  %v4759_v27 = vmul.f32 -1.442695, %v7838_v36 }
 0x748   : > { %8165 = vst [vmem:[#allocation16_spill] sm:$0xff] %v7850_v58  ;;  %8166 = vst [vmem:[#allocation29_spill] sm:$0xff] %v7854_v28  ;;  %v5656_v17 = vpop.eup %5655  ;;  %5681 = vpow2.f32 %v4755_v32  ;;  %v7862_v22 = vadd.f32 %v7637_v55, %v4052_v63  ;;  %v4760_v18 = vmul.f32 -1.442695, %v7846_v5  ;;  %v4761_v44 = vmul.f32 -1.442695, %v7850_v58 }
 0x749   : > { %8167 = vst [vmem:[#allocation5_spill] sm:$0xff] %v7858_v57  ;;  %v5658_v46 = vpop.eup %5657  ;;  %5683 = vpow2.f32 %v4756_v59  ;;  %v4762_v30 = vmul.f32 -1.442695, %v7854_v28  ;;  %v4763_v32 = vmul.f32 -1.442695, %v7858_v57  ;;  %v4204_v59 = vadd.f32 1.0, %v7761_v0 }
 0x74a   : > { %8168 = vst [vmem:[#allocation13_spill] sm:$0xff] %v7862_v22  ;;  %v5660_v24 = vpop.eup %5659  ;;  %5685 = vpow2.f32 %v4757_v41  ;;  %v4764_v55 = vmul.f32 -1.442695, %v7862_v22  ;;  %v4205_v41 = vadd.f32 1.0, %v7769_v1  ;;  %v4216_v22 = vadd.f32 1.0, %v5654_v23 }
 0x74b   : > { %v5662_v12 = vpop.eup %5661  ;;  %5687 = vpow2.f32 %v4758_v49  ;;  %v4206_v49 = vadd.f32 1.0, %v7777_v25 }
 0x74c   : > { %v5664_v48 = vpop.eup %5663  ;;  %5689 = vpow2.f32 %v4759_v27 }
 0x74d   : > { %v5666_v36 = vpop.eup %5665  ;;  %5691 = vpow2.f32 %v4760_v18  ;;  %v4207_v18 = vadd.f32 1.0, %v7785_v21  ;;  %v4221_v23 = vadd.f32 1.0, %v5664_v48 }
 0x74e   : > { %v5668_v63 = vpop.eup %5667  ;;  %5693 = vpow2.f32 %v4761_v44  ;;  %v4208_v44 = vadd.f32 1.0, %v7793_v45  ;;  %v4212_v45 = vadd.f32 1.0, %v7825_v6 }
 0x74f   : > { %v5670_v5 = vpop.eup %5669  ;;  %5695 = vpow2.f32 %v4762_v30  ;;  %v4209_v30 = vadd.f32 1.0, %v7801_v62  ;;  %v4213_v62 = vadd.f32 1.0, %v7833_v31 }
 0x750   : > { %v7871_v58 = vpop.eup %5671  ;;  %5697 = vpow2.f32 %v4763_v32  ;;  %v4210_v32 = vadd.f32 1.0, %v7809_v61  ;;  %v4214_v61 = vadd.f32 1.0, %v7841_v15  ;;  %v4219_v15 = vadd.f32 1.0, %v5660_v24 }
 0x751   : > { %v7874_v27 = vpop.eup %5673  ;;  %5699 = vpow2.f32 %v4764_v55  ;;  %v4211_v55 = vadd.f32 1.0, %v7817_v16  ;;  %v4215_v16 = vadd.f32 1.0, %v5652_v14  ;;  %v4220_v14 = vadd.f32 1.0, %v5662_v12 }
 0x752   : > { %v7877_v57 = vpop.eup %5675  ;;  %5701 = vrcp.f32 %v4204_v59 }
 0x753   : > { %v7880_v0 = vpop.eup %5677  ;;  %5703 = vrcp.f32 %v4205_v41 }
 0x754   : > { %v7883_v1 = vpop.eup %5679  ;;  %5705 = vrcp.f32 %v4206_v49 }
 0x755   : > { %v7886_v25 = vpop.eup %5681  ;;  %5707 = vrcp.f32 %v4207_v18 }
 0x756   : > { %v7889_v21 = vpop.eup %5683  ;;  %5709 = vrcp.f32 %v4208_v44  ;;  %v4217_v44 = vadd.f32 1.0, %v5656_v17 }
 0x757   : > { %v7892_v59 = vpop.eup %5685  ;;  %5711 = vrcp.f32 %v4209_v30  ;;  %v4218_v30 = vadd.f32 1.0, %v5658_v46  ;;  %v4222_v46 = vadd.f32 1.0, %v5666_v36  ;;  %v4225_v36 = vadd.f32 1.0, %v7871_v58 }
 0x758   : > { %v7895_v41 = vpop.eup %5687  ;;  %5713 = vrcp.f32 %v4210_v32 }
 0x759   : > { %v7898_v49 = vpop.eup %5689  ;;  %5715 = vrcp.f32 %v4211_v55 }
 0x75a   : > { %v7900_v18 = vpop.eup %5691  ;;  %5717 = vrcp.f32 %v4212_v45 }
 0x75b   : > { %v7902_v6 = vpop.eup %5693  ;;  %5719 = vrcp.f32 %v4213_v62  ;;  %v4223_v62 = vadd.f32 1.0, %v5668_v63  ;;  %v4226_v63 = vadd.f32 1.0, %v7874_v27 }
 0x75c   : > { %v7905_v31 = vpop.eup %5695  ;;  %5721 = vrcp.f32 %v4214_v61  ;;  %v4224_v61 = vadd.f32 1.0, %v5670_v5 }
 0x75d   : > { %v7907_v28 = vpop.eup %5697  ;;  %5723 = vrcp.f32 %v4215_v16 }
 0x75e   : > { %v7909_v32 = vpop.eup %5699  ;;  %5725 = vrcp.f32 %v4216_v22 }
 0x75f   : > { %v5702_v55 = vpop.eup %5701  ;;  %5727 = vrcp.f32 %v4217_v44 }
 0x760   : > { %v5704_v17 = vpop.eup %5703  ;;  %5729 = vrcp.f32 %v4218_v30  ;;  %v4312_v24 = vmul.f32 %v5702_v55, %v7646_v29 }
 0x761   : > { %v5706_v45 = vpop.eup %5705  ;;  %5731 = vrcp.f32 %v4219_v15  ;;  %v4313_v22 = vmul.f32 %v5704_v17, %v7649_v56 }
 0x762   : > { %v5708_v12 = vpop.eup %5707  ;;  %5733 = vrcp.f32 %v4220_v14  ;;  %v4314_v16 = vmul.f32 %v5706_v45, %v7652_v9  ;;  %4348 = vst [vmem:[%s7914_s18] sm:$0xff] %v4312_v24  ;;  %v4227_v9 = vadd.f32 1.0, %v7877_v57 }
 0x763   : > { %v5710_v48 = vpop.eup %5709  ;;  %5735 = vrcp.f32 %v4221_v23  ;;  %v4315_v44 = vmul.f32 %v5708_v12, %v7657_v60  ;;  %4349 = vst [vmem:[%s7914_s18 + $0x8] sm:$0xff] %v4313_v22  ;;  %v4228_v60 = vadd.f32 1.0, %v7880_v0 }
 0x764   : > { %v5712_v29 = vpop.eup %5711  ;;  %5737 = vrcp.f32 %v4222_v46  ;;  %v4316_v56 = vmul.f32 %v5710_v48, %v7662_v34  ;;  %4350 = vst [vmem:[%s7914_s18 + $0x10] sm:$0xff] %v4314_v16  ;;  %v4229_v34 = vadd.f32 1.0, %v7883_v1 }
 0x765   : > { %v5714_v5 = vpop.eup %5713  ;;  %5739 = vrcp.f32 %v4223_v62  ;;  %v4317_v30 = vmul.f32 %v5712_v29, %v7669_v33  ;;  %4351 = vst [vmem:[%s7914_s18 + $0x18] sm:$0xff] %v4315_v44  ;;  %v4230_v33 = vadd.f32 1.0, %v7886_v25 }
 0x766   : > { %v5716_v58 = vpop.eup %5715  ;;  %5741 = vrcp.f32 %v4224_v61  ;;  %v4318_v15 = vmul.f32 %v5714_v5, %v7672_v35  ;;  %4352 = vst [vmem:[%s7914_s18 + $0x20] sm:$0xff] %v4316_v56  ;;  %v4231_v35 = vadd.f32 1.0, %v7889_v21 }
 0x767   : > { %v5718_v27 = vpop.eup %5717  ;;  %5743 = vrcp.f32 %v4225_v36  ;;  %v4319_v14 = vmul.f32 %v5716_v58, %v7680_v7  ;;  %4353 = vst [vmem:[%s7914_s18 + $0x28] sm:$0xff] %v4317_v30  ;;  %v4232_v7 = vadd.f32 1.0, %v7892_v59 }
 0x768   : > { %v5720_v57 = vpop.eup %5719  ;;  %5745 = vrcp.f32 %v4226_v63  ;;  %v4320_v55 = vmul.f32 %v5718_v27, %v7686_v51  ;;  %4354 = vst [vmem:[%s7914_s18 + $0x30] sm:$0xff] %v4318_v15  ;;  %v4233_v51 = vadd.f32 1.0, %v7895_v41  ;;  %v8170_v15 = vld [vmem:[#allocation31_spill] sm:$0xff] }
 0x769   : > { %v5722_v0 = vpop.eup %5721  ;;  %5747 = vrcp.f32 %v4227_v9  ;;  %v4321_v23 = vmul.f32 %v5720_v57, %v7692_v13  ;;  %4355 = vst [vmem:[%s7914_s18 + $0x38] sm:$0xff] %v4319_v14  ;;  %v4234_v13 = vadd.f32 1.0, %v7898_v49 }
 0x76a   : > { %v5724_v1 = vpop.eup %5723  ;;  %5749 = vrcp.f32 %v4228_v60  ;;  %v4322_v17 = vmul.f32 %v5722_v0, %v7698_v42  ;;  %4356 = vst [vmem:[%s7914_s18 + $0x40] sm:$0xff] %v4320_v55  ;;  %v4235_v42 = vadd.f32 1.0, %v7900_v18  ;;  %v8169_v60 = vld [vmem:[#allocation18_spill] sm:$0xff]  ;;  %v8173_v0 = vld [vmem:[#allocation5_spill] sm:$0xff] }
 0x76b   : > { %v5726_v25 = vpop.eup %5725  ;;  %5751 = vrcp.f32 %v4229_v34  ;;  %v4323_v46 = vmul.f32 %v5724_v1, %v7704_v39  ;;  %4357 = vst [vmem:[%s7914_s18 + $0x48] sm:$0xff] %v4321_v23  ;;  %v4236_v39 = vadd.f32 1.0, %v7902_v6  ;;  %v8174_v23 = vld [vmem:[#allocation13_spill] sm:$0xff] }
 0x76c   : > { %v5728_v21 = vpop.eup %5727  ;;  %5753 = vrcp.f32 %v4230_v33  ;;  %v4324_v24 = vmul.f32 %v5726_v25, %v7710_v8  ;;  %4358 = vst [vmem:[%s7914_s18 + $0x50] sm:$0xff] %v4322_v17  ;;  %v4237_v8 = vadd.f32 1.0, %v7905_v31  ;;  %v8172_v33 = vld [vmem:[#allocation29_spill] sm:$0xff] }
 0x76d   : > { %v5730_v59 = vpop.eup %5729  ;;  %5755 = vrcp.f32 %v4231_v35  ;;  %v4325_v45 = vmul.f32 %v5728_v21, %v7716_v53  ;;  %4359 = vst [vmem:[%s7914_s18 + $0x58] sm:$0xff] %v4323_v46  ;;  %v4238_v53 = vadd.f32 1.0, %v7907_v28 }
 0x76e   : > { %v5732_v41 = vpop.eup %5731  ;;  %5757 = vrcp.f32 %v4232_v7  ;;  %v4326_v62 = vmul.f32 %v5730_v59, %v7722_v19  ;;  %4360 = vst [vmem:[%s7914_s18 + $0x60] sm:$0xff] %v4324_v24  ;;  %v4239_v19 = vadd.f32 1.0, %v7909_v32 }
 0x76f   : > { %v5734_v49 = vpop.eup %5733  ;;  %5759 = vrcp.f32 %v4233_v51  ;;  %v4327_v18 = vmul.f32 %v5732_v41, %v7728_v3  ;;  %4361 = vst [vmem:[%s7914_s18 + $0x68] sm:$0xff] %v4325_v45 }
 0x770   : > { %v5736_v22 = vpop.eup %5735  ;;  %5761 = vrcp.f32 %v4234_v13  ;;  %v4328_v6 = vmul.f32 %v5734_v49, %v7734_v43  ;;  %4362 = vst [vmem:[%s7914_s18 + $0x70] sm:$0xff] %v4326_v62 }
 0x771   : > { %v5738_v12 = vpop.eup %5737  ;;  %5763 = vrcp.f32 %v4235_v42  ;;  %v4329_v31 = vmul.f32 %v5736_v22, %v7740_v10  ;;  %4363 = vst [vmem:[%s7914_s18 + $0x78] sm:$0xff] %v4327_v18 }
 0x772   : > { %v5740_v61 = vpop.eup %5739  ;;  %5765 = vrcp.f32 %v4236_v39  ;;  %v4330_v3 = vmul.f32 %v5738_v12, %v7746_v38  ;;  %4364 = vst [vmem:[%s7914_s18 + $0x80] sm:$0xff] %v4328_v6 }
 0x773   : > { %v5742_v28 = vpop.eup %5741  ;;  %5767 = vrcp.f32 %v4237_v8  ;;  %v4331_v43 = vmul.f32 %v5740_v61, %v7752_v37  ;;  %4365 = vst [vmem:[%s7914_s18 + $0x88] sm:$0xff] %v4329_v31 }
 0x774   : > { %v5744_v16 = vpop.eup %5743  ;;  %5769 = vrcp.f32 %v4238_v53  ;;  %v4332_v32 = vmul.f32 %v5742_v28, %v7758_v20  ;;  %4366 = vst [vmem:[%s7914_s18 + $0x90] sm:$0xff] %v4330_v3 }
 0x775   : > { %v5746_v10 = vpop.eup %5745  ;;  %5771 = vrcp.f32 %v4239_v19  ;;  %v4333_v48 = vmul.f32 %v5744_v16, %v7766_v26  ;;  %4367 = vst [vmem:[%s7914_s18 + $0x98] sm:$0xff] %v4331_v43 }
 0x776   : > { %v5748_v38 = vpop.eup %5747  ;;  %v4334_v36 = vmul.f32 %v5746_v10, %v7774_v50  ;;  %4368 = vst [vmem:[%s7914_s18 + $0xa0] sm:$0xff] %v4332_v32 }
 0x777   : > { %v5750_v37 = vpop.eup %5749  ;;  %v4335_v44 = vmul.f32 %v5748_v38, %v7782_v2  ;;  %4369 = vst [vmem:[%s7914_s18 + $0xa8] sm:$0xff] %v4333_v48 }
 0x778   : > { %v5752_v29 = vpop.eup %5751  ;;  %v4336_v20 = vmul.f32 %v5750_v37, %v7790_v40  ;;  %4370 = vst [vmem:[%s7914_s18 + $0xb0] sm:$0xff] %v4334_v36 }
 0x779   : > { %v5754_v63 = vpop.eup %5753  ;;  %v4337_v26 = vmul.f32 %v5752_v29, %v7798_v47  ;;  %4371 = vst [vmem:[%s7914_s18 + $0xb8] sm:$0xff] %v4335_v44 }
 0x77a   : > { %v5756_v56 = vpop.eup %5755  ;;  %v4338_v50 = vmul.f32 %v5754_v63, %v7806_v11  ;;  %4372 = vst [vmem:[%s7914_s18 + $0xc0] sm:$0xff] %v4336_v20 }
 0x77b   : > { %v5758_v5 = vpop.eup %5757  ;;  %v4339_v2 = vmul.f32 %v5756_v56, %v7814_v4  ;;  %4373 = vst [vmem:[%s7914_s18 + $0xc8] sm:$0xff] %v4337_v26 }
 0x77c   : > { %v5760_v9 = vpop.eup %5759  ;;  %v4340_v40 = vmul.f32 %v5758_v5, %v7822_v52  ;;  %4374 = vst [vmem:[%s7914_s18 + $0xd0] sm:$0xff] %v4338_v50  ;;  %v8171_v52 = vld [vmem:[#allocation16_spill] sm:$0xff] }
 0x77d   : > { %v5762_v30 = vpop.eup %5761  ;;  %v4341_v47 = vmul.f32 %v5760_v9, %v7830_v54  ;;  %4375 = vst [vmem:[%s7914_s18 + $0xd8] sm:$0xff] %v4339_v2 }
 0x77e   : > { %v5764_v58 = vpop.eup %5763  ;;  %v4342_v11 = vmul.f32 %v5762_v30, %v8169_v60  ;;  %4376 = vst [vmem:[%s7914_s18 + $0xe0] sm:$0xff] %v4340_v40 }
 0x77f   : > { %v5766_v4 = vpop.eup %5765  ;;  %v4343_v27 = vmul.f32 %v5764_v58, %v8170_v15  ;;  %4377 = vst [vmem:[%s7914_s18 + $0xe8] sm:$0xff] %v4341_v47 }
 0x780   : > { %v5768_v34 = vpop.eup %5767  ;;  %v4344_v14 = vmul.f32 %v5766_v4, %v8171_v52  ;;  %4378 = vst [vmem:[%s7914_s18 + $0xf0] sm:$0xff] %v4342_v11 }
 0x781   : > { %v5770_v57 = vpop.eup %5769  ;;  %v4345_v54 = vmul.f32 %v5768_v34, %v8172_v33  ;;  %4379 = vst [vmem:[%s7914_s18 + $0xf8] sm:$0xff] %v4343_v27 }
 0x782   : > { %v5772_v55 = vpop.eup %5771  ;;  %v4346_v35 = vmul.f32 %v5770_v57, %v8173_v0  ;;  %4380 = vst [vmem:[%s7914_s18 + $0x100] sm:$0xff] %v4344_v14 }
 0x783   : > { %v4347_v1 = vmul.f32 %v5772_v55, %v8174_v23  ;;  %4381 = vst [vmem:[%s7914_s18 + $0x108] sm:$0xff] %v4345_v54 }
 0x784   : > { %4382 = vst [vmem:[%s7914_s18 + $0x110] sm:$0xff] %v4346_v35 }
 0x785   : > { %4383 = vst [vmem:[%s7914_s18 + $0x118] sm:$0x3f] %v4347_v1 }
 0x786 PF: > { %s18_s29 = sadd.s32 1, %s5795_s29   ;;  %s8175_s27 = smov %s5791_s28 }
 0x787   : > { %p15_p5 = scmp.ge.s32.totalorder %s18_s29, 4   ;;  %s8176_s28 = smov %s8178_s30 }
 0x789   :  { %17 = sbr.rel (!%p15_p5) target bundleno = 2 (0x2), region = 108 }

</bundles_post_ra>
